<compile_context>
chip_gen: v7x
topology: tpu7x:2x2x1
jax: 0.10.0
libtpu: 0.0.40
codegen_flags: <defaults>
</compile_context>

<pallas_src>
import functools

import jax
import jax.numpy as jnp
from jax import lax
from jax.experimental import pallas as pl
from jax.experimental.pallas import tpu as pltpu

# ---------------- config (small synthetic sizes) ----------------
HIDDEN = 32          # hidden_size
NUM_EMBED = 64       # num_embeddings
EMBED_DIM = 32       # embedding_dim (== hidden, as in the reference defaults)
NUM_CHANNELS = 3
NUM_HEADS = 8
BN_EPS = 1e-5
# TODO(synk): cfg.tau / cfg.hard come from an external global config in the reference;
# fixed here to tau=1.0, hard=False.
TAU = 1.0
HARD = False


# ======================= Pallas GEMM (+bias, optional fused ReLU / residual) =======================
def _matmul_kernel(a_ref, b_ref, bias_ref, o_ref, *, relu):
    # Single full-K block: one MXU dot, f32 accumulate, f32 epilogue, dtype-cast store.
    acc = jnp.dot(a_ref[...].astype(jnp.bfloat16), b_ref[...],
                  preferred_element_type=jnp.float32)
    acc = acc + bias_ref[...]
    if relu:
        acc = jnp.maximum(acc, 0.0)
    o_ref[...] = acc.astype(o_ref.dtype)


def _matmul_res_kernel(a_ref, b_ref, bias_ref, res_ref, o_ref, *, relu):
    acc = jnp.dot(a_ref[...].astype(jnp.bfloat16), b_ref[...],
                  preferred_element_type=jnp.float32)
    acc = acc + bias_ref[...]
    if relu:
        acc = jnp.maximum(acc, 0.0)
    acc = acc + res_ref[...].astype(jnp.float32)        # fused residual add
    o_ref[...] = acc.astype(o_ref.dtype)


def pallas_matmul(a, b, bias=None, relu=False, residual=None, out_dtype=jnp.float32):
    """(M,K) @ (K,N) + bias[N] (+ optional ReLU, + optional residual), bf16 MXU operands."""
    M, K = a.shape
    K2, N = b.shape
    assert K == K2
    if bias is None:
        bias = jnp.zeros((N,), jnp.float32)
    bias2d = bias.reshape(1, N).astype(jnp.float32)

    # Single full-array block (full-dim rule, no padding). All GEMMs here have M<=512,
    # K<=512 -> working set << VMEM, and the net is launch-overhead bound on 1-TC chips.
    # TODO(synk): on v7x, split M into 2 tiles so both TensorCores get work.
    tm = M
    grid = (M // tm,)

    in_specs = [pl.BlockSpec((tm, K), lambda i: (i, 0)),
                pl.BlockSpec((K, N), lambda i: (0, 0)),
                pl.BlockSpec((1, N), lambda i: (0, 0))]
    args = [a, b, bias2d]
    if residual is not None:
        kernel = functools.partial(_matmul_res_kernel, relu=relu)
        in_specs.append(pl.BlockSpec((tm, N), lambda i: (i, 0)))
        args.append(residual)
    else:
        kernel = functools.partial(_matmul_kernel, relu=relu)

    return pl.pallas_call(
        kernel,
        out_shape=jax.ShapeDtypeStruct((M, N), out_dtype),
        grid_spec=pltpu.PrefetchScalarGridSpec(
            num_scalar_prefetch=0,
            grid=grid,
            in_specs=in_specs,
            out_specs=pl.BlockSpec((tm, N), lambda i: (i, 0)),
        ),
        compiler_params=pltpu.CompilerParams(
            dimension_semantics=("parallel",)),
    )(*args)


# ======================= Pallas attention kernel (all batched heads in one call) =======================
def _attn_kernel(q_ref, k_ref, v_ref, o_ref):
    q = q_ref[...]            # (B*heads, S, dh) bf16
    k = k_ref[...]
    v = v_ref[...]
    # NOTE: no 1/sqrt(d) scaling — matches the reference Transformer module.
    s = jnp.einsum('hqd,hkd->hqk', q, k,
                   preferred_element_type=jnp.float32)          # (BH, S, S) f32
    s = s - jnp.max(s, axis=-1, keepdims=True)
    p = jnp.exp(s)
    p = p * pl.reciprocal(jnp.sum(p, axis=-1, keepdims=True), approx=True)
    o_ref[...] = jnp.einsum('hqk,hkd->hqd', p.astype(jnp.bfloat16), v,
                            preferred_element_type=jnp.float32)


def pallas_attention(q, k, v):
    """q, k, v: (B*heads, S, dh) -> softmax(q k^T) v per head, f32; single grid step."""
    BH, S, dh = q.shape
    # TODO(synk): add flash-style KV tiling before scaling resolution (scores are S^2 in VMEM).
    spec = pl.BlockSpec((BH, S, dh), lambda i: (0, 0, 0))
    return pl.pallas_call(
        _attn_kernel,
        out_shape=jax.ShapeDtypeStruct((BH, S, dh), jnp.float32),
        grid_spec=pltpu.PrefetchScalarGridSpec(
            num_scalar_prefetch=0,
            grid=(1,),
            in_specs=[spec, spec, spec],
            out_specs=spec,
        ),
    )(q.astype(jnp.bfloat16), k.astype(jnp.bfloat16), v.astype(jnp.bfloat16))


# ======================= conv / transposed-conv as Pallas GEMMs (NHWC) =======================
def _im2col_nhwc(x, kh, kw, stride, pad):
    """x: (B,H,W,C) -> patches (B*Ho*Wo, kh*kw*C) flattened as (kh, kw, C)."""
    xp = jnp.pad(x, ((0, 0), (pad, pad), (pad, pad), (0, 0)))
    B, Hp, Wp, C = xp.shape
    Ho = (Hp - kh) // stride + 1
    Wo = (Wp - kw) // stride + 1
    cols = []
    for i in range(kh):
        for j in range(kw):
            cols.append(xp[:, i:i + stride * Ho:stride, j:j + stride * Wo:stride, :])
    cols = jnp.concatenate(cols, axis=-1)                 # (B, Ho, Wo, kh*kw*C)
    return cols.reshape(B * Ho * Wo, kh * kw * C), Ho, Wo


def conv2d(x, w_gemm, b, kh, kw, stride=1, pad=0, relu=False, out_dtype=jnp.float32):
    """Conv2d on NHWC input with a pre-laid-out (kh*kw*Cin, Cout) bf16 GEMM weight."""
    B, H, W, C = x.shape
    if kh == 1 and kw == 1 and stride == 1 and pad == 0:
        cols, Ho, Wo = x.reshape(B * H * W, C), H, W      # 1x1 conv: pure reshape
    else:
        # TODO(synk): im2col is still XLA-side (kh*kw HBM amplification); move it into the
        # GEMM kernel (tap-shifted slices of a VMEM-resident block) before scaling resolution.
        cols, Ho, Wo = _im2col_nhwc(x.astype(jnp.bfloat16), kh, kw, stride, pad)
    out = pallas_matmul(cols, w_gemm, b, relu=relu, out_dtype=out_dtype)
    return out.reshape(B, Ho, Wo, -1)


def conv_transpose2d_phase(x, w_packed, b_packed, cout):
    """ConvTranspose2d(k=4, s=2, p=1) via sub-pixel phase decomposition: a single GEMM over
    the 3x3 windows of the once-padded input, with the 4 output phases packed along N.
    No zero-dilated tensor is materialized and no structural-zero rows are multiplied."""
    B, H, W, C = x.shape
    cols, _, _ = _im2col_nhwc(x.astype(jnp.bfloat16), 3, 3, 1, 1)     # (B*H*W, 9C)
    out = pallas_matmul(cols, w_packed, b_packed)                     # (B*H*W, 4*cout) f32
    out = out.reshape(B, H, W, 2, 2, cout)                            # (..., a, b, cout)
    out = out.transpose(0, 1, 3, 2, 4, 5).reshape(B, 2 * H, 2 * W, cout)
    return out


def _conv_w_gemm(w):
    """PyTorch conv weight (Cout,Cin,kh,kw) -> GEMM layout (kh*kw*Cin, Cout), bf16."""
    Cout, Cin, kh, kw = w.shape
    return w.transpose(2, 3, 1, 0).reshape(kh * kw * Cin, Cout).astype(jnp.bfloat16)


def _convT_w_phase_gemm(wT):
    """PyTorch ConvTranspose2d weight (Cin,Cout,4,4), stride=2, pad=1 -> packed phase GEMM
    weight (3*3*Cin, 4*Cout).  Phase (a,b) (output pixel (2y+a, 2x+b)) occupies columns
    [(2a+b)*Cout : (2a+b+1)*Cout] and its 2x2 taps sit at 3x3-window taps (a+p, b+q)."""
    Cin, Cout, kh, kw = wT.shape
    assert kh == 4 and kw == 4
    wflip = jnp.flip(wT, axis=(-1, -2)).transpose(2, 3, 0, 1)         # (kh,kw,Cin,Cout)
    Wp = jnp.zeros((3, 3, Cin, 4 * Cout), jnp.float32)
    for a in range(2):
        for b in range(2):
            ph = 2 * a + b
            for p_ in range(2):
                for q_ in range(2):
                    Wp = Wp.at[a + p_, b + q_, :, ph * Cout:(ph + 1) * Cout].set(
                        wflip[a + 2 * p_, b + 2 * q_])
    return Wp.reshape(9 * Cin, 4 * Cout).astype(jnp.bfloat16)


# ======================= plain-JAX glue (normalization etc.) =======================
def batch_norm(x):
    """BatchNorm2d in training mode (batch statistics), gamma=1, beta=0; NHWC."""
    mean = jnp.mean(x, axis=(0, 1, 2), keepdims=True)
    var = jnp.var(x, axis=(0, 1, 2), keepdims=True)
    return (x - mean) * lax.rsqrt(var + BN_EPS)


def res_block(x, p, name, bn, out_dtype=jnp.float32):
    B, H, W, C = x.shape
    h = jax.nn.relu(x)
    # ReLU -> Conv3x3 -> [BN -> ReLU | fused ReLU] -> Conv1x1 (+ residual fused in epilogue)
    h = conv2d(h, p[name + '_w1'], p[name + '_b1'], 3, 3, stride=1, pad=1,
               relu=(not bn),
               out_dtype=(jnp.float32 if bn else jnp.bfloat16))
    if bn:
        h = jax.nn.relu(batch_norm(h))
    out = pallas_matmul(h.reshape(B * H * W, C), p[name + '_w2'], p[name + '_b2'],
                        residual=x.reshape(B * H * W, C), out_dtype=out_dtype)
    return out.reshape(B, H, W, C)


def transformer(x, p, name, num_heads):
    B, H, W, C = x.shape
    dh = C // num_heads
    S = H * W
    # fused q/k/v projection: one GEMM (N = 3C), bf16 epilogue feeds attention directly
    qkv = conv2d(x, p[f'{name}_qkv_w'], p[f'{name}_qkv_b'], 1, 1, out_dtype=jnp.bfloat16)
    qkv = qkv.reshape(B, S, 3, num_heads, dh)

    def pick(t):  # == transpose_for_scores, with batch folded into the head axis
        return qkv[:, :, t].transpose(0, 2, 1, 3).reshape(B * num_heads, S, dh)

    ctx = pallas_attention(pick(0), pick(1), pick(2))                 # (B*heads, S, dh) f32
    return ctx.reshape(B, num_heads, S, dh).transpose(0, 2, 1, 3).reshape(B, H, W, C)


def gumbel_softmax(key, logits, tau, hard, axis):
    u = jax.random.uniform(key, logits.shape, jnp.float32,
                           minval=1e-6, maxval=1.0 - 1e-6)
    g = -jnp.log(-jnp.log(u))
    y = jax.nn.softmax((logits + g) / tau, axis=axis)
    if hard:
        idx = jnp.argmax(y, axis=axis)
        y = jax.nn.one_hot(idx, y.shape[axis], axis=axis, dtype=y.dtype)
    return y


# ======================= parameters (weights stored once in GEMM layout, bf16) =======================
def init_params(key, hd=HIDDEN, ne=NUM_EMBED, ed=EMBED_DIM, nc=NUM_CHANNELS):
    keys = iter(jax.random.split(key, 24))
    rnd = lambda shape: 0.2 * jax.random.normal(next(keys), shape, jnp.float32)
    zeros = lambda n: jnp.zeros((n,), jnp.float32)
    p = {}
    # encoder strided convs
    p['enc_c1_w'] = _conv_w_gemm(rnd((hd, nc, 4, 4))); p['enc_c1_b'] = zeros(hd)
    p['enc_c2_w'] = _conv_w_gemm(rnd((hd, hd, 4, 4))); p['enc_c2_b'] = zeros(hd)
    # res blocks
    for name in ['enc_res1', 'enc_res2', 'dec_res1', 'dec_res2']:
        p[name + '_w1'] = _conv_w_gemm(rnd((hd, hd, 3, 3))); p[name + '_b1'] = zeros(hd)
        p[name + '_w2'] = _conv_w_gemm(rnd((hd, hd, 1, 1))); p[name + '_b2'] = zeros(hd)
    # attention q/k/v 1x1 convs, fused along the output-channel axis (hd -> 3*hd)
    for name in ['enc_attn', 'dec_attn']:
        p[f'{name}_qkv_w'] = _conv_w_gemm(rnd((3 * hd, hd, 1, 1)))
        p[f'{name}_qkv_b'] = zeros(3 * hd)
    # decoder transposed convs: PyTorch layout (Cin, Cout, 4, 4) -> packed phase GEMM weight
    p['dec_dc1_w'] = _convT_w_phase_gemm(rnd((hd, hd, 4, 4))); p['dec_dc1_b'] = zeros(4 * hd)
    p['dec_dc2_w'] = _convT_w_phase_gemm(rnd((hd, nc, 4, 4))); p['dec_dc2_b'] = zeros(4 * nc)
    # quantizer
    p['vq_logits_w'] = _conv_w_gemm(rnd((ne, hd, 1, 1))); p['vq_logits_b'] = zeros(ne)
    p['vq_emb'] = (0.2 * jax.random.normal(next(keys), (ne, ed), jnp.float32)
                   ).astype(jnp.bfloat16)
    return p


# ======================= VQ_VAE forward =======================
def vq_vae_forward(params, x, gumbel_key):
    p = params
    xh = x.transpose(0, 2, 3, 1)                                    # NCHW -> NHWC once

    # ----- encoder -----
    h = conv2d(xh, p['enc_c1_w'], p['enc_c1_b'], 4, 4, stride=2, pad=1)
    h = jax.nn.relu(batch_norm(h))
    h = conv2d(h, p['enc_c2_w'], p['enc_c2_b'], 4, 4, stride=2, pad=1)
    h = jax.nn.relu(batch_norm(h))
    # TODO(synk): gamma=1/beta=0 BNs could be folded into the following GEMM's weight/bias
    # (scale along K) to skip the normalize pass; kept explicit for clarity.
    h = res_block(h, p, 'enc_res1', bn=True)
    h = batch_norm(h)
    h = res_block(h, p, 'enc_res2', bn=True)
    h = batch_norm(h)
    h = transformer(h, p, 'enc_attn', NUM_HEADS)
    z_e = batch_norm(h)                                             # NHWC (B,H,W,C)

    # ----- vector quantizer -----
    logits = conv2d(z_e, p['vq_logits_w'], p['vq_logits_b'], 1, 1)  # (B,H,W,NE) f32
    # F.gumbel_softmax default dim=-1 on NCHW logits == softmax over the image-width axis,
    # i.e. axis=2 of this NHWC layout (reference quirk kept; no NCHW relayout needed).
    onehot = gumbel_softmax(gumbel_key, logits, TAU, HARD, axis=2)  # (B,H,W,NE)
    B, H, W, NE = onehot.shape
    q = pallas_matmul(onehot.reshape(-1, NE), p['vq_emb'])          # == 'BNHW,NE->BEHW'
    quantized = q.reshape(B, H, W, -1)                              # NHWC
    # reference does .view(-1, NE).sum(0) on the contiguous NCHW tensor (mixes axes; kept)
    dict_refs = onehot.transpose(0, 3, 1, 2).reshape(-1, NE).sum(0)
    prob = dict_refs / jnp.maximum(jnp.sum(jnp.abs(dict_refs)), 1e-12)
    entr = jnp.where(prob > 0, -prob * jnp.log(prob), 0.0)
    perplexity = jnp.exp(jnp.sum(entr))

    # ----- decoder -----
    d = transformer(quantized, p, 'dec_attn', NUM_HEADS)
    d = batch_norm(d)
    d = res_block(d, p, 'dec_res1', bn=False)
    d = batch_norm(d)
    d = res_block(d, p, 'dec_res2', bn=False, out_dtype=jnp.bfloat16)  # feeds next GEMM
    d = conv_transpose2d_phase(d, p['dec_dc1_w'], p['dec_dc1_b'], HIDDEN)
    d = jax.nn.relu(batch_norm(d))
    d = conv_transpose2d_phase(d, p['dec_dc2_w'], p['dec_dc2_b'], NUM_CHANNELS)
    decoded_x = jnp.tanh(d)                                         # NHWC

    # return NCHW tensors to match the PyTorch module's interface
    return (decoded_x.transpose(0, 3, 1, 2),
            z_e.transpose(0, 3, 1, 2),
            quantized.transpose(0, 3, 1, 2),
            dict_refs, perplexity)


if __name__ == "__main__":
    key = jax.random.PRNGKey(0)
    pkey, xkey, gkey = jax.random.split(key, 3)
    params = init_params(pkey)
    x = jax.random.normal(xkey, (2, NUM_CHANNELS, 16, 16), jnp.float32)

    fwd = jax.jit(vq_vae_forward)
    outs = fwd(params, x, gkey)
    outs = jax.tree_util.tree_map(jax.block_until_ready, outs)

    decoded_x, z_e, quantized, dict_refs, perplexity = outs
    assert decoded_x.shape == (2, NUM_CHANNELS, 16, 16)
    assert z_e.shape == (2, HIDDEN, 4, 4)
    assert quantized.shape == (2, EMBED_DIM, 4, 4)
    assert dict_refs.shape == (NUM_EMBED,)
    assert perplexity.shape == ()
    assert all(bool(jnp.all(jnp.isfinite(o))) for o in
               (decoded_x, z_e, quantized, dict_refs, perplexity))
    print("KERNEL_OK")
</pallas_src>

<mosaic_0001>
module attributes {stable_mosaic.version = 11 : i64} {
  func.func @_matmul_kernel(%arg0: i32, %arg1: memref<128x48xbf16, #tpu.memory_space<vmem>>, %arg2: memref<48x32xbf16, #tpu.memory_space<vmem>>, %arg3: memref<1x32xf32, #tpu.memory_space<vmem>>, %arg4: memref<128x32xf32, #tpu.memory_space<vmem>>) attributes {dimension_semantics = [#tpu.dimension_semantics<parallel>], iteration_bounds = array<i64: 1>, scalar_prefetch = 0 : i64, scratch_operands = 0 : i64, tpu.core_type = #tpu.core_type<tc>, window_params = [{transform_indices = @transform_0, window_bounds = array<i64: 128, 48>}, {pipeline_mode = #tpu.pipeline_mode<synchronous>, transform_indices = @transform_1, window_bounds = array<i64: 48, 32>}, {pipeline_mode = #tpu.pipeline_mode<synchronous>, transform_indices = @transform_2, window_bounds = array<i64: 1, 32>}, {transform_indices = @transform_3, window_bounds = array<i64: 128, 32>}]} {
    %c0 = arith.constant 0 : index
    %c0_0 = arith.constant 0 : index
    %0 = vector.load %arg1[%c0, %c0_0] : memref<128x48xbf16, #tpu.memory_space<vmem>>, vector<128x48xbf16>
    %c0_1 = arith.constant 0 : index
    %c0_2 = arith.constant 0 : index
    %1 = vector.load %arg2[%c0_1, %c0_2] : memref<48x32xbf16, #tpu.memory_space<vmem>>, vector<48x32xbf16>
    %cst = arith.constant dense<0.000000e+00> : vector<128x32xf32>
    %2 = tpu.matmul %0, %1, %cst {dimension_numbers = #tpu.dot_dimension_numbers<[1], [0], [0], [1], [0, 0, 1, 1], [], []>} : vector<128x48xbf16>, vector<48x32xbf16>, vector<128x32xf32> -> vector<128x32xf32>
    %c0_3 = arith.constant 0 : index
    %c0_4 = arith.constant 0 : index
    %3 = vector.load %arg3[%c0_3, %c0_4] : memref<1x32xf32, #tpu.memory_space<vmem>>, vector<1x32xf32>
    %4 = vector.broadcast %3 : vector<1x32xf32> to vector<128x32xf32>
    %5 = arith.addf %2, %4 : vector<128x32xf32>
    %c0_5 = arith.constant 0 : index
    %c0_6 = arith.constant 0 : index
    %6 = vector.load %arg4[%c0_5, %c0_6] : memref<128x32xf32, #tpu.memory_space<vmem>>, vector<128x32xf32>
    tpu.vector_store %arg4[%c0_5, %c0_6], %5 {strides = array<i32>} : memref<128x32xf32, #tpu.memory_space<vmem>>, vector<128x32xf32>,
    return
  }
  func.func @transform_0(%arg0: i32) -> (i32, i32) {
    %c0_i32 = arith.constant 0 : i32
    %c0_i32_0 = arith.constant 0 : i32
    return %arg0, %c0_i32 : i32, i32
  }
  func.func @transform_1(%arg0: i32) -> (i32, i32) {
    %c0_i32 = arith.constant 0 : i32
    %c0_i32_0 = arith.constant 0 : i32
    %c0_i32_1 = arith.constant 0 : i32
    return %c0_i32, %c0_i32_0 : i32, i32
  }
  func.func @transform_2(%arg0: i32) -> (i32, i32) {
    %c0_i32 = arith.constant 0 : i32
    %c0_i32_0 = arith.constant 0 : i32
    %c0_i32_1 = arith.constant 0 : i32
    return %c0_i32, %c0_i32_0 : i32, i32
  }
  func.func @transform_3(%arg0: i32) -> (i32, i32) {
    %c0_i32 = arith.constant 0 : i32
    %c0_i32_0 = arith.constant 0 : i32
    return %arg0, %c0_i32 : i32, i32
  }
}

module attributes {stable_mosaic.version = 11 : i64} {
  func.func @_matmul_kernel(%arg0: i32, %arg1: memref<32x512xbf16, #tpu.memory_space<vmem>>, %arg2: memref<512x32xbf16, #tpu.memory_space<vmem>>, %arg3: memref<1x32xf32, #tpu.memory_space<vmem>>, %arg4: memref<32x32xf32, #tpu.memory_space<vmem>>) attributes {dimension_semantics = [#tpu.dimension_semantics<parallel>], iteration_bounds = array<i64: 1>, scalar_prefetch = 0 : i64, scratch_operands = 0 : i64, tpu.core_type = #tpu.core_type<tc>, window_params = [{transform_indices = @transform_0, window_bounds = array<i64: 32, 512>}, {pipeline_mode = #tpu.pipeline_mode<synchronous>, transform_indices = @transform_1, window_bounds = array<i64: 512, 32>}, {pipeline_mode = #tpu.pipeline_mode<synchronous>, transform_indices = @transform_2, window_bounds = array<i64: 1, 32>}, {transform_indices = @transform_3, window_bounds = array<i64: 32, 32>}]} {
    %c0 = arith.constant 0 : index
    %c0_0 = arith.constant 0 : index
    %0 = vector.load %arg1[%c0, %c0_0] : memref<32x512xbf16, #tpu.memory_space<vmem>>, vector<32x512xbf16>
    %c0_1 = arith.constant 0 : index
    %c0_2 = arith.constant 0 : index
    %1 = vector.load %arg2[%c0_1, %c0_2] : memref<512x32xbf16, #tpu.memory_space<vmem>>, vector<512x32xbf16>
    %cst = arith.constant dense<0.000000e+00> : vector<32x32xf32>
    %2 = tpu.matmul %0, %1, %cst {dimension_numbers = #tpu.dot_dimension_numbers<[1], [0], [0], [1], [0, 0, 1, 1], [], []>} : vector<32x512xbf16>, vector<512x32xbf16>, vector<32x32xf32> -> vector<32x32xf32>
    %c0_3 = arith.constant 0 : index
    %c0_4 = arith.constant 0 : index
    %3 = vector.load %arg3[%c0_3, %c0_4] : memref<1x32xf32, #tpu.memory_space<vmem>>, vector<1x32xf32>
    %4 = vector.broadcast %3 : vector<1x32xf32> to vector<32x32xf32>
    %5 = arith.addf %2, %4 : vector<32x32xf32>
    %c0_5 = arith.constant 0 : index
    %c0_6 = arith.constant 0 : index
    %6 = vector.load %arg4[%c0_5, %c0_6] : memref<32x32xf32, #tpu.memory_space<vmem>>, vector<32x32xf32>
    tpu.vector_store %arg4[%c0_5, %c0_6], %5 {strides = array<i32>} : memref<32x32xf32, #tpu.memory_space<vmem>>, vector<32x32xf32>,
    return
  }
  func.func @transform_0(%arg0: i32) -> (i32, i32) {
    %c0_i32 = arith.constant 0 : i32
    %c0_i32_0 = arith.constant 0 : i32
    return %arg0, %c0_i32 : i32, i32
  }
  func.func @transform_1(%arg0: i32) -> (i32, i32) {
    %c0_i32 = arith.constant 0 : i32
    %c0_i32_0 = arith.constant 0 : i32
    %c0_i32_1 = arith.constant 0 : i32
    return %c0_i32, %c0_i32_0 : i32, i32
  }
  func.func @transform_2(%arg0: i32) -> (i32, i32) {
    %c0_i32 = arith.constant 0 : i32
    %c0_i32_0 = arith.constant 0 : i32
    %c0_i32_1 = arith.constant 0 : i32
    return %c0_i32, %c0_i32_0 : i32, i32
  }
  func.func @transform_3(%arg0: i32) -> (i32, i32) {
    %c0_i32 = arith.constant 0 : i32
    %c0_i32_0 = arith.constant 0 : i32
    return %arg0, %c0_i32 : i32, i32
  }
}

module attributes {stable_mosaic.version = 11 : i64} {
  func.func @_matmul_res_kernel(%arg0: i32, %arg1: memref<32x32xf32, #tpu.memory_space<vmem>>, %arg2: memref<32x32xbf16, #tpu.memory_space<vmem>>, %arg3: memref<1x32xf32, #tpu.memory_space<vmem>>, %arg4: memref<32x32xf32, #tpu.memory_space<vmem>>, %arg5: memref<32x32xf32, #tpu.memory_space<vmem>>) attributes {dimension_semantics = [#tpu.dimension_semantics<parallel>], iteration_bounds = array<i64: 1>, scalar_prefetch = 0 : i64, scratch_operands = 0 : i64, tpu.core_type = #tpu.core_type<tc>, window_params = [{transform_indices = @transform_0, window_bounds = array<i64: 32, 32>}, {pipeline_mode = #tpu.pipeline_mode<synchronous>, transform_indices = @transform_1, window_bounds = array<i64: 32, 32>}, {pipeline_mode = #tpu.pipeline_mode<synchronous>, transform_indices = @transform_2, window_bounds = array<i64: 1, 32>}, {transform_indices = @transform_3, window_bounds = array<i64: 32, 32>}, {transform_indices = @transform_4, window_bounds = array<i64: 32, 32>}]} {
    %c0 = arith.constant 0 : index
    %c0_0 = arith.constant 0 : index
    %0 = vector.load %arg1[%c0, %c0_0] : memref<32x32xf32, #tpu.memory_space<vmem>>, vector<32x32xf32>
    %1 = arith.truncf %0 : vector<32x32xf32> to vector<32x32xbf16>
    %c0_1 = arith.constant 0 : index
    %c0_2 = arith.constant 0 : index
    %2 = vector.load %arg2[%c0_1, %c0_2] : memref<32x32xbf16, #tpu.memory_space<vmem>>, vector<32x32xbf16>
    %cst = arith.constant dense<0.000000e+00> : vector<32x32xf32>
    %3 = tpu.matmul %1, %2, %cst {dimension_numbers = #tpu.dot_dimension_numbers<[1], [0], [0], [1], [0, 0, 1, 1], [], []>} : vector<32x32xbf16>, vector<32x32xbf16>, vector<32x32xf32> -> vector<32x32xf32>
    %c0_3 = arith.constant 0 : index
    %c0_4 = arith.constant 0 : index
    %4 = vector.load %arg3[%c0_3, %c0_4] : memref<1x32xf32, #tpu.memory_space<vmem>>, vector<1x32xf32>
    %5 = vector.broadcast %4 : vector<1x32xf32> to vector<32x32xf32>
    %6 = arith.addf %3, %5 : vector<32x32xf32>
    %c0_5 = arith.constant 0 : index
    %c0_6 = arith.constant 0 : index
    %7 = vector.load %arg4[%c0_5, %c0_6] : memref<32x32xf32, #tpu.memory_space<vmem>>, vector<32x32xf32>
    %8 = arith.addf %6, %7 : vector<32x32xf32>
    %c0_7 = arith.constant 0 : index
    %c0_8 = arith.constant 0 : index
    %9 = vector.load %arg5[%c0_7, %c0_8] : memref<32x32xf32, #tpu.memory_space<vmem>>, vector<32x32xf32>
    tpu.vector_store %arg5[%c0_7, %c0_8], %8 {strides = array<i32>} : memref<32x32xf32, #tpu.memory_space<vmem>>, vector<32x32xf32>,
    return
  }
  func.func @transform_0(%arg0: i32) -> (i32, i32) {
    %c0_i32 = arith.constant 0 : i32
    %c0_i32_0 = arith.constant 0 : i32
    return %arg0, %c0_i32 : i32, i32
  }
  func.func @transform_1(%arg0: i32) -> (i32, i32) {
    %c0_i32 = arith.constant 0 : i32
    %c0_i32_0 = arith.constant 0 : i32
    %c0_i32_1 = arith.constant 0 : i32
    return %c0_i32, %c0_i32_0 : i32, i32
  }
  func.func @transform_2(%arg0: i32) -> (i32, i32) {
    %c0_i32 = arith.constant 0 : i32
    %c0_i32_0 = arith.constant 0 : i32
    %c0_i32_1 = arith.constant 0 : i32
    return %c0_i32, %c0_i32_0 : i32, i32
  }
  func.func @transform_3(%arg0: i32) -> (i32, i32) {
    %c0_i32 = arith.constant 0 : i32
    %c0_i32_0 = arith.constant 0 : i32
    return %arg0, %c0_i32 : i32, i32
  }
  func.func @transform_4(%arg0: i32) -> (i32, i32) {
    %c0_i32 = arith.constant 0 : i32
    %c0_i32_0 = arith.constant 0 : i32
    return %arg0, %c0_i32 : i32, i32
  }
}

module attributes {stable_mosaic.version = 11 : i64} {
  func.func @_matmul_kernel(%arg0: i32, %arg1: memref<32x288xbf16, #tpu.memory_space<vmem>>, %arg2: memref<288x32xbf16, #tpu.memory_space<vmem>>, %arg3: memref<1x32xf32, #tpu.memory_space<vmem>>, %arg4: memref<32x32xf32, #tpu.memory_space<vmem>>) attributes {dimension_semantics = [#tpu.dimension_semantics<parallel>], iteration_bounds = array<i64: 1>, scalar_prefetch = 0 : i64, scratch_operands = 0 : i64, tpu.core_type = #tpu.core_type<tc>, window_params = [{transform_indices = @transform_0, window_bounds = array<i64: 32, 288>}, {pipeline_mode = #tpu.pipeline_mode<synchronous>, transform_indices = @transform_1, window_bounds = array<i64: 288, 32>}, {pipeline_mode = #tpu.pipeline_mode<synchronous>, transform_indices = @transform_2, window_bounds = array<i64: 1, 32>}, {transform_indices = @transform_3, window_bounds = array<i64: 32, 32>}]} {
    %c0 = arith.constant 0 : index
    %c0_0 = arith.constant 0 : index
    %0 = vector.load %arg1[%c0, %c0_0] : memref<32x288xbf16, #tpu.memory_space<vmem>>, vector<32x288xbf16>
    %c0_1 = arith.constant 0 : index
    %c0_2 = arith.constant 0 : index
    %1 = vector.load %arg2[%c0_1, %c0_2] : memref<288x32xbf16, #tpu.memory_space<vmem>>, vector<288x32xbf16>
    %cst = arith.constant dense<0.000000e+00> : vector<32x32xf32>
    %2 = tpu.matmul %0, %1, %cst {dimension_numbers = #tpu.dot_dimension_numbers<[1], [0], [0], [1], [0, 0, 1, 1], [], []>} : vector<32x288xbf16>, vector<288x32xbf16>, vector<32x32xf32> -> vector<32x32xf32>
    %c0_3 = arith.constant 0 : index
    %c0_4 = arith.constant 0 : index
    %3 = vector.load %arg3[%c0_3, %c0_4] : memref<1x32xf32, #tpu.memory_space<vmem>>, vector<1x32xf32>
    %4 = vector.broadcast %3 : vector<1x32xf32> to vector<32x32xf32>
    %5 = arith.addf %2, %4 : vector<32x32xf32>
    %c0_5 = arith.constant 0 : index
    %c0_6 = arith.constant 0 : index
    %6 = vector.load %arg4[%c0_5, %c0_6] : memref<32x32xf32, #tpu.memory_space<vmem>>, vector<32x32xf32>
    tpu.vector_store %arg4[%c0_5, %c0_6], %5 {strides = array<i32>} : memref<32x32xf32, #tpu.memory_space<vmem>>, vector<32x32xf32>,
    return
  }
  func.func @transform_0(%arg0: i32) -> (i32, i32) {
    %c0_i32 = arith.constant 0 : i32
    %c0_i32_0 = arith.constant 0 : i32
    return %arg0, %c0_i32 : i32, i32
  }
  func.func @transform_1(%arg0: i32) -> (i32, i32) {
    %c0_i32 = arith.constant 0 : i32
    %c0_i32_0 = arith.constant 0 : i32
    %c0_i32_1 = arith.constant 0 : i32
    return %c0_i32, %c0_i32_0 : i32, i32
  }
  func.func @transform_2(%arg0: i32) -> (i32, i32) {
    %c0_i32 = arith.constant 0 : i32
    %c0_i32_0 = arith.constant 0 : i32
    %c0_i32_1 = arith.constant 0 : i32
    return %c0_i32, %c0_i32_0 : i32, i32
  }
  func.func @transform_3(%arg0: i32) -> (i32, i32) {
    %c0_i32 = arith.constant 0 : i32
    %c0_i32_0 = arith.constant 0 : i32
    return %arg0, %c0_i32 : i32, i32
  }
}

module attributes {stable_mosaic.version = 11 : i64} {
  func.func @_matmul_kernel(%arg0: i32, %arg1: memref<32x32xf32, #tpu.memory_space<vmem>>, %arg2: memref<32x96xbf16, #tpu.memory_space<vmem>>, %arg3: memref<1x96xf32, #tpu.memory_space<vmem>>, %arg4: memref<32x96xbf16, #tpu.memory_space<vmem>>) attributes {dimension_semantics = [#tpu.dimension_semantics<parallel>], iteration_bounds = array<i64: 1>, scalar_prefetch = 0 : i64, scratch_operands = 0 : i64, tpu.core_type = #tpu.core_type<tc>, window_params = [{transform_indices = @transform_0, window_bounds = array<i64: 32, 32>}, {pipeline_mode = #tpu.pipeline_mode<synchronous>, transform_indices = @transform_1, window_bounds = array<i64: 32, 96>}, {pipeline_mode = #tpu.pipeline_mode<synchronous>, transform_indices = @transform_2, window_bounds = array<i64: 1, 96>}, {transform_indices = @transform_3, window_bounds = array<i64: 32, 96>}]} {
    %c0 = arith.constant 0 : index
    %c0_0 = arith.constant 0 : index
    %0 = vector.load %arg1[%c0, %c0_0] : memref<32x32xf32, #tpu.memory_space<vmem>>, vector<32x32xf32>
    %1 = arith.truncf %0 : vector<32x32xf32> to vector<32x32xbf16>
    %c0_1 = arith.constant 0 : index
    %c0_2 = arith.constant 0 : index
    %2 = vector.load %arg2[%c0_1, %c0_2] : memref<32x96xbf16, #tpu.memory_space<vmem>>, vector<32x96xbf16>
    %cst = arith.constant dense<0.000000e+00> : vector<32x96xf32>
    %3 = tpu.matmul %1, %2, %cst {dimension_numbers = #tpu.dot_dimension_numbers<[1], [0], [0], [1], [0, 0, 1, 1], [], []>} : vector<32x32xbf16>, vector<32x96xbf16>, vector<32x96xf32> -> vector<32x96xf32>
    %c0_3 = arith.constant 0 : index
    %c0_4 = arith.constant 0 : index
    %4 = vector.load %arg3[%c0_3, %c0_4] : memref<1x96xf32, #tpu.memory_space<vmem>>, vector<1x96xf32>
    %5 = vector.broadcast %4 : vector<1x96xf32> to vector<32x96xf32>
    %6 = arith.addf %3, %5 : vector<32x96xf32>
    %7 = arith.truncf %6 : vector<32x96xf32> to vector<32x96xbf16>
    %c0_5 = arith.constant 0 : index
    %c0_6 = arith.constant 0 : index
    %8 = vector.load %arg4[%c0_5, %c0_6] : memref<32x96xbf16, #tpu.memory_space<vmem>>, vector<32x96xbf16>
    tpu.vector_store %arg4[%c0_5, %c0_6], %7 {strides = array<i32>} : memref<32x96xbf16, #tpu.memory_space<vmem>>, vector<32x96xbf16>,
    return
  }
  func.func @transform_0(%arg0: i32) -> (i32, i32) {
    %c0_i32 = arith.constant 0 : i32
    %c0_i32_0 = arith.constant 0 : i32
    return %arg0, %c0_i32 : i32, i32
  }
  func.func @transform_1(%arg0: i32) -> (i32, i32) {
    %c0_i32 = arith.constant 0 : i32
    %c0_i32_0 = arith.constant 0 : i32
    %c0_i32_1 = arith.constant 0 : i32
    return %c0_i32, %c0_i32_0 : i32, i32
  }
  func.func @transform_2(%arg0: i32) -> (i32, i32) {
    %c0_i32 = arith.constant 0 : i32
    %c0_i32_0 = arith.constant 0 : i32
    %c0_i32_1 = arith.constant 0 : i32
    return %c0_i32, %c0_i32_0 : i32, i32
  }
  func.func @transform_3(%arg0: i32) -> (i32, i32) {
    %c0_i32 = arith.constant 0 : i32
    %c0_i32_0 = arith.constant 0 : i32
    return %arg0, %c0_i32 : i32, i32
  }
}

module attributes {stable_mosaic.version = 11 : i64} {
  func.func @_attn_kernel(%arg0: i32, %arg1: memref<16x16x4xbf16, #tpu.memory_space<vmem>>, %arg2: memref<16x16x4xbf16, #tpu.memory_space<vmem>>, %arg3: memref<16x16x4xbf16, #tpu.memory_space<vmem>>, %arg4: memref<16x16x4xf32, #tpu.memory_space<vmem>>) attributes {dimension_semantics = [#tpu.dimension_semantics<arbitrary>], iteration_bounds = array<i64: 1>, scalar_prefetch = 0 : i64, scratch_operands = 0 : i64, tpu.core_type = #tpu.core_type<tc>, window_params = [{pipeline_mode = #tpu.pipeline_mode<synchronous>, transform_indices = @transform_0, window_bounds = array<i64: 16, 16, 4>}, {pipeline_mode = #tpu.pipeline_mode<synchronous>, transform_indices = @transform_1, window_bounds = array<i64: 16, 16, 4>}, {pipeline_mode = #tpu.pipeline_mode<synchronous>, transform_indices = @transform_2, window_bounds = array<i64: 16, 16, 4>}, {pipeline_mode = #tpu.pipeline_mode<synchronous>, transform_indices = @transform_3, window_bounds = array<i64: 16, 16, 4>}]} {
    %c0 = arith.constant 0 : index
    %c0_0 = arith.constant 0 : index
    %c0_1 = arith.constant 0 : index
    %0 = vector.load %arg1[%c0, %c0_0, %c0_1] : memref<16x16x4xbf16, #tpu.memory_space<vmem>>, vector<16x16x4xbf16>
    %c0_2 = arith.constant 0 : index
    %c0_3 = arith.constant 0 : index
    %c0_4 = arith.constant 0 : index
    %1 = vector.load %arg2[%c0_2, %c0_3, %c0_4] : memref<16x16x4xbf16, #tpu.memory_space<vmem>>, vector<16x16x4xbf16>
    %c0_5 = arith.constant 0 : index
    %c0_6 = arith.constant 0 : index
    %c0_7 = arith.constant 0 : index
    %2 = vector.load %arg3[%c0_5, %c0_6, %c0_7] : memref<16x16x4xbf16, #tpu.memory_space<vmem>>, vector<16x16x4xbf16>
    "tpu.trace_start"() <{level = 10 : i32, message = "hqd,hkd->hqk"}> : () -> ()
    %cst = arith.constant dense<0.000000e+00> : vector<16x16x16xf32>
    %3 = tpu.matmul %0, %1, %cst {dimension_numbers = #tpu.dot_dimension_numbers<[2], [2], [1], [1], [0, 0, 0, 1, 1, 1], [0], [0]>} : vector<16x16x4xbf16>, vector<16x16x4xbf16>, vector<16x16x16xf32> -> vector<16x16x16xf32>
    "tpu.trace_stop"() : () -> ()
    %cst_8 = arith.constant dense<0xFF800000> : vector<16x16xf32>
    %4 = vector.multi_reduction <maximumf>, %3, %cst_8 [2] : vector<16x16x16xf32> to vector<16x16xf32>
    %5 = vector.shape_cast %4 : vector<16x16xf32> to vector<16x16x1xf32>
    %6 = vector.broadcast %5 : vector<16x16x1xf32> to vector<16x16x16xf32>
    %7 = arith.subf %3, %6 : vector<16x16x16xf32>
    %8 = math.exp %7 : vector<16x16x16xf32>
    %cst_9 = arith.constant dense<0.000000e+00> : vector<16x16xf32>
    %9 = vector.multi_reduction <add>, %8, %cst_9 [2] : vector<16x16x16xf32> to vector<16x16xf32>
    %10 = vector.shape_cast %9 : vector<16x16xf32> to vector<16x16x1xf32>
    %11 = tpu.reciprocal %10 {approx = true} : vector<16x16x1xf32> -> vector<16x16x1xf32>
    %12 = vector.broadcast %11 : vector<16x16x1xf32> to vector<16x16x16xf32>
    %13 = arith.mulf %8, %12 : vector<16x16x16xf32>
    %14 = arith.truncf %13 : vector<16x16x16xf32> to vector<16x16x16xbf16>
    "tpu.trace_start"() <{level = 10 : i32, message = "hqk,hkd->hqd"}> : () -> ()
    %cst_10 = arith.constant dense<0.000000e+00> : vector<16x16x4xf32>
    %15 = tpu.matmul %14, %2, %cst_10 {dimension_numbers = #tpu.dot_dimension_numbers<[2], [1], [1], [2], [0, 0, 0, 1, 1, 2], [0], [0]>} : vector<16x16x16xbf16>, vector<16x16x4xbf16>, vector<16x16x4xf32> -> vector<16x16x4xf32>
    "tpu.trace_stop"() : () -> ()
    %c0_11 = arith.constant 0 : index
    %c0_12 = arith.constant 0 : index
    %c0_13 = arith.constant 0 : index
    %16 = vector.load %arg4[%c0_11, %c0_12, %c0_13] : memref<16x16x4xf32, #tpu.memory_space<vmem>>, vector<16x16x4xf32>
    tpu.vector_store %arg4[%c0_11, %c0_12, %c0_13], %15 {strides = array<i32>} : memref<16x16x4xf32, #tpu.memory_space<vmem>>, vector<16x16x4xf32>,
    return
  }
  func.func @transform_0(%arg0: i32) -> (i32, i32, i32) {
    %c0_i32 = arith.constant 0 : i32
    %c0_i32_0 = arith.constant 0 : i32
    %c0_i32_1 = arith.constant 0 : i32
    %c0_i32_2 = arith.constant 0 : i32
    return %c0_i32, %c0_i32_0, %c0_i32_1 : i32, i32, i32
  }
  func.func @transform_1(%arg0: i32) -> (i32, i32, i32) {
    %c0_i32 = arith.constant 0 : i32
    %c0_i32_0 = arith.constant 0 : i32
    %c0_i32_1 = arith.constant 0 : i32
    %c0_i32_2 = arith.constant 0 : i32
    return %c0_i32, %c0_i32_0, %c0_i32_1 : i32, i32, i32
  }
  func.func @transform_2(%arg0: i32) -> (i32, i32, i32) {
    %c0_i32 = arith.constant 0 : i32
    %c0_i32_0 = arith.constant 0 : i32
    %c0_i32_1 = arith.constant 0 : i32
    %c0_i32_2 = arith.constant 0 : i32
    return %c0_i32, %c0_i32_0, %c0_i32_1 : i32, i32, i32
  }
  func.func @transform_3(%arg0: i32) -> (i32, i32, i32) {
    %c0_i32 = arith.constant 0 : i32
    %c0_i32_0 = arith.constant 0 : i32
    %c0_i32_1 = arith.constant 0 : i32
    %c0_i32_2 = arith.constant 0 : i32
    return %c0_i32, %c0_i32_0, %c0_i32_1 : i32, i32, i32
  }
}

module attributes {stable_mosaic.version = 11 : i64} {
  func.func @_matmul_kernel(%arg0: i32, %arg1: memref<32x32xf32, #tpu.memory_space<vmem>>, %arg2: memref<32x64xbf16, #tpu.memory_space<vmem>>, %arg3: memref<1x64xf32, #tpu.memory_space<vmem>>, %arg4: memref<32x64xf32, #tpu.memory_space<vmem>>) attributes {dimension_semantics = [#tpu.dimension_semantics<parallel>], iteration_bounds = array<i64: 1>, scalar_prefetch = 0 : i64, scratch_operands = 0 : i64, tpu.core_type = #tpu.core_type<tc>, window_params = [{transform_indices = @transform_0, window_bounds = array<i64: 32, 32>}, {pipeline_mode = #tpu.pipeline_mode<synchronous>, transform_indices = @transform_1, window_bounds = array<i64: 32, 64>}, {pipeline_mode = #tpu.pipeline_mode<synchronous>, transform_indices = @transform_2, window_bounds = array<i64: 1, 64>}, {transform_indices = @transform_3, window_bounds = array<i64: 32, 64>}]} {
    %c0 = arith.constant 0 : index
    %c0_0 = arith.constant 0 : index
    %0 = vector.load %arg1[%c0, %c0_0] : memref<32x32xf32, #tpu.memory_space<vmem>>, vector<32x32xf32>
    %1 = arith.truncf %0 : vector<32x32xf32> to vector<32x32xbf16>
    %c0_1 = arith.constant 0 : index
    %c0_2 = arith.constant 0 : index
    %2 = vector.load %arg2[%c0_1, %c0_2] : memref<32x64xbf16, #tpu.memory_space<vmem>>, vector<32x64xbf16>
    %cst = arith.constant dense<0.000000e+00> : vector<32x64xf32>
    %3 = tpu.matmul %1, %2, %cst {dimension_numbers = #tpu.dot_dimension_numbers<[1], [0], [0], [1], [0, 0, 1, 1], [], []>} : vector<32x32xbf16>, vector<32x64xbf16>, vector<32x64xf32> -> vector<32x64xf32>
    %c0_3 = arith.constant 0 : index
    %c0_4 = arith.constant 0 : index
    %4 = vector.load %arg3[%c0_3, %c0_4] : memref<1x64xf32, #tpu.memory_space<vmem>>, vector<1x64xf32>
    %5 = vector.broadcast %4 : vector<1x64xf32> to vector<32x64xf32>
    %6 = arith.addf %3, %5 : vector<32x64xf32>
    %c0_5 = arith.constant 0 : index
    %c0_6 = arith.constant 0 : index
    %7 = vector.load %arg4[%c0_5, %c0_6] : memref<32x64xf32, #tpu.memory_space<vmem>>, vector<32x64xf32>
    tpu.vector_store %arg4[%c0_5, %c0_6], %6 {strides = array<i32>} : memref<32x64xf32, #tpu.memory_space<vmem>>, vector<32x64xf32>,
    return
  }
  func.func @transform_0(%arg0: i32) -> (i32, i32) {
    %c0_i32 = arith.constant 0 : i32
    %c0_i32_0 = arith.constant 0 : i32
    return %arg0, %c0_i32 : i32, i32
  }
  func.func @transform_1(%arg0: i32) -> (i32, i32) {
    %c0_i32 = arith.constant 0 : i32
    %c0_i32_0 = arith.constant 0 : i32
    %c0_i32_1 = arith.constant 0 : i32
    return %c0_i32, %c0_i32_0 : i32, i32
  }
  func.func @transform_2(%arg0: i32) -> (i32, i32) {
    %c0_i32 = arith.constant 0 : i32
    %c0_i32_0 = arith.constant 0 : i32
    %c0_i32_1 = arith.constant 0 : i32
    return %c0_i32, %c0_i32_0 : i32, i32
  }
  func.func @transform_3(%arg0: i32) -> (i32, i32) {
    %c0_i32 = arith.constant 0 : i32
    %c0_i32_0 = arith.constant 0 : i32
    return %arg0, %c0_i32 : i32, i32
  }
}

module attributes {stable_mosaic.version = 11 : i64} {
  func.func @_matmul_kernel(%arg0: i32, %arg1: memref<32x64xf32, #tpu.memory_space<vmem>>, %arg2: memref<64x32xbf16, #tpu.memory_space<vmem>>, %arg3: memref<1x32xf32, #tpu.memory_space<vmem>>, %arg4: memref<32x32xf32, #tpu.memory_space<vmem>>) attributes {dimension_semantics = [#tpu.dimension_semantics<parallel>], iteration_bounds = array<i64: 1>, scalar_prefetch = 0 : i64, scratch_operands = 0 : i64, tpu.core_type = #tpu.core_type<tc>, window_params = [{transform_indices = @transform_0, window_bounds = array<i64: 32, 64>}, {pipeline_mode = #tpu.pipeline_mode<synchronous>, transform_indices = @transform_1, window_bounds = array<i64: 64, 32>}, {pipeline_mode = #tpu.pipeline_mode<synchronous>, transform_indices = @transform_2, window_bounds = array<i64: 1, 32>}, {transform_indices = @transform_3, window_bounds = array<i64: 32, 32>}]} {
    %c0 = arith.constant 0 : index
    %c0_0 = arith.constant 0 : index
    %0 = vector.load %arg1[%c0, %c0_0] : memref<32x64xf32, #tpu.memory_space<vmem>>, vector<32x64xf32>
    %1 = arith.truncf %0 : vector<32x64xf32> to vector<32x64xbf16>
    %c0_1 = arith.constant 0 : index
    %c0_2 = arith.constant 0 : index
    %2 = vector.load %arg2[%c0_1, %c0_2] : memref<64x32xbf16, #tpu.memory_space<vmem>>, vector<64x32xbf16>
    %cst = arith.constant dense<0.000000e+00> : vector<32x32xf32>
    %3 = tpu.matmul %1, %2, %cst {dimension_numbers = #tpu.dot_dimension_numbers<[1], [0], [0], [1], [0, 0, 1, 1], [], []>} : vector<32x64xbf16>, vector<64x32xbf16>, vector<32x32xf32> -> vector<32x32xf32>
    %c0_3 = arith.constant 0 : index
    %c0_4 = arith.constant 0 : index
    %4 = vector.load %arg3[%c0_3, %c0_4] : memref<1x32xf32, #tpu.memory_space<vmem>>, vector<1x32xf32>
    %5 = vector.broadcast %4 : vector<1x32xf32> to vector<32x32xf32>
    %6 = arith.addf %3, %5 : vector<32x32xf32>
    %c0_5 = arith.constant 0 : index
    %c0_6 = arith.constant 0 : index
    %7 = vector.load %arg4[%c0_5, %c0_6] : memref<32x32xf32, #tpu.memory_space<vmem>>, vector<32x32xf32>
    tpu.vector_store %arg4[%c0_5, %c0_6], %6 {strides = array<i32>} : memref<32x32xf32, #tpu.memory_space<vmem>>, vector<32x32xf32>,
    return
  }
  func.func @transform_0(%arg0: i32) -> (i32, i32) {
    %c0_i32 = arith.constant 0 : i32
    %c0_i32_0 = arith.constant 0 : i32
    return %arg0, %c0_i32 : i32, i32
  }
  func.func @transform_1(%arg0: i32) -> (i32, i32) {
    %c0_i32 = arith.constant 0 : i32
    %c0_i32_0 = arith.constant 0 : i32
    %c0_i32_1 = arith.constant 0 : i32
    return %c0_i32, %c0_i32_0 : i32, i32
  }
  func.func @transform_2(%arg0: i32) -> (i32, i32) {
    %c0_i32 = arith.constant 0 : i32
    %c0_i32_0 = arith.constant 0 : i32
    %c0_i32_1 = arith.constant 0 : i32
    return %c0_i32, %c0_i32_0 : i32, i32
  }
  func.func @transform_3(%arg0: i32) -> (i32, i32) {
    %c0_i32 = arith.constant 0 : i32
    %c0_i32_0 = arith.constant 0 : i32
    return %arg0, %c0_i32 : i32, i32
  }
}

module attributes {stable_mosaic.version = 11 : i64} {
  func.func @_matmul_kernel(%arg0: i32, %arg1: memref<32x288xbf16, #tpu.memory_space<vmem>>, %arg2: memref<288x32xbf16, #tpu.memory_space<vmem>>, %arg3: memref<1x32xf32, #tpu.memory_space<vmem>>, %arg4: memref<32x32xbf16, #tpu.memory_space<vmem>>) attributes {dimension_semantics = [#tpu.dimension_semantics<parallel>], iteration_bounds = array<i64: 1>, scalar_prefetch = 0 : i64, scratch_operands = 0 : i64, tpu.core_type = #tpu.core_type<tc>, window_params = [{transform_indices = @transform_0, window_bounds = array<i64: 32, 288>}, {pipeline_mode = #tpu.pipeline_mode<synchronous>, transform_indices = @transform_1, window_bounds = array<i64: 288, 32>}, {pipeline_mode = #tpu.pipeline_mode<synchronous>, transform_indices = @transform_2, window_bounds = array<i64: 1, 32>}, {transform_indices = @transform_3, window_bounds = array<i64: 32, 32>}]} {
    %c0 = arith.constant 0 : index
    %c0_0 = arith.constant 0 : index
    %0 = vector.load %arg1[%c0, %c0_0] : memref<32x288xbf16, #tpu.memory_space<vmem>>, vector<32x288xbf16>
    %c0_1 = arith.constant 0 : index
    %c0_2 = arith.constant 0 : index
    %1 = vector.load %arg2[%c0_1, %c0_2] : memref<288x32xbf16, #tpu.memory_space<vmem>>, vector<288x32xbf16>
    %cst = arith.constant dense<0.000000e+00> : vector<32x32xf32>
    %2 = tpu.matmul %0, %1, %cst {dimension_numbers = #tpu.dot_dimension_numbers<[1], [0], [0], [1], [0, 0, 1, 1], [], []>} : vector<32x288xbf16>, vector<288x32xbf16>, vector<32x32xf32> -> vector<32x32xf32>
    %c0_3 = arith.constant 0 : index
    %c0_4 = arith.constant 0 : index
    %3 = vector.load %arg3[%c0_3, %c0_4] : memref<1x32xf32, #tpu.memory_space<vmem>>, vector<1x32xf32>
    %4 = vector.broadcast %3 : vector<1x32xf32> to vector<32x32xf32>
    %5 = arith.addf %2, %4 : vector<32x32xf32>
    %cst_5 = arith.constant 0.000000e+00 : f32
    %6 = vector.broadcast %cst_5 : f32 to vector<32x32xf32>
    %7 = arith.maximumf %5, %6 : vector<32x32xf32>
    %8 = arith.truncf %7 : vector<32x32xf32> to vector<32x32xbf16>
    %c0_6 = arith.constant 0 : index
    %c0_7 = arith.constant 0 : index
    %9 = vector.load %arg4[%c0_6, %c0_7] : memref<32x32xbf16, #tpu.memory_space<vmem>>, vector<32x32xbf16>
    tpu.vector_store %arg4[%c0_6, %c0_7], %8 {strides = array<i32>} : memref<32x32xbf16, #tpu.memory_space<vmem>>, vector<32x32xbf16>,
    return
  }
  func.func @transform_0(%arg0: i32) -> (i32, i32) {
    %c0_i32 = arith.constant 0 : i32
    %c0_i32_0 = arith.constant 0 : i32
    return %arg0, %c0_i32 : i32, i32
  }
  func.func @transform_1(%arg0: i32) -> (i32, i32) {
    %c0_i32 = arith.constant 0 : i32
    %c0_i32_0 = arith.constant 0 : i32
    %c0_i32_1 = arith.constant 0 : i32
    return %c0_i32, %c0_i32_0 : i32, i32
  }
  func.func @transform_2(%arg0: i32) -> (i32, i32) {
    %c0_i32 = arith.constant 0 : i32
    %c0_i32_0 = arith.constant 0 : i32
    %c0_i32_1 = arith.constant 0 : i32
    return %c0_i32, %c0_i32_0 : i32, i32
  }
  func.func @transform_3(%arg0: i32) -> (i32, i32) {
    %c0_i32 = arith.constant 0 : i32
    %c0_i32_0 = arith.constant 0 : i32
    return %arg0, %c0_i32 : i32, i32
  }
}

module attributes {stable_mosaic.version = 11 : i64} {
  func.func @_matmul_res_kernel(%arg0: i32, %arg1: memref<32x32xbf16, #tpu.memory_space<vmem>>, %arg2: memref<32x32xbf16, #tpu.memory_space<vmem>>, %arg3: memref<1x32xf32, #tpu.memory_space<vmem>>, %arg4: memref<32x32xf32, #tpu.memory_space<vmem>>, %arg5: memref<32x32xbf16, #tpu.memory_space<vmem>>) attributes {dimension_semantics = [#tpu.dimension_semantics<parallel>], iteration_bounds = array<i64: 1>, scalar_prefetch = 0 : i64, scratch_operands = 0 : i64, tpu.core_type = #tpu.core_type<tc>, window_params = [{transform_indices = @transform_0, window_bounds = array<i64: 32, 32>}, {pipeline_mode = #tpu.pipeline_mode<synchronous>, transform_indices = @transform_1, window_bounds = array<i64: 32, 32>}, {pipeline_mode = #tpu.pipeline_mode<synchronous>, transform_indices = @transform_2, window_bounds = array<i64: 1, 32>}, {transform_indices = @transform_3, window_bounds = array<i64: 32, 32>}, {transform_indices = @transform_4, window_bounds = array<i64: 32, 32>}]} {
    %c0 = arith.constant 0 : index
    %c0_0 = arith.constant 0 : index
    %0 = vector.load %arg1[%c0, %c0_0] : memref<32x32xbf16, #tpu.memory_space<vmem>>, vector<32x32xbf16>
    %c0_1 = arith.constant 0 : index
    %c0_2 = arith.constant 0 : index
    %1 = vector.load %arg2[%c0_1, %c0_2] : memref<32x32xbf16, #tpu.memory_space<vmem>>, vector<32x32xbf16>
    %cst = arith.constant dense<0.000000e+00> : vector<32x32xf32>
    %2 = tpu.matmul %0, %1, %cst {dimension_numbers = #tpu.dot_dimension_numbers<[1], [0], [0], [1], [0, 0, 1, 1], [], []>} : vector<32x32xbf16>, vector<32x32xbf16>, vector<32x32xf32> -> vector<32x32xf32>
    %c0_3 = arith.constant 0 : index
    %c0_4 = arith.constant 0 : index
    %3 = vector.load %arg3[%c0_3, %c0_4] : memref<1x32xf32, #tpu.memory_space<vmem>>, vector<1x32xf32>
    %4 = vector.broadcast %3 : vector<1x32xf32> to vector<32x32xf32>
    %5 = arith.addf %2, %4 : vector<32x32xf32>
    %c0_5 = arith.constant 0 : index
    %c0_6 = arith.constant 0 : index
    %6 = vector.load %arg4[%c0_5, %c0_6] : memref<32x32xf32, #tpu.memory_space<vmem>>, vector<32x32xf32>
    %7 = arith.addf %5, %6 : vector<32x32xf32>
    %8 = arith.truncf %7 : vector<32x32xf32> to vector<32x32xbf16>
    %c0_7 = arith.constant 0 : index
    %c0_8 = arith.constant 0 : index
    %9 = vector.load %arg5[%c0_7, %c0_8] : memref<32x32xbf16, #tpu.memory_space<vmem>>, vector<32x32xbf16>
    tpu.vector_store %arg5[%c0_7, %c0_8], %8 {strides = array<i32>} : memref<32x32xbf16, #tpu.memory_space<vmem>>, vector<32x32xbf16>,
    return
  }
  func.func @transform_0(%arg0: i32) -> (i32, i32) {
    %c0_i32 = arith.constant 0 : i32
    %c0_i32_0 = arith.constant 0 : i32
    return %arg0, %c0_i32 : i32, i32
  }
  func.func @transform_1(%arg0: i32) -> (i32, i32) {
    %c0_i32 = arith.constant 0 : i32
    %c0_i32_0 = arith.constant 0 : i32
    %c0_i32_1 = arith.constant 0 : i32
    return %c0_i32, %c0_i32_0 : i32, i32
  }
  func.func @transform_2(%arg0: i32) -> (i32, i32) {
    %c0_i32 = arith.constant 0 : i32
    %c0_i32_0 = arith.constant 0 : i32
    %c0_i32_1 = arith.constant 0 : i32
    return %c0_i32, %c0_i32_0 : i32, i32
  }
  func.func @transform_3(%arg0: i32) -> (i32, i32) {
    %c0_i32 = arith.constant 0 : i32
    %c0_i32_0 = arith.constant 0 : i32
    return %arg0, %c0_i32 : i32, i32
  }
  func.func @transform_4(%arg0: i32) -> (i32, i32) {
    %c0_i32 = arith.constant 0 : i32
    %c0_i32_0 = arith.constant 0 : i32
    return %arg0, %c0_i32 : i32, i32
  }
}

module attributes {stable_mosaic.version = 11 : i64} {
  func.func @_matmul_res_kernel(%arg0: i32, %arg1: memref<32x32xbf16, #tpu.memory_space<vmem>>, %arg2: memref<32x32xbf16, #tpu.memory_space<vmem>>, %arg3: memref<1x32xf32, #tpu.memory_space<vmem>>, %arg4: memref<32x32xf32, #tpu.memory_space<vmem>>, %arg5: memref<32x32xf32, #tpu.memory_space<vmem>>) attributes {dimension_semantics = [#tpu.dimension_semantics<parallel>], iteration_bounds = array<i64: 1>, scalar_prefetch = 0 : i64, scratch_operands = 0 : i64, tpu.core_type = #tpu.core_type<tc>, window_params = [{transform_indices = @transform_0, window_bounds = array<i64: 32, 32>}, {pipeline_mode = #tpu.pipeline_mode<synchronous>, transform_indices = @transform_1, window_bounds = array<i64: 32, 32>}, {pipeline_mode = #tpu.pipeline_mode<synchronous>, transform_indices = @transform_2, window_bounds = array<i64: 1, 32>}, {transform_indices = @transform_3, window_bounds = array<i64: 32, 32>}, {transform_indices = @transform_4, window_bounds = array<i64: 32, 32>}]} {
    %c0 = arith.constant 0 : index
    %c0_0 = arith.constant 0 : index
    %0 = vector.load %arg1[%c0, %c0_0] : memref<32x32xbf16, #tpu.memory_space<vmem>>, vector<32x32xbf16>
    %c0_1 = arith.constant 0 : index
    %c0_2 = arith.constant 0 : index
    %1 = vector.load %arg2[%c0_1, %c0_2] : memref<32x32xbf16, #tpu.memory_space<vmem>>, vector<32x32xbf16>
    %cst = arith.constant dense<0.000000e+00> : vector<32x32xf32>
    %2 = tpu.matmul %0, %1, %cst {dimension_numbers = #tpu.dot_dimension_numbers<[1], [0], [0], [1], [0, 0, 1, 1], [], []>} : vector<32x32xbf16>, vector<32x32xbf16>, vector<32x32xf32> -> vector<32x32xf32>
    %c0_3 = arith.constant 0 : index
    %c0_4 = arith.constant 0 : index
    %3 = vector.load %arg3[%c0_3, %c0_4] : memref<1x32xf32, #tpu.memory_space<vmem>>, vector<1x32xf32>
    %4 = vector.broadcast %3 : vector<1x32xf32> to vector<32x32xf32>
    %5 = arith.addf %2, %4 : vector<32x32xf32>
    %c0_5 = arith.constant 0 : index
    %c0_6 = arith.constant 0 : index
    %6 = vector.load %arg4[%c0_5, %c0_6] : memref<32x32xf32, #tpu.memory_space<vmem>>, vector<32x32xf32>
    %7 = arith.addf %5, %6 : vector<32x32xf32>
    %c0_7 = arith.constant 0 : index
    %c0_8 = arith.constant 0 : index
    %8 = vector.load %arg5[%c0_7, %c0_8] : memref<32x32xf32, #tpu.memory_space<vmem>>, vector<32x32xf32>
    tpu.vector_store %arg5[%c0_7, %c0_8], %7 {strides = array<i32>} : memref<32x32xf32, #tpu.memory_space<vmem>>, vector<32x32xf32>,
    return
  }
  func.func @transform_0(%arg0: i32) -> (i32, i32) {
    %c0_i32 = arith.constant 0 : i32
    %c0_i32_0 = arith.constant 0 : i32
    return %arg0, %c0_i32 : i32, i32
  }
  func.func @transform_1(%arg0: i32) -> (i32, i32) {
    %c0_i32 = arith.constant 0 : i32
    %c0_i32_0 = arith.constant 0 : i32
    %c0_i32_1 = arith.constant 0 : i32
    return %c0_i32, %c0_i32_0 : i32, i32
  }
  func.func @transform_2(%arg0: i32) -> (i32, i32) {
    %c0_i32 = arith.constant 0 : i32
    %c0_i32_0 = arith.constant 0 : i32
    %c0_i32_1 = arith.constant 0 : i32
    return %c0_i32, %c0_i32_0 : i32, i32
  }
  func.func @transform_3(%arg0: i32) -> (i32, i32) {
    %c0_i32 = arith.constant 0 : i32
    %c0_i32_0 = arith.constant 0 : i32
    return %arg0, %c0_i32 : i32, i32
  }
  func.func @transform_4(%arg0: i32) -> (i32, i32) {
    %c0_i32 = arith.constant 0 : i32
    %c0_i32_0 = arith.constant 0 : i32
    return %arg0, %c0_i32 : i32, i32
  }
}

module attributes {stable_mosaic.version = 11 : i64} {
  func.func @_matmul_kernel(%arg0: i32, %arg1: memref<32x288xbf16, #tpu.memory_space<vmem>>, %arg2: memref<288x128xbf16, #tpu.memory_space<vmem>>, %arg3: memref<1x128xf32, #tpu.memory_space<vmem>>, %arg4: memref<32x128xf32, #tpu.memory_space<vmem>>) attributes {dimension_semantics = [#tpu.dimension_semantics<parallel>], iteration_bounds = array<i64: 1>, scalar_prefetch = 0 : i64, scratch_operands = 0 : i64, tpu.core_type = #tpu.core_type<tc>, window_params = [{transform_indices = @transform_0, window_bounds = array<i64: 32, 288>}, {pipeline_mode = #tpu.pipeline_mode<synchronous>, transform_indices = @transform_1, window_bounds = array<i64: 288, 128>}, {pipeline_mode = #tpu.pipeline_mode<synchronous>, transform_indices = @transform_2, window_bounds = array<i64: 1, 128>}, {transform_indices = @transform_3, window_bounds = array<i64: 32, 128>}]} {
    %c0 = arith.constant 0 : index
    %c0_0 = arith.constant 0 : index
    %0 = vector.load %arg1[%c0, %c0_0] : memref<32x288xbf16, #tpu.memory_space<vmem>>, vector<32x288xbf16>
    %c0_1 = arith.constant 0 : index
    %c0_2 = arith.constant 0 : index
    %1 = vector.load %arg2[%c0_1, %c0_2] : memref<288x128xbf16, #tpu.memory_space<vmem>>, vector<288x128xbf16>
    %cst = arith.constant dense<0.000000e+00> : vector<32x128xf32>
    %2 = tpu.matmul %0, %1, %cst {dimension_numbers = #tpu.dot_dimension_numbers<[1], [0], [0], [1], [0, 0, 1, 1], [], []>} : vector<32x288xbf16>, vector<288x128xbf16>, vector<32x128xf32> -> vector<32x128xf32>
    %c0_3 = arith.constant 0 : index
    %c0_4 = arith.constant 0 : index
    %3 = vector.load %arg3[%c0_3, %c0_4] : memref<1x128xf32, #tpu.memory_space<vmem>>, vector<1x128xf32>
    %4 = vector.broadcast %3 : vector<1x128xf32> to vector<32x128xf32>
    %5 = arith.addf %2, %4 : vector<32x128xf32>
    %c0_5 = arith.constant 0 : index
    %c0_6 = arith.constant 0 : index
    %6 = vector.load %arg4[%c0_5, %c0_6] : memref<32x128xf32, #tpu.memory_space<vmem>>, vector<32x128xf32>
    tpu.vector_store %arg4[%c0_5, %c0_6], %5 {strides = array<i32>} : memref<32x128xf32, #tpu.memory_space<vmem>>, vector<32x128xf32>,
    return
  }
  func.func @transform_0(%arg0: i32) -> (i32, i32) {
    %c0_i32 = arith.constant 0 : i32
    %c0_i32_0 = arith.constant 0 : i32
    return %arg0, %c0_i32 : i32, i32
  }
  func.func @transform_1(%arg0: i32) -> (i32, i32) {
    %c0_i32 = arith.constant 0 : i32
    %c0_i32_0 = arith.constant 0 : i32
    %c0_i32_1 = arith.constant 0 : i32
    return %c0_i32, %c0_i32_0 : i32, i32
  }
  func.func @transform_2(%arg0: i32) -> (i32, i32) {
    %c0_i32 = arith.constant 0 : i32
    %c0_i32_0 = arith.constant 0 : i32
    %c0_i32_1 = arith.constant 0 : i32
    return %c0_i32, %c0_i32_0 : i32, i32
  }
  func.func @transform_3(%arg0: i32) -> (i32, i32) {
    %c0_i32 = arith.constant 0 : i32
    %c0_i32_0 = arith.constant 0 : i32
    return %arg0, %c0_i32 : i32, i32
  }
}

module attributes {stable_mosaic.version = 11 : i64} {
  func.func @_matmul_kernel(%arg0: i32, %arg1: memref<128x288xbf16, #tpu.memory_space<vmem>>, %arg2: memref<288x12xbf16, #tpu.memory_space<vmem>>, %arg3: memref<1x12xf32, #tpu.memory_space<vmem>>, %arg4: memref<128x12xf32, #tpu.memory_space<vmem>>) attributes {dimension_semantics = [#tpu.dimension_semantics<parallel>], iteration_bounds = array<i64: 1>, scalar_prefetch = 0 : i64, scratch_operands = 0 : i64, tpu.core_type = #tpu.core_type<tc>, window_params = [{transform_indices = @transform_0, window_bounds = array<i64: 128, 288>}, {pipeline_mode = #tpu.pipeline_mode<synchronous>, transform_indices = @transform_1, window_bounds = array<i64: 288, 12>}, {pipeline_mode = #tpu.pipeline_mode<synchronous>, transform_indices = @transform_2, window_bounds = array<i64: 1, 12>}, {transform_indices = @transform_3, window_bounds = array<i64: 128, 12>}]} {
    %c0 = arith.constant 0 : index
    %c0_0 = arith.constant 0 : index
    %0 = vector.load %arg1[%c0, %c0_0] : memref<128x288xbf16, #tpu.memory_space<vmem>>, vector<128x288xbf16>
    %c0_1 = arith.constant 0 : index
    %c0_2 = arith.constant 0 : index
    %1 = vector.load %arg2[%c0_1, %c0_2] : memref<288x12xbf16, #tpu.memory_space<vmem>>, vector<288x12xbf16>
    %cst = arith.constant dense<0.000000e+00> : vector<128x12xf32>
    %2 = tpu.matmul %0, %1, %cst {dimension_numbers = #tpu.dot_dimension_numbers<[1], [0], [0], [1], [0, 0, 1, 1], [], []>} : vector<128x288xbf16>, vector<288x12xbf16>, vector<128x12xf32> -> vector<128x12xf32>
    %c0_3 = arith.constant 0 : index
    %c0_4 = arith.constant 0 : index
    %3 = vector.load %arg3[%c0_3, %c0_4] : memref<1x12xf32, #tpu.memory_space<vmem>>, vector<1x12xf32>
    %4 = vector.broadcast %3 : vector<1x12xf32> to vector<128x12xf32>
    %5 = arith.addf %2, %4 : vector<128x12xf32>
    %c0_5 = arith.constant 0 : index
    %c0_6 = arith.constant 0 : index
    %6 = vector.load %arg4[%c0_5, %c0_6] : memref<128x12xf32, #tpu.memory_space<vmem>>, vector<128x12xf32>
    tpu.vector_store %arg4[%c0_5, %c0_6], %5 {strides = array<i32>} : memref<128x12xf32, #tpu.memory_space<vmem>>, vector<128x12xf32>,
    return
  }
  func.func @transform_0(%arg0: i32) -> (i32, i32) {
    %c0_i32 = arith.constant 0 : i32
    %c0_i32_0 = arith.constant 0 : i32
    return %arg0, %c0_i32 : i32, i32
  }
  func.func @transform_1(%arg0: i32) -> (i32, i32) {
    %c0_i32 = arith.constant 0 : i32
    %c0_i32_0 = arith.constant 0 : i32
    %c0_i32_1 = arith.constant 0 : i32
    return %c0_i32, %c0_i32_0 : i32, i32
  }
  func.func @transform_2(%arg0: i32) -> (i32, i32) {
    %c0_i32 = arith.constant 0 : i32
    %c0_i32_0 = arith.constant 0 : i32
    %c0_i32_1 = arith.constant 0 : i32
    return %c0_i32, %c0_i32_0 : i32, i32
  }
  func.func @transform_3(%arg0: i32) -> (i32, i32) {
    %c0_i32 = arith.constant 0 : i32
    %c0_i32_0 = arith.constant 0 : i32
    return %arg0, %c0_i32 : i32, i32
  }
}

</mosaic_0001>

<bundles_post_ra>
// kernel: vq_vae_forward.18
= control target key start
LH: loop header
LB: loop body
LE: loop exit
PB: predicated region body
PF: predicated region fallthrough
CT: control target
= control target key end

     0   :  { %vm102_vm0 = vcmask 392192   ;;  %vm224_vm1 = vcmask 261120   ;;  %s443_s1 = inlined_call_operand.vmem [shape: bf16[48,32], index: 1, kind: input, shape index: {}]   ;;  %s444_s0 = inlined_call_operand.vmem [shape: bf16[128,48], index: 0, kind: input, shape index: {}]   ;;  %s445_s2 = inlined_call_operand.vmem [shape: f32[1,32], index: 2, kind: input, shape index: {}]   ;;  %s446_s3 = inlined_call_operand.vmem [shape: f32[128,32], index: 3, kind: output, shape index: {}]  }
   0x1   :  { %v304_v0 = vld [vmem:[%s443_s1] sm:$0xff]   ;;  %v305_v1 = vld [vmem:[%s443_s1 + $0x8] sm:$0xff]   ;;  %v306_v2 = vld [vmem:[%s443_s1 + $0x10] sm:$0xff]  }
   0x2   :  { %276 = vmatprep.subr.bf16.mxu0 %v304_v0  ;;  %298 = vmatprep.subr.bf16.mxu1 %v304_v0  ;;  %v307_v3 = vld [vmem:[%s444_s0] sm:$0xff]   ;;  %v309_v5 = vld [vmem:[%s444_s0 + $0x8] sm:$0xff]   ;;  %v311_v7 = vld [vmem:[%s444_s0 + $0x10] sm:$0xff]  }
   0x3   :  { %277 = vmatpush3.bf16.msra.mxu0 %v304_v0  ;;  %301 = vmatpush3.bf16.msra.mxu1 %v304_v0  ;;  %v308_v4 = vld [vmem:[%s444_s0 + $0x20] sm:$0xff]   ;;  %v310_v6 = vld [vmem:[%s444_s0 + $0x28] sm:$0xff]   ;;  %v312_v8 = vld [vmem:[%s444_s0 + $0x30] sm:$0xff]  }
   0x4   :  { %278 = vmatprep.subr.bf16.mxu0 %v305_v1  ;;  %299 = vmatprep.subr.bf16.mxu1 %v305_v1  ;;  %v313_v9 = vld [vmem:[%s444_s0 + $0x18] sm:$0xff]   ;;  %v245_v11 = vld [vmem:[%s445_s2] ss:$0 sm:$0xff] }
   0x5   :  { %282 = vmatprep.mubr.msk.bf16.mxu0 %vm102_vm0, %v307_v3  ;;  %290 = vmatprep.mubr.msk.bf16.mxu1 %vm102_vm0, %v308_v4  ;;  %v314_v10 = vld [vmem:[%s444_s0 + $0x38] sm:$0xff]  }
   0x7   :  { %279 = vmatpush3.bf16.msra.mxu0 %v305_v1  ;;  %302 = vmatpush3.bf16.msra.mxu1 %v305_v1 }
   0x8   :  { %280 = vmatprep.subr.bf16.mxu0 %v306_v2  ;;  %300 = vmatprep.subr.bf16.mxu1 %v306_v2 }
   0xb   :  { %281 = vmatpush3.bf16.msra.mxu0 %v306_v2  ;;  %303 = vmatpush3.bf16.msra.mxu1 %v306_v2 }
   0xe   :  { %283 = vmatmul.mubr.msk.bf16.vlgmr.msra.gmra.mrb[0].mxu0 %vm102_vm0, %v309_v5  ;;  %291 = vmatmul.mubr.msk.bf16.vlgmr.msra.gmra.mrb[0].mxu1 %vm102_vm0, %v310_v6 }
   0xf   :  { %286 = vmatprep.mubr.msk.bf16.mxu0 %vm102_vm0, %v311_v7  ;;  %294 = vmatprep.mubr.msk.bf16.mxu1 %vm102_vm0, %v312_v8 }
  0x16   :  { %287 = vmatmul.mubr.msk.bf16.gmra.mrb[4].mxu0 %vm102_vm0, %v313_v9  ;;  %295 = vmatmul.mubr.msk.bf16.gmra.mrb[4].mxu1 %vm102_vm0, %v314_v10 }
  0xe1   :  { %v284_v12 = vpop.f32.mrb[0].mxu0  ;;  %v292_v13 = vpop.f32.mrb[0].mxu1 }
  0xe2   :  { %v170_v14 = vadd.f32 %v284_v12, %v245_v11  ;;  %v202_v15 = vadd.f32 %v292_v13, %v245_v11  ;;  %v161_v16 = vpop.f32.mrb[1].mxu0  ;;  %v193_v17 = vpop.f32.mrb[1].mxu1 }
  0xe3   :  { %v162_v18 = vadd.f32 %v245_v11, %v161_v16  ;;  %v194_v19 = vadd.f32 %v245_v11, %v193_v17  ;;  %v285_v20 = vpop.f32.mrb[2].mxu0  ;;  %v293_v21 = vpop.f32.mrb[2].mxu1 }
  0xe4   :  { %227 = vst.msk [vmem:[%s446_s3 + $0x10] sm:$0xff] %vm224_vm1, %v170_v14  ;;  %235 = vst.msk [vmem:[%s446_s3 + $0x50] sm:$0xff] %vm224_vm1, %v202_v15  ;;  %v173_v22 = vadd.f32 %v285_v20, %v245_v11  ;;  %v205_v23 = vadd.f32 %v293_v21, %v245_v11  ;;  %v164_v24 = vpop.f32.mrb[3].mxu0  ;;  %v196_v25 = vpop.f32.mrb[3].mxu1 }
  0xe5   :  { %225 = vst.msk [vmem:[%s446_s3] sm:$0xff] %vm224_vm1, %v162_v18  ;;  %233 = vst.msk [vmem:[%s446_s3 + $0x40] sm:$0xff] %vm224_vm1, %v194_v19  ;;  %v165_v26 = vadd.f32 %v245_v11, %v164_v24  ;;  %v197_v27 = vadd.f32 %v245_v11, %v196_v25 }
  0xe6   :  { %228 = vst.msk [vmem:[%s446_s3 + $0x18] sm:$0xff] %vm224_vm1, %v173_v22  ;;  %236 = vst.msk [vmem:[%s446_s3 + $0x58] sm:$0xff] %vm224_vm1, %v205_v23 }
  0xe7   :  { %226 = vst.msk [vmem:[%s446_s3 + $0x8] sm:$0xff] %vm224_vm1, %v165_v26  ;;  %234 = vst.msk [vmem:[%s446_s3 + $0x48] sm:$0xff] %vm224_vm1, %v197_v27 }
  0xe9   :  { %v288_v28 = vpop.f32.mrb[4].mxu0  ;;  %v296_v29 = vpop.f32.mrb[4].mxu1 }
  0xea   :  { %v186_v30 = vadd.f32 %v288_v28, %v245_v11  ;;  %v218_v31 = vadd.f32 %v296_v29, %v245_v11  ;;  %v177_v32 = vpop.f32.mrb[5].mxu0  ;;  %v209_v33 = vpop.f32.mrb[5].mxu1 }
  0xeb   :  { %v178_v34 = vadd.f32 %v245_v11, %v177_v32  ;;  %v210_v35 = vadd.f32 %v245_v11, %v209_v33  ;;  %v289_v36 = vpop.f32.mrb[6].mxu0  ;;  %v297_v37 = vpop.f32.mrb[6].mxu1 }
  0xec   :  { %231 = vst.msk [vmem:[%s446_s3 + $0x30] sm:$0xff] %vm224_vm1, %v186_v30  ;;  %239 = vst.msk [vmem:[%s446_s3 + $0x70] sm:$0xff] %vm224_vm1, %v218_v31  ;;  %v189_v38 = vadd.f32 %v289_v36, %v245_v11  ;;  %v221_v39 = vadd.f32 %v297_v37, %v245_v11  ;;  %v180_v40 = vpop.f32.mrb[7].mxu0  ;;  %v212_v41 = vpop.f32.mrb[7].mxu1 }
  0xed   :  { %229 = vst.msk [vmem:[%s446_s3 + $0x20] sm:$0xff] %vm224_vm1, %v178_v34  ;;  %237 = vst.msk [vmem:[%s446_s3 + $0x60] sm:$0xff] %vm224_vm1, %v210_v35  ;;  %v181_v42 = vadd.f32 %v245_v11, %v180_v40  ;;  %v213_v43 = vadd.f32 %v245_v11, %v212_v41 }
  0xee   :  { %232 = vst.msk [vmem:[%s446_s3 + $0x38] sm:$0xff] %vm224_vm1, %v189_v38  ;;  %240 = vst.msk [vmem:[%s446_s3 + $0x78] sm:$0xff] %vm224_vm1, %v221_v39 }
  0xef   :  { %230 = vst.msk [vmem:[%s446_s3 + $0x28] sm:$0xff] %vm224_vm1, %v181_v42  ;;  %238 = vst.msk [vmem:[%s446_s3 + $0x68] sm:$0xff] %vm224_vm1, %v213_v43 }

// kernel: vq_vae_forward.19
= control target key start
LH: loop header
LB: loop body
LE: loop exit
PB: predicated region body
PF: predicated region fallthrough
CT: control target
= control target key end

     0   :  { %vm424_vm0 = vcmask 261120   ;;  %s733_s1 = inlined_call_operand.vmem [shape: bf16[512,32], index: 1, kind: input, shape index: {}]   ;;  %s734_s0 = inlined_call_operand.vmem [shape: bf16[32,512], index: 0, kind: input, shape index: {}]   ;;  %s735_s2 = inlined_call_operand.vmem [shape: f32[1,32], index: 2, kind: input, shape index: {}]   ;;  %s736_s3 = inlined_call_operand.vmem [shape: f32[32,32], index: 3, kind: output, shape index: {}]  }
   0x1   :  { %v530_v0 = vld [vmem:[%s733_s1 + $0x40] sm:$0xff]   ;;  %v534_v4 = vld [vmem:[%s733_s1 + $0x48] sm:$0xff]   ;;  %v538_v8 = vld [vmem:[%s733_s1 + $0x50] sm:$0xff]  }
   0x2   :  { %v531_v1 = vld [vmem:[%s733_s1 + $0xc0] sm:$0xff]   ;;  %474 = vmatprep.subr.bf16.mxu0 %v530_v0  ;;  %v535_v5 = vld [vmem:[%s733_s1 + $0xc8] sm:$0xff]   ;;  %v539_v9 = vld [vmem:[%s733_s1 + $0xd0] sm:$0xff]  }
   0x3   :  { %v532_v2 = vld [vmem:[%s733_s1] sm:$0xff]   ;;  %502 = vmatprep.subr.bf16.mxu1 %v531_v1  ;;  %v536_v6 = vld [vmem:[%s733_s1 + $0x8] sm:$0xff]   ;;  %v540_v10 = vld [vmem:[%s733_s1 + $0x10] sm:$0xff]  }
   0x4   :  { %v533_v3 = vld [vmem:[%s733_s1 + $0x80] sm:$0xff]   ;;  %475 = vmatpush3.bf16.msra.mxu0 %v532_v2  ;;  %v537_v7 = vld [vmem:[%s733_s1 + $0x88] sm:$0xff]   ;;  %v541_v11 = vld [vmem:[%s733_s1 + $0x90] sm:$0xff]  }
   0x5   :  { %503 = vmatpush3.bf16.msra.mxu1 %v533_v3  ;;  %476 = vmatprep.subr.bf16.mxu0 %v534_v4  ;;  %v542_v12 = vld [vmem:[%s733_s1 + $0x58] sm:$0xff]   ;;  %v546_v16 = vld [vmem:[%s733_s1 + $0x60] sm:$0xff]   ;;  %v550_v20 = vld [vmem:[%s733_s1 + $0x68] sm:$0xff]  }
   0x6   :  { %504 = vmatprep.subr.bf16.mxu1 %v535_v5  ;;  %v543_v13 = vld [vmem:[%s733_s1 + $0xd8] sm:$0xff]   ;;  %v547_v17 = vld [vmem:[%s733_s1 + $0xe0] sm:$0xff]   ;;  %v551_v21 = vld [vmem:[%s733_s1 + $0xe8] sm:$0xff]  }
   0x7   :  { %v544_v14 = vld [vmem:[%s733_s1 + $0x18] sm:$0xff]   ;;  %v548_v18 = vld [vmem:[%s733_s1 + $0x20] sm:$0xff]   ;;  %v552_v22 = vld [vmem:[%s733_s1 + $0x28] sm:$0xff]  }
   0x8   :  { %477 = vmatpush3.bf16.msra.mxu0 %v536_v6  ;;  %v545_v15 = vld [vmem:[%s733_s1 + $0x98] sm:$0xff]   ;;  %v549_v19 = vld [vmem:[%s733_s1 + $0xa0] sm:$0xff]   ;;  %v553_v23 = vld [vmem:[%s733_s1 + $0xa8] sm:$0xff]  }
   0x9   :  { %505 = vmatpush3.bf16.msra.mxu1 %v537_v7  ;;  %478 = vmatprep.subr.bf16.mxu0 %v538_v8  ;;  %v554_v24 = vld [vmem:[%s733_s1 + $0x70] sm:$0xff]   ;;  %v558_v28 = vld [vmem:[%s733_s1 + $0x78] sm:$0xff]   ;;  %v433_v42 = vld [vmem:[%s735_s2] ss:$0 sm:$0xff] }
   0xa   :  { %506 = vmatprep.subr.bf16.mxu1 %v539_v9  ;;  %v555_v25 = vld [vmem:[%s733_s1 + $0xf0] sm:$0xff]   ;;  %v559_v29 = vld [vmem:[%s733_s1 + $0xf8] sm:$0xff]  }
   0xb   :  { %v556_v26 = vld [vmem:[%s733_s1 + $0x30] sm:$0xff]   ;;  %v560_v30 = vld [vmem:[%s733_s1 + $0x38] sm:$0xff]  }
   0xc   :  { %479 = vmatpush3.bf16.msra.mxu0 %v540_v10  ;;  %v557_v27 = vld [vmem:[%s733_s1 + $0xb0] sm:$0xff]   ;;  %v561_v31 = vld [vmem:[%s733_s1 + $0xb8] sm:$0xff]  }
   0xd   :  { %507 = vmatpush3.bf16.msra.mxu1 %v541_v11  ;;  %480 = vmatprep.subr.bf16.mxu0 %v542_v12  ;;  %v562_v32 = vld [vmem:[%s734_s0] ss:$16 sps:$4 sm:$0xff]   ;;  %v564_v33 = vld [vmem:[%s734_s0 + $0x4] ss:$16 sps:$4 sm:$0xff]   ;;  %v565_v34 = vld [vmem:[%s734_s0 + $0x8] ss:$16 sps:$4 sm:$0xff]  }
   0xe   :  { %508 = vmatprep.subr.bf16.mxu1 %v543_v13  ;;  %v567_v35 = vld [vmem:[%s734_s0 + $0xc] ss:$16 sps:$4 sm:$0xff]   ;;  %358 = vmatprep.mubr.bf16.mxu0 %v564_v33  ;;  %v568_v36 = vld [vmem:[%s734_s0 + $0x24] ss:$16 sps:$4 sm:$0xff]   ;;  %v572_v38 = vld [vmem:[%s734_s0 + $0x20] ss:$16 sps:$4 sm:$0xff]  }
   0xf   :  { %407 = vmatprep.mubr.bf16.mxu1 %v567_v35  ;;  %v570_v37 = vld [vmem:[%s734_s0 + $0x2c] ss:$16 sps:$4 sm:$0xff]   ;;  %v573_v39 = vld [vmem:[%s734_s0 + $0x28] ss:$16 sps:$4 sm:$0xff]  }
  0x10   :  { %481 = vmatpush3.bf16.msra.mxu0 %v544_v14 }
  0x11   :  { %509 = vmatpush3.bf16.msra.mxu1 %v545_v15  ;;  %482 = vmatprep.subr.bf16.mxu0 %v546_v16 }
  0x12   :  { %510 = vmatprep.subr.bf16.mxu1 %v547_v17 }
  0x14   :  { %483 = vmatpush3.bf16.msra.mxu0 %v548_v18 }
  0x15   :  { %511 = vmatpush3.bf16.msra.mxu1 %v549_v19  ;;  %484 = vmatprep.subr.bf16.mxu0 %v550_v20 }
  0x16   :  { %512 = vmatprep.subr.bf16.mxu1 %v551_v21 }
  0x18   :  { %485 = vmatpush3.bf16.msra.mxu0 %v552_v22 }
  0x19   :  { %513 = vmatpush3.bf16.msra.mxu1 %v553_v23  ;;  %486 = vmatprep.subr.bf16.mxu0 %v554_v24 }
  0x1a   :  { %514 = vmatprep.subr.bf16.mxu1 %v555_v25 }
  0x1c   :  { %487 = vmatpush3.bf16.msra.mxu0 %v556_v26 }
  0x1d   :  { %515 = vmatpush3.bf16.msra.mxu1 %v557_v27  ;;  %488 = vmatprep.subr.bf16.mxu0 %v558_v28 }
  0x1e   :  { %516 = vmatprep.subr.bf16.mxu1 %v559_v29 }
  0x20   :  { %489 = vmatpush3.bf16.msra.mxu0 %v560_v30 }
  0x21   :  { %517 = vmatpush3.bf16.msra.mxu1 %v561_v31 }
  0x23   :  { %359 = vmatmul.mubr.bf16.vlgmr.msra.gmra.mrb[0].mxu0 %v562_v32 }
  0x24   :  { %408 = vmatmul.mubr.bf16.vlgmr.msra.gmra.mrb[0].mxu1 %v565_v34  ;;  %366 = vmatprep.mubr.bf16.mxu0 %v568_v36 }
  0x25   :  { %415 = vmatprep.mubr.bf16.mxu1 %v570_v37 }
  0x2b   :  { %367 = vmatmul.mubr.bf16.gmra.mrb[4].mxu0 %v572_v38 }
  0x2c   :  { %416 = vmatmul.mubr.bf16.gmra.mrb[4].mxu1 %v573_v39 }
  0xf6   :  { %v490_v40 = vpop.f32.mrb[0].mxu0 }
  0xf7   :  { %v518_v41 = vpop.f32.mrb[0].mxu1  ;;  %v491_v43 = vpop.f32.mrb[1].mxu0 }
  0xf8   :  { %v492_v44 = vadd.f32 %v491_v43, %v490_v40  ;;  %v519_v45 = vpop.f32.mrb[1].mxu1  ;;  %v493_v46 = vpop.f32.mrb[2].mxu0 }
  0xf9   :  { %v520_v47 = vadd.f32 %v519_v45, %v518_v41  ;;  %v521_v48 = vpop.f32.mrb[2].mxu1  ;;  %v494_v49 = vpop.f32.mrb[3].mxu0 }
  0xfa   :  { %v361_v50 = vadd.f32 %v492_v44, %v433_v42  ;;  %v495_v51 = vadd.f32 %v494_v49, %v493_v46  ;;  %v522_v52 = vpop.f32.mrb[3].mxu1 }
  0xfb   :  { %v523_v53 = vadd.f32 %v522_v52, %v521_v48 }
  0xfc   :  { %v410_v54 = vadd.f32 %v520_v47, %v361_v50  ;;  %v364_v55 = vadd.f32 %v495_v51, %v433_v42 }
  0xfe   :  { %425 = vst.msk [vmem:[%s736_s3] sm:$0xff] %vm424_vm0, %v410_v54  ;;  %v413_v56 = vadd.f32 %v523_v53, %v364_v55  ;;  %v496_v57 = vpop.f32.mrb[4].mxu0 }
  0xff   :  { %v524_v58 = vpop.f32.mrb[4].mxu1  ;;  %v497_v59 = vpop.f32.mrb[5].mxu0 }
 0x100   :  { %426 = vst.msk [vmem:[%s736_s3 + $0x8] sm:$0xff] %vm424_vm0, %v413_v56  ;;  %v498_v60 = vadd.f32 %v497_v59, %v496_v57  ;;  %v525_v61 = vpop.f32.mrb[5].mxu1  ;;  %v499_v62 = vpop.f32.mrb[6].mxu0 }
 0x101   :  { %v526_v63 = vadd.f32 %v525_v61, %v524_v58  ;;  %v527_v0 = vpop.f32.mrb[6].mxu1  ;;  %v500_v1 = vpop.f32.mrb[7].mxu0 }
 0x102   :  { %v369_v2 = vadd.f32 %v498_v60, %v433_v42  ;;  %v501_v3 = vadd.f32 %v500_v1, %v499_v62  ;;  %v528_v4 = vpop.f32.mrb[7].mxu1 }
 0x103   :  { %v529_v5 = vadd.f32 %v528_v4, %v527_v0 }
 0x104   :  { %v418_v6 = vadd.f32 %v526_v63, %v369_v2  ;;  %v372_v7 = vadd.f32 %v501_v3, %v433_v42 }
 0x106   :  { %427 = vst.msk [vmem:[%s736_s3 + $0x10] sm:$0xff] %vm424_vm0, %v418_v6  ;;  %v421_v8 = vadd.f32 %v529_v5, %v372_v7 }
 0x108   :  { %428 = vst.msk [vmem:[%s736_s3 + $0x18] sm:$0xff] %vm424_vm0, %v421_v8 }

// kernel: vq_vae_forward.21
= control target key start
LH: loop header
LB: loop body
LE: loop exit
PB: predicated region body
PF: predicated region fallthrough
CT: control target
= control target key end

     0   :  { %vm47_vm0 = vcmask 261120   ;;  %s214_s1 = inlined_call_operand.vmem [shape: bf16[32,32], index: 1, kind: input, shape index: {}]   ;;  %s215_s0 = inlined_call_operand.vmem [shape: f32[32,32], index: 0, kind: input, shape index: {}]   ;;  %s216_s2 = inlined_call_operand.vmem [shape: f32[1,32], index: 2, kind: input, shape index: {}]   ;;  %s217_s3 = inlined_call_operand.vmem [shape: f32[32,32], index: 3, kind: input, shape index: {}]   ;;  %s218_s4 = inlined_call_operand.vmem [shape: f32[32,32], index: 4, kind: output, shape index: {}]  }
   0x1   :  { %v136_v0 = vld [vmem:[%s214_s1] sm:$0xff]   ;;  %v137_v1 = vld [vmem:[%s214_s1 + $0x8] sm:$0xff]   ;;  %v20_v5 = vld [vmem:[%s215_s0 + $0x10] sm:$0xff] }
   0x2   :  { %128 = vmatprep.subr.bf16.mxu0 %v136_v0  ;;  %v18_v2 = vld [vmem:[%s215_s0] sm:$0xff]  ;;  %v19_v3 = vld [vmem:[%s215_s0 + $0x8] sm:$0xff]  ;;  %v21_v6 = vld [vmem:[%s215_s0 + $0x18] sm:$0xff] }
   0x3   :  { %129 = vmatpush3.bf16.msra.mxu0 %v136_v0  ;;  %v22_v4 = vpack.c.bf16 %v19_v3, %v18_v2  ;;  %v23_v7 = vpack.c.bf16 %v21_v6, %v20_v5  ;;  %v119_v8 = vld [vmem:[%s216_s2] ss:$0 sm:$0xff]  ;;  %v105_v10 = vld [vmem:[%s217_s3 + $0x10] sm:$0xff]  ;;  %v106_v16 = vld [vmem:[%s217_s3 + $0x18] sm:$0xff] }
   0x4   :  { %130 = vmatprep.subr.bf16.mxu0 %v137_v1  ;;  %v103_v13 = vld [vmem:[%s217_s3] sm:$0xff]  ;;  %v104_v20 = vld [vmem:[%s217_s3 + $0x8] sm:$0xff] }
   0x5   :  { %132 = vmatprep.mubr.msk.bf16.mxu0 %vm47_vm0, %v22_v4 }
   0x7   :  { %131 = vmatpush3.bf16.msra.mxu0 %v137_v1 }
   0xa   :  { %133 = vmatmul.mubr.msk.bf16.vlgmr.msra.gmra.mrb[0].mxu0 %vm47_vm0, %v23_v7 }
  0xdd   :  { %v134_v9 = vpop.f32.mrb[0].mxu0 }
  0xde   :  { %v97_v11 = vadd.f32 %v134_v9, %v119_v8  ;;  %v88_v12 = vpop.f32.mrb[1].mxu0 }
  0xdf   :  { %v89_v14 = vadd.f32 %v119_v8, %v88_v12  ;;  %v135_v15 = vpop.f32.mrb[2].mxu0 }
  0xe0   :  { %v109_v17 = vadd.f32 %v105_v10, %v97_v11  ;;  %v100_v18 = vadd.f32 %v135_v15, %v119_v8  ;;  %v91_v19 = vpop.f32.mrb[3].mxu0 }
  0xe1   :  { %v107_v21 = vadd.f32 %v103_v13, %v89_v14  ;;  %v92_v22 = vadd.f32 %v119_v8, %v91_v19 }
  0xe2   :  { %113 = vst.msk [vmem:[%s218_s4 + $0x10] sm:$0xff] %vm47_vm0, %v109_v17  ;;  %v110_v23 = vadd.f32 %v106_v16, %v100_v18 }
  0xe3   :  { %111 = vst.msk [vmem:[%s218_s4] sm:$0xff] %vm47_vm0, %v107_v21  ;;  %v108_v24 = vadd.f32 %v104_v20, %v92_v22 }
  0xe4   :  { %114 = vst.msk [vmem:[%s218_s4 + $0x18] sm:$0xff] %vm47_vm0, %v110_v23 }
  0xe5   :  { %112 = vst.msk [vmem:[%s218_s4 + $0x8] sm:$0xff] %vm47_vm0, %v108_v24 }

// kernel: vq_vae_forward.20
= control target key start
LH: loop header
LB: loop body
LE: loop exit
PB: predicated region body
PF: predicated region fallthrough
CT: control target
= control target key end

     0   :  { %vm204_vm0 = vcmask 261120   ;;  %s523_s1 = inlined_call_operand.vmem [shape: bf16[288,32], index: 1, kind: input, shape index: {}]   ;;  %s524_s0 = inlined_call_operand.vmem [shape: bf16[32,288], index: 0, kind: input, shape index: {}]   ;;  %s525_s2 = inlined_call_operand.vmem [shape: f32[1,32], index: 2, kind: input, shape index: {}]   ;;  %s526_s3 = inlined_call_operand.vmem [shape: f32[32,32], index: 3, kind: output, shape index: {}]  }
   0x1   :  { %v384_v0 = vld [vmem:[%s523_s1 + $0x40] sm:$0xff]   ;;  %v386_v2 = vld [vmem:[%s523_s1 + $0x48] sm:$0xff]   ;;  %v388_v4 = vld [vmem:[%s523_s1 + $0x50] sm:$0xff]  }
   0x2   :  { %v385_v1 = vld [vmem:[%s523_s1] sm:$0xff]   ;;  %344 = vmatprep.subr.bf16.mxu0 %v384_v0  ;;  %v387_v3 = vld [vmem:[%s523_s1 + $0x8] sm:$0xff]   ;;  %v389_v5 = vld [vmem:[%s523_s1 + $0x10] sm:$0xff]  }
   0x3   :  { %345 = vmatpush3.bf16.msra.mxu0 %v385_v1  ;;  %v390_v6 = vld [vmem:[%s523_s1 + $0x58] sm:$0xff]   ;;  %v392_v8 = vld [vmem:[%s523_s1 + $0x60] sm:$0xff]   ;;  %v394_v11 = vld [vmem:[%s523_s1 + $0x68] sm:$0xff]  }
   0x4   :  { %346 = vmatprep.subr.bf16.mxu0 %v386_v2  ;;  %v391_v7 = vld [vmem:[%s523_s1 + $0x18] sm:$0xff]   ;;  %v393_v9 = vld [vmem:[%s523_s1 + $0x20] sm:$0xff]   ;;  %v395_v12 = vld [vmem:[%s523_s1 + $0x28] sm:$0xff]  }
   0x5   :  { %v399_v10 = vld [vmem:[%s523_s1 + $0x80] sm:$0xff]   ;;  %v396_v13 = vld [vmem:[%s523_s1 + $0x70] sm:$0xff]   ;;  %v404_v15 = vld [vmem:[%s523_s1 + $0x88] sm:$0xff]  }
   0x6   :  { %376 = vmatprep.subr.bf16.mxu1 %v399_v10  ;;  %v403_v14 = vld [vmem:[%s524_s0 + $0x4] ss:$12 sps:$4 sm:$0xff]   ;;  %v405_v16 = vld [vmem:[%s524_s0 + $0x8] ss:$12 sps:$4 sm:$0xff]   ;;  %v406_v17 = vld [vmem:[%s524_s0 + $0x20] ss:$12 sps:$4 sm:$0xff]  }
   0x7   :  { %347 = vmatpush3.bf16.msra.mxu0 %v387_v3  ;;  %377 = vmatpush3.bf16.msra.mxu1 %v399_v10  ;;  %v397_v18 = vld [vmem:[%s523_s1 + $0x30] sm:$0xff]   ;;  %v398_v19 = vld [vmem:[%s523_s1 + $0x78] sm:$0xff]   ;;  %v401_v21 = vld [vmem:[%s524_s0] ss:$12 sps:$4 sm:$0xff]  }
   0x8   :  { %348 = vmatprep.subr.bf16.mxu0 %v388_v4  ;;  %243 = vmatprep.mubr.bf16.mxu0 %v403_v14  ;;  %v400_v20 = vld [vmem:[%s523_s1 + $0x38] sm:$0xff]   ;;  %v317_v30 = vld [vmem:[%s525_s2] ss:$0 sm:$0xff] }
   0x9   :  { %378 = vmatprep.subr.bf16.mxu1 %v404_v15  ;;  %380 = vmatprep.mubr.msk.bf16.mxu1 %vm204_vm0, %v405_v16  ;;  %v407_v22 = vld [vmem:[%s524_s0 + $0x1c] ss:$12 sps:$4 sm:$0xff]   ;;  %v409_v23 = vld [vmem:[%s524_s0 + $0x18] ss:$12 sps:$4 sm:$0xff]  }
   0xb   :  { %349 = vmatpush3.bf16.msra.mxu0 %v389_v5  ;;  %379 = vmatpush3.bf16.msra.mxu1 %v404_v15 }
   0xc   :  { %350 = vmatprep.subr.bf16.mxu0 %v390_v6 }
   0xe   :  { %381 = vmatmul.mubr.msk.bf16.vlgmr.msra.gmra.mrb[0].mxu1 %vm204_vm0, %v406_v17 }
   0xf   :  { %351 = vmatpush3.bf16.msra.mxu0 %v391_v7 }
  0x10   :  { %352 = vmatprep.subr.bf16.mxu0 %v392_v8 }
  0x13   :  { %353 = vmatpush3.bf16.msra.mxu0 %v393_v9 }
  0x14   :  { %354 = vmatprep.subr.bf16.mxu0 %v394_v11 }
  0x17   :  { %355 = vmatpush3.bf16.msra.mxu0 %v395_v12 }
  0x18   :  { %356 = vmatprep.subr.bf16.mxu0 %v396_v13 }
  0x1b   :  { %357 = vmatpush3.bf16.msra.mxu0 %v397_v18 }
  0x1c   :  { %358 = vmatprep.subr.bf16.mxu0 %v398_v19 }
  0x1f   :  { %359 = vmatpush3.bf16.msra.mxu0 %v400_v20 }
  0x22   :  { %244 = vmatmul.mubr.bf16.vlgmr.msra.gmra.mrb[0].mxu0 %v401_v21 }
  0x23   :  { %251 = vmatprep.mubr.bf16.mxu0 %v407_v22 }
  0x2a   :  { %252 = vmatmul.mubr.bf16.gmra.mrb[4].mxu0 %v409_v23 }
  0xe1   :  { %v382_v24 = vpop.f32.mrb[0].mxu1 }
  0xe2   :  { %v294_v25 = vpop.f32.mrb[1].mxu1 }
  0xe3   :  { %v383_v26 = vpop.f32.mrb[2].mxu1 }
  0xe4   :  { %v297_v27 = vpop.f32.mrb[3].mxu1 }
  0xf5   :  { %v360_v28 = vpop.f32.mrb[0].mxu0 }
  0xf6   :  { %v361_v29 = vpop.f32.mrb[1].mxu0 }
  0xf7   :  { %v362_v31 = vadd.f32 %v361_v29, %v360_v28  ;;  %v363_v32 = vpop.f32.mrb[2].mxu0 }
  0xf8   :  { %v364_v33 = vpop.f32.mrb[3].mxu0 }
  0xf9   :  { %v365_v34 = vadd.f32 %v364_v33, %v363_v32  ;;  %v246_v35 = vadd.f32 %v362_v31, %v317_v30 }
  0xfb   :  { %v295_v36 = vadd.f32 %v294_v25, %v246_v35  ;;  %v249_v37 = vadd.f32 %v365_v34, %v317_v30 }
  0xfd   :  { %309 = vst.msk [vmem:[%s526_s3] sm:$0xff] %vm204_vm0, %v295_v36  ;;  %v298_v38 = vadd.f32 %v297_v27, %v249_v37  ;;  %v366_v39 = vpop.f32.mrb[4].mxu0 }
  0xfe   :  { %v367_v40 = vpop.f32.mrb[5].mxu0 }
  0xff   :  { %310 = vst.msk [vmem:[%s526_s3 + $0x8] sm:$0xff] %vm204_vm0, %v298_v38  ;;  %v368_v41 = vadd.f32 %v367_v40, %v366_v39  ;;  %v369_v42 = vpop.f32.mrb[6].mxu0 }
 0x100   :  { %v370_v43 = vpop.f32.mrb[7].mxu0 }
 0x101   :  { %v254_v44 = vadd.f32 %v368_v41, %v317_v30  ;;  %v371_v45 = vadd.f32 %v370_v43, %v369_v42 }
 0x103   :  { %v303_v46 = vadd.f32 %v382_v24, %v254_v44  ;;  %v257_v47 = vadd.f32 %v371_v45, %v317_v30 }
 0x105   :  { %311 = vst.msk [vmem:[%s526_s3 + $0x10] sm:$0xff] %vm204_vm0, %v303_v46  ;;  %v306_v48 = vadd.f32 %v383_v26, %v257_v47 }
 0x107   :  { %312 = vst.msk [vmem:[%s526_s3 + $0x18] sm:$0xff] %vm204_vm0, %v306_v48 }

// kernel: vq_vae_forward.24
= control target key start
LH: loop header
LB: loop body
LE: loop exit
PB: predicated region body
PF: predicated region fallthrough
CT: control target
= control target key end

     0   :  { %vm44_vm0 = vcmask 261120   ;;  %vm116_vm1 = vcmask 781312   ;;  %s205_s1 = inlined_call_operand.vmem [shape: bf16[32,96], index: 1, kind: input, shape index: {}]   ;;  %s206_s0 = inlined_call_operand.vmem [shape: f32[32,32], index: 0, kind: input, shape index: {}]   ;;  %s207_s2 = inlined_call_operand.vmem [shape: f32[1,96], index: 2, kind: input, shape index: {}]   ;;  %s208_s3 = inlined_call_operand.vmem [shape: bf16[32,96], index: 3, kind: output, shape index: {}]  }
   0x1   :  { %v150_v0 = vld [vmem:[%s205_s1] sm:$0xff]   ;;  %v151_v1 = vld [vmem:[%s205_s1 + $0x8] sm:$0xff]   ;;  %v17_v5 = vld [vmem:[%s206_s0 + $0x10] sm:$0xff] }
   0x2   :  { %142 = vmatprep.subr.bf16.mxu0 %v150_v0  ;;  %v15_v2 = vld [vmem:[%s206_s0] sm:$0xff]  ;;  %v16_v3 = vld [vmem:[%s206_s0 + $0x8] sm:$0xff]  ;;  %v18_v6 = vld [vmem:[%s206_s0 + $0x18] sm:$0xff] }
   0x3   :  { %143 = vmatpush3.bf16.msra.mxu0 %v150_v0  ;;  %v19_v4 = vpack.c.bf16 %v16_v3, %v15_v2  ;;  %v20_v7 = vpack.c.bf16 %v18_v6, %v17_v5  ;;  %v125_v8 = vld [vmem:[%s207_s2] ss:$0 sm:$0xff] }
   0x4   :  { %144 = vmatprep.subr.bf16.mxu0 %v151_v1 }
   0x5   :  { %146 = vmatprep.mubr.msk.bf16.mxu0 %vm44_vm0, %v19_v4 }
   0x7   :  { %145 = vmatpush3.bf16.msra.mxu0 %v151_v1 }
   0xa   :  { %147 = vmatmul.mubr.msk.bf16.vlgmr.msra.gmra.mrb[0].mxu0 %vm44_vm0, %v20_v7 }
  0xdd   :  { %v148_v9 = vpop.f32.mrb[0].mxu0 }
  0xde   :  { %v94_v10 = vadd.f32 %v148_v9, %v125_v8  ;;  %v85_v11 = vpop.f32.mrb[1].mxu0 }
  0xdf   :  { %v86_v12 = vadd.f32 %v125_v8, %v85_v11  ;;  %v149_v13 = vpop.f32.mrb[2].mxu0 }
  0xe0   :  { %v136_v14 = vpack.c.bf16 %v94_v10, %v94_v10  ;;  %v97_v15 = vadd.f32 %v149_v13, %v125_v8  ;;  %v88_v16 = vpop.f32.mrb[3].mxu0 }
  0xe1   :  { %v134_v17 = vpack.c.bf16 %v86_v12, %v86_v12  ;;  %v89_v18 = vadd.f32 %v125_v8, %v88_v16 }
  0xe2   :  { %119 = vst.msk [vmem:[%s208_s3 + $0x8] sm:$0xf] %vm116_vm1, %v136_v14  ;;  %v137_v19 = vpack.c.bf16 %v97_v15, %v97_v15 }
  0xe3   :  { %117 = vst.msk [vmem:[%s208_s3] sm:$0xf] %vm116_vm1, %v134_v17  ;;  %v135_v20 = vpack.c.bf16 %v89_v18, %v89_v18 }
  0xe4   :  { %120 = vst.msk [vmem:[%s208_s3 + $0xc] sm:$0xf] %vm116_vm1, %v137_v19 }
  0xe5   :  { %118 = vst.msk [vmem:[%s208_s3 + $0x4] sm:$0xf] %vm116_vm1, %v135_v20 }

// kernel: vq_vae_forward.26
= control target key start
LH: loop header
LB: loop body
LE: loop exit
PB: predicated region body
PF: predicated region fallthrough
CT: control target
= control target key end

     0   :  { %vm44_vm0 = vcmask 261120   ;;  %vm100_vm1 = vcmask 523264   ;;  %s181_s1 = inlined_call_operand.vmem [shape: bf16[32,64], index: 1, kind: input, shape index: {}]   ;;  %s182_s0 = inlined_call_operand.vmem [shape: f32[32,32], index: 0, kind: input, shape index: {}]   ;;  %s183_s2 = inlined_call_operand.vmem [shape: f32[1,64], index: 2, kind: input, shape index: {}]   ;;  %s184_s3 = inlined_call_operand.vmem [shape: f32[32,64], index: 3, kind: output, shape index: {}]  }
   0x1   :  { %v126_v0 = vld [vmem:[%s181_s1] sm:$0xff]   ;;  %v127_v1 = vld [vmem:[%s181_s1 + $0x8] sm:$0xff]   ;;  %v17_v5 = vld [vmem:[%s182_s0 + $0x10] sm:$0xff] }
   0x2   :  { %118 = vmatprep.subr.bf16.mxu0 %v126_v0  ;;  %v15_v2 = vld [vmem:[%s182_s0] sm:$0xff]  ;;  %v16_v3 = vld [vmem:[%s182_s0 + $0x8] sm:$0xff]  ;;  %v18_v6 = vld [vmem:[%s182_s0 + $0x18] sm:$0xff] }
   0x3   :  { %119 = vmatpush3.bf16.msra.mxu0 %v126_v0  ;;  %v19_v4 = vpack.c.bf16 %v16_v3, %v15_v2  ;;  %v20_v7 = vpack.c.bf16 %v18_v6, %v17_v5  ;;  %v109_v8 = vld [vmem:[%s183_s2] ss:$0 sm:$0xff] }
   0x4   :  { %120 = vmatprep.subr.bf16.mxu0 %v127_v1 }
   0x5   :  { %122 = vmatprep.mubr.msk.bf16.mxu0 %vm44_vm0, %v19_v4 }
   0x7   :  { %121 = vmatpush3.bf16.msra.mxu0 %v127_v1 }
   0xa   :  { %123 = vmatmul.mubr.msk.bf16.vlgmr.msra.gmra.mrb[0].mxu0 %vm44_vm0, %v20_v7 }
  0xdd   :  { %v124_v9 = vpop.f32.mrb[0].mxu0 }
  0xde   :  { %v94_v10 = vadd.f32 %v124_v9, %v109_v8  ;;  %v85_v11 = vpop.f32.mrb[1].mxu0 }
  0xdf   :  { %v86_v12 = vadd.f32 %v109_v8, %v85_v11  ;;  %v125_v13 = vpop.f32.mrb[2].mxu0 }
  0xe0   :  { %103 = vst.msk [vmem:[%s184_s3 + $0x10] sm:$0xff] %vm100_vm1, %v94_v10  ;;  %v97_v14 = vadd.f32 %v125_v13, %v109_v8  ;;  %v88_v15 = vpop.f32.mrb[3].mxu0 }
  0xe1   :  { %101 = vst.msk [vmem:[%s184_s3] sm:$0xff] %vm100_vm1, %v86_v12  ;;  %v89_v16 = vadd.f32 %v109_v8, %v88_v15 }
  0xe2   :  { %104 = vst.msk [vmem:[%s184_s3 + $0x18] sm:$0xff] %vm100_vm1, %v97_v14 }
  0xe3   :  { %102 = vst.msk [vmem:[%s184_s3 + $0x8] sm:$0xff] %vm100_vm1, %v89_v16 }

// kernel: vq_vae_forward.25
= control target key start
LH: loop header
LB: loop body
LE: loop exit
PB: predicated region body
PF: predicated region fallthrough
CT: control target
= control target key end

     0   :  { %vm121_vm0 = vcmask 31744   ;;  %v2743_v0 = vmov 0.0   ;;  %vm2744_vm1 = vmmov 0   ;;  %vm1024_vm2 = vcmask 130048   ;;  %s3501_s1 = inlined_call_operand.vmem [shape: bf16[16,16,4], index: 1, kind: input, shape index: {}]   ;;  %s3502_s0 = inlined_call_operand.vmem [shape: bf16[16,16,4], index: 0, kind: input, shape index: {}]   ;;  %s3503_s2 = inlined_call_operand.vmem [shape: bf16[16,16,4], index: 2, kind: input, shape index: {}]   ;;  %s3504_s3 = inlined_call_operand.vmem [shape: f32[16,16,4], index: 3, kind: output, shape index: {}]  }
   0x1   :  { %2373 = vmatprep.subr.bf16.mxu0 %v2743_v0  ;;  %2379 = vmatprep.subr.bf16.mxu1 %v2743_v0  ;;  %v2567_v1 = vld [vmem:[%s3501_s1] sm:$0xff]   ;;  %v2568_v2 = vld [vmem:[%s3501_s1 + $0x8] sm:$0xff]   ;;  %v2571_v5 = vld [vmem:[%s3501_s1 + $0x10] sm:$0xff]  }
   0x2   :  { %2375 = vmatprep.mubr.msk.bf16.mxu0 %vm2744_vm1, %v2743_v0  ;;  %2381 = vmatprep.mubr.msk.bf16.mxu1 %vm2744_vm1, %v2743_v0  ;;  %v126_v3 = vsel %vm121_vm0, %v2567_v1, 0  ;;  %v183_v4 = vsel %vm121_vm0, %v2568_v2, 0  ;;  %v2572_v6 = vld [vmem:[%s3501_s1 + $0x18] sm:$0xff]   ;;  %v2569_v7 = vld [vmem:[%s3502_s0] sm:$0xff]   ;;  %v2570_v8 = vld [vmem:[%s3502_s0 + $0x8] sm:$0xff]   ;;  %v240_v9 = vsel %vm121_vm0, %v2571_v5, 0 }
   0x3   :  { %2374 = vmatpush3.bf16.xpose.msra.mxu0 %v126_v3  ;;  %2380 = vmatpush3.bf16.xpose.msra.mxu1 %v183_v4  ;;  %v297_v10 = vsel %vm121_vm0, %v2572_v6, 0  ;;  %v2574_v11 = vld [vmem:[%s3501_s1 + $0x20] sm:$0xff]   ;;  %v2576_v12 = vld [vmem:[%s3501_s1 + $0x28] sm:$0xff]   ;;  %v2573_v13 = vld [vmem:[%s3502_s0 + $0x10] sm:$0xff]  }
   0x4   :  { %2385 = vmatprep.subr.bf16.mxu0 %v2743_v0  ;;  %2391 = vmatprep.subr.bf16.mxu1 %v2743_v0  ;;  %v2575_v14 = vld [vmem:[%s3502_s0 + $0x18] sm:$0xff]   ;;  %v354_v15 = vsel %vm121_vm0, %v2574_v11, 0  ;;  %v411_v16 = vsel %vm121_vm0, %v2576_v12, 0  ;;  %v2578_v17 = vld [vmem:[%s3501_s1 + $0x30] sm:$0xff]   ;;  %v2577_v19 = vld [vmem:[%s3502_s0 + $0x20] sm:$0xff]  }
   0x5   :  { %v2580_v18 = vld [vmem:[%s3501_s1 + $0x38] sm:$0xff]   ;;  %v2579_v20 = vld [vmem:[%s3502_s0 + $0x28] sm:$0xff]   ;;  %v468_v21 = vsel %vm121_vm0, %v2578_v17, 0  ;;  %v2582_v23 = vld [vmem:[%s3501_s1 + $0x40] sm:$0xff]  }
   0x6   :  { %v525_v22 = vsel %vm121_vm0, %v2580_v18, 0  ;;  %v2584_v24 = vld [vmem:[%s3501_s1 + $0x48] sm:$0xff]   ;;  %v2581_v25 = vld [vmem:[%s3502_s0 + $0x30] sm:$0xff]   ;;  %v2583_v26 = vld [vmem:[%s3502_s0 + $0x38] sm:$0xff]   ;;  %v582_v27 = vsel %vm121_vm0, %v2582_v23, 0 }
   0x7   :  { %v639_v28 = vsel %vm121_vm0, %v2584_v24, 0  ;;  %v2586_v29 = vld [vmem:[%s3501_s1 + $0x50] sm:$0xff]   ;;  %v2588_v30 = vld [vmem:[%s3501_s1 + $0x58] sm:$0xff]   ;;  %v2585_v31 = vld [vmem:[%s3502_s0 + $0x40] sm:$0xff]  }
   0x8   :  { %v2587_v32 = vld [vmem:[%s3502_s0 + $0x48] sm:$0xff]   ;;  %v696_v33 = vsel %vm121_vm0, %v2586_v29, 0  ;;  %v753_v34 = vsel %vm121_vm0, %v2588_v30, 0  ;;  %v2590_v35 = vld [vmem:[%s3501_s1 + $0x60] sm:$0xff]   ;;  %v2589_v37 = vld [vmem:[%s3502_s0 + $0x50] sm:$0xff]  }
   0x9   :  { %v2592_v36 = vld [vmem:[%s3501_s1 + $0x68] sm:$0xff]   ;;  %v2591_v38 = vld [vmem:[%s3502_s0 + $0x58] sm:$0xff]   ;;  %v810_v39 = vsel %vm121_vm0, %v2590_v35, 0  ;;  %v2594_v41 = vld [vmem:[%s3501_s1 + $0x70] sm:$0xff]  }
   0xa   :  { %2376 = vmatmul.mubr.msk.bf16.vlgmr.msra.gmra.mrb[0].mxu0 %vm121_vm0, %v2569_v7  ;;  %2382 = vmatmul.mubr.msk.bf16.vlgmr.msra.gmra.mrb[0].mxu1 %vm121_vm0, %v2570_v8  ;;  %v867_v40 = vsel %vm121_vm0, %v2592_v36, 0  ;;  %v2596_v42 = vld [vmem:[%s3501_s1 + $0x78] sm:$0xff]   ;;  %v2593_v43 = vld [vmem:[%s3502_s0 + $0x60] sm:$0xff]   ;;  %v2595_v44 = vld [vmem:[%s3502_s0 + $0x68] sm:$0xff]   ;;  %v924_v45 = vsel %vm121_vm0, %v2594_v41, 0 }
   0xb   :  { %2386 = vmatpush3.bf16.xpose.msra.mxu0 %v240_v9  ;;  %2392 = vmatpush3.bf16.xpose.msra.mxu1 %v297_v10  ;;  %v981_v46 = vsel %vm121_vm0, %v2596_v42, 0  ;;  %v2597_v47 = vld [vmem:[%s3502_s0 + $0x70] sm:$0xff]   ;;  %v2598_v48 = vld [vmem:[%s3502_s0 + $0x78] sm:$0xff]  }
   0xc   :  { %2387 = vmatprep.mubr.msk.bf16.mxu0 %vm2744_vm1, %v2743_v0  ;;  %2397 = vmatprep.subr.bf16.mxu0 %v2743_v0 }
   0xd   :  { %2393 = vmatprep.mubr.msk.bf16.mxu1 %vm2744_vm1, %v2743_v0  ;;  %2403 = vmatprep.subr.bf16.mxu1 %v2743_v0 }
  0x12   :  { %2388 = vmatmul.mubr.msk.bf16.vlgmr.msra.gmra.mrb[4].mxu0 %vm121_vm0, %v2573_v13  ;;  %2394 = vmatmul.mubr.msk.bf16.vlgmr.msra.gmra.mrb[4].mxu1 %vm121_vm0, %v2575_v14 }
  0x13   :  { %2398 = vmatpush3.bf16.xpose.msra.mxu0 %v354_v15  ;;  %2404 = vmatpush3.bf16.xpose.msra.mxu1 %v411_v16 }
  0x14   :  { %2399 = vmatprep.mubr.msk.bf16.mxu0 %vm2744_vm1, %v2743_v0  ;;  %2409 = vmatprep.subr.bf16.mxu0 %v2743_v0 }
  0x15   :  { %2405 = vmatprep.mubr.msk.bf16.mxu1 %vm2744_vm1, %v2743_v0  ;;  %2415 = vmatprep.subr.bf16.mxu1 %v2743_v0 }
  0x1a   :  { %2400 = vmatmul.mubr.msk.bf16.vlgmr.msra.gmra.mrb[8].mxu0 %vm121_vm0, %v2577_v19  ;;  %2406 = vmatmul.mubr.msk.bf16.vlgmr.msra.gmra.mrb[8].mxu1 %vm121_vm0, %v2579_v20 }
  0x1b   :  { %2410 = vmatpush3.bf16.xpose.msra.mxu0 %v468_v21  ;;  %2416 = vmatpush3.bf16.xpose.msra.mxu1 %v525_v22 }
  0x1c   :  { %2411 = vmatprep.mubr.msk.bf16.mxu0 %vm2744_vm1, %v2743_v0  ;;  %2421 = vmatprep.subr.bf16.mxu0 %v2743_v0 }
  0x1d   :  { %2417 = vmatprep.mubr.msk.bf16.mxu1 %vm2744_vm1, %v2743_v0  ;;  %2427 = vmatprep.subr.bf16.mxu1 %v2743_v0 }
  0x22   :  { %2412 = vmatmul.mubr.msk.bf16.vlgmr.msra.gmra.mrb[12].mxu0 %vm121_vm0, %v2581_v25  ;;  %2418 = vmatmul.mubr.msk.bf16.vlgmr.msra.gmra.mrb[12].mxu1 %vm121_vm0, %v2583_v26 }
  0x23   :  { %2422 = vmatpush3.bf16.xpose.msra.mxu0 %v582_v27  ;;  %2428 = vmatpush3.bf16.xpose.msra.mxu1 %v639_v28 }
  0x24   :  { %2423 = vmatprep.mubr.msk.bf16.mxu0 %vm2744_vm1, %v2743_v0  ;;  %2433 = vmatprep.subr.bf16.mxu0 %v2743_v0 }
  0x25   :  { %2429 = vmatprep.mubr.msk.bf16.mxu1 %vm2744_vm1, %v2743_v0  ;;  %2439 = vmatprep.subr.bf16.mxu1 %v2743_v0 }
  0x2a   :  { %2424 = vmatmul.mubr.msk.bf16.vlgmr.msra.gmra.mrb[16].mxu0 %vm121_vm0, %v2585_v31  ;;  %2430 = vmatmul.mubr.msk.bf16.vlgmr.msra.gmra.mrb[16].mxu1 %vm121_vm0, %v2587_v32 }
  0x2b   :  { %2434 = vmatpush3.bf16.xpose.msra.mxu0 %v696_v33  ;;  %2440 = vmatpush3.bf16.xpose.msra.mxu1 %v753_v34 }
  0x2c   :  { %2435 = vmatprep.mubr.msk.bf16.mxu0 %vm2744_vm1, %v2743_v0  ;;  %2445 = vmatprep.subr.bf16.mxu0 %v2743_v0 }
  0x2d   :  { %2441 = vmatprep.mubr.msk.bf16.mxu1 %vm2744_vm1, %v2743_v0  ;;  %2451 = vmatprep.subr.bf16.mxu1 %v2743_v0 }
  0x32   :  { %2436 = vmatmul.mubr.msk.bf16.vlgmr.msra.gmra.mrb[20].mxu0 %vm121_vm0, %v2589_v37  ;;  %2442 = vmatmul.mubr.msk.bf16.vlgmr.msra.gmra.mrb[20].mxu1 %vm121_vm0, %v2591_v38 }
  0x33   :  { %2446 = vmatpush3.bf16.xpose.msra.mxu0 %v810_v39  ;;  %2452 = vmatpush3.bf16.xpose.msra.mxu1 %v867_v40 }
  0x34   :  { %2447 = vmatprep.mubr.msk.bf16.mxu0 %vm2744_vm1, %v2743_v0  ;;  %2457 = vmatprep.subr.bf16.mxu0 %v2743_v0 }
  0x35   :  { %2453 = vmatprep.mubr.msk.bf16.mxu1 %vm2744_vm1, %v2743_v0  ;;  %2463 = vmatprep.subr.bf16.mxu1 %v2743_v0 }
  0x3a   :  { %2448 = vmatmul.mubr.msk.bf16.vlgmr.msra.gmra.mrb[24].mxu0 %vm121_vm0, %v2593_v43  ;;  %2454 = vmatmul.mubr.msk.bf16.vlgmr.msra.gmra.mrb[24].mxu1 %vm121_vm0, %v2595_v44 }
  0x3b   :  { %2458 = vmatpush3.bf16.xpose.msra.mxu0 %v924_v45  ;;  %2464 = vmatpush3.bf16.xpose.msra.mxu1 %v981_v46 }
  0x3c   :  { %2459 = vmatprep.mubr.msk.bf16.mxu0 %vm2744_vm1, %v2743_v0  ;;  %2465 = vmatprep.mubr.msk.bf16.mxu1 %vm2744_vm1, %v2743_v0 }
  0x3d   :  { %2469 = vmatprep.subr.bf16.mxu0 %v2743_v0  ;;  %2475 = vmatprep.subr.bf16.mxu1 %v2743_v0 }
  0x42   :  { %2460 = vmatmul.mubr.msk.bf16.vlgmr.msra.gmra.mrb[28].mxu0 %vm121_vm0, %v2597_v47  ;;  %2466 = vmatmul.mubr.msk.bf16.vlgmr.msra.gmra.mrb[28].mxu1 %vm121_vm0, %v2598_v48 }
  0x43   :  { %2471 = vmatprep.mubr.msk.bf16.mxu0 %vm2744_vm1, %v2743_v0  ;;  %2477 = vmatprep.mubr.msk.bf16.mxu1 %vm2744_vm1, %v2743_v0 }
  0xdd   :  { %v2947_v49 = vpop.f32.mrb[0].mxu0  ;;  %v2949_v50 = vpop.f32.mrb[0].mxu1 }
  0xde   :  { %v2377_v51 = vpop.f32.mrb[1].mxu0  ;;  %v1025_v52 = vsel %vm1024_vm2, %v2947_v49, -inf  ;;  %v1031_v53 = vsel %vm1024_vm2, %v2949_v50, -inf  ;;  %v2383_v54 = vpop.f32.mrb[1].mxu1 }
  0xdf   :  { %1026 = vmax.xlane.f32.xlu0 %v1025_v52  ;;  %v2955_v55 = vpop.f32.mrb[2].mxu0  ;;  %1032 = vmax.xlane.f32.xlu1 %v1031_v53  ;;  %v2957_v57 = vpop.f32.mrb[2].mxu1 }
  0xe0   :  { %v2378_v56 = vpop.f32.mrb[3].mxu0  ;;  %v2384_v58 = vpop.f32.mrb[3].mxu1  ;;  %v1034_v59 = vsel %vm1024_vm2, %v2957_v57, -inf  ;;  %v1028_v60 = vsel %vm1024_vm2, %v2955_v55, -inf }
  0xe3   :  { %1029 = vmax.xlane.f32.xlu0 %v1028_v60  ;;  %1035 = vmax.xlane.f32.xlu1 %v1034_v59 }
  0xe5   :  { %v2963_v61 = vpop.f32.mrb[4].mxu0  ;;  %v2967_v1 = vpop.f32.mrb[4].mxu1 }
  0xe6   :  { %v2389_v62 = vpop.f32.mrb[5].mxu0  ;;  %v1037_v63 = vsel %vm1024_vm2, %v2963_v61, -inf  ;;  %v2395_v3 = vpop.f32.mrb[5].mxu1  ;;  %v1043_v7 = vsel %vm1024_vm2, %v2967_v1, -inf }
  0xe7   :  { %1038 = vmax.xlane.f32.xlu0 %v1037_v63  ;;  %v2969_v2 = vpop.f32.mrb[6].mxu0  ;;  %v2973_v6 = vpop.f32.mrb[6].mxu1 }
  0xe8   :  { %v2390_v4 = vpop.f32.mrb[7].mxu0  ;;  %v1040_v5 = vsel %vm1024_vm2, %v2969_v2, -inf  ;;  %v2396_v8 = vpop.f32.mrb[7].mxu1  ;;  %v1046_v9 = vsel %vm1024_vm2, %v2973_v6, -inf }
  0xe9   :  { %1041 = vmax.xlane.f32.xlu1 %v1040_v5 }
  0xeb   :  { %1044 = vmax.xlane.f32.xlu0 %v1043_v7 }
  0xed   :  { %1047 = vmax.xlane.f32.xlu1 %v1046_v9  ;;  %v2979_v10 = vpop.f32.mrb[8].mxu0  ;;  %v2983_v13 = vpop.f32.mrb[8].mxu1 }
  0xee   :  { %v2401_v11 = vpop.f32.mrb[9].mxu0  ;;  %v1049_v12 = vsel %vm1024_vm2, %v2979_v10, -inf  ;;  %v2407_v15 = vpop.f32.mrb[9].mxu1  ;;  %v1055_v19 = vsel %vm1024_vm2, %v2983_v13, -inf }
  0xef   :  { %1050 = vmax.xlane.f32.xlu0 %v1049_v12  ;;  %v2985_v14 = vpop.f32.mrb[10].mxu0  ;;  %v2989_v18 = vpop.f32.mrb[10].mxu1 }
  0xf0   :  { %v2402_v16 = vpop.f32.mrb[11].mxu0  ;;  %v1052_v17 = vsel %vm1024_vm2, %v2985_v14, -inf  ;;  %v2408_v20 = vpop.f32.mrb[11].mxu1  ;;  %v1058_v21 = vsel %vm1024_vm2, %v2989_v18, -inf }
  0xf1   :  { %1053 = vmax.xlane.f32.xlu1 %v1052_v17 }
  0xf3   :  { %1056 = vmax.xlane.f32.xlu0 %v1055_v19 }
  0xf5   :  { %1059 = vmax.xlane.f32.xlu1 %v1058_v21  ;;  %v2995_v22 = vpop.f32.mrb[12].mxu0  ;;  %v2999_v25 = vpop.f32.mrb[12].mxu1 }
  0xf6   :  { %v2413_v23 = vpop.f32.mrb[13].mxu0  ;;  %v1061_v24 = vsel %vm1024_vm2, %v2995_v22, -inf  ;;  %v2419_v27 = vpop.f32.mrb[13].mxu1  ;;  %v1067_v31 = vsel %vm1024_vm2, %v2999_v25, -inf }
  0xf7   :  { %1062 = vmax.xlane.f32.xlu0 %v1061_v24  ;;  %v3001_v26 = vpop.f32.mrb[14].mxu0  ;;  %v3005_v30 = vpop.f32.mrb[14].mxu1 }
  0xf8   :  { %v2414_v28 = vpop.f32.mrb[15].mxu0  ;;  %v1064_v29 = vsel %vm1024_vm2, %v3001_v26, -inf  ;;  %v2420_v32 = vpop.f32.mrb[15].mxu1  ;;  %v1070_v33 = vsel %vm1024_vm2, %v3005_v30, -inf }
  0xf9   :  { %1065 = vmax.xlane.f32.xlu1 %v1064_v29 }
  0xfb   :  { %1068 = vmax.xlane.f32.xlu0 %v1067_v31 }
  0xfd   :  { %1071 = vmax.xlane.f32.xlu1 %v1070_v33  ;;  %v3011_v34 = vpop.f32.mrb[16].mxu0  ;;  %v3015_v37 = vpop.f32.mrb[16].mxu1 }
  0xfe   :  { %v2425_v35 = vpop.f32.mrb[17].mxu0  ;;  %v1073_v36 = vsel %vm1024_vm2, %v3011_v34, -inf  ;;  %v2431_v39 = vpop.f32.mrb[17].mxu1  ;;  %v1079_v43 = vsel %vm1024_vm2, %v3015_v37, -inf }
  0xff   :  { %1074 = vmax.xlane.f32.xlu0 %v1073_v36  ;;  %v3017_v38 = vpop.f32.mrb[18].mxu0  ;;  %v3021_v42 = vpop.f32.mrb[18].mxu1 }
 0x100   :  { %v2426_v40 = vpop.f32.mrb[19].mxu0  ;;  %v1076_v41 = vsel %vm1024_vm2, %v3017_v38, -inf  ;;  %v2432_v44 = vpop.f32.mrb[19].mxu1  ;;  %v1082_v45 = vsel %vm1024_vm2, %v3021_v42, -inf }
 0x101   :  { %1077 = vmax.xlane.f32.xlu1 %v1076_v41 }
 0x103   :  { %1080 = vmax.xlane.f32.xlu0 %v1079_v43 }
 0x105   :  { %1083 = vmax.xlane.f32.xlu1 %v1082_v45  ;;  %v3027_v46 = vpop.f32.mrb[20].mxu0  ;;  %v3031_v51 = vpop.f32.mrb[20].mxu1 }
 0x106   :  { %v2437_v47 = vpop.f32.mrb[21].mxu0  ;;  %v1085_v48 = vsel %vm1024_vm2, %v3027_v46, -inf  ;;  %v2443_v53 = vpop.f32.mrb[21].mxu1  ;;  %v1091_v59 = vsel %vm1024_vm2, %v3031_v51, -inf }
 0x107   :  { %1086 = vmax.xlane.f32.xlu0 %v1085_v48  ;;  %v3033_v52 = vpop.f32.mrb[22].mxu0  ;;  %v3037_v58 = vpop.f32.mrb[22].mxu1 }
 0x108   :  { %v2438_v54 = vpop.f32.mrb[23].mxu0  ;;  %v1088_v56 = vsel %vm1024_vm2, %v3033_v52, -inf  ;;  %v2444_v60 = vpop.f32.mrb[23].mxu1  ;;  %v1094_v62 = vsel %vm1024_vm2, %v3037_v58, -inf }
 0x109   :  { %1089 = vmax.xlane.f32.xlu1 %v1088_v56 }
 0x10b   :  { %1092 = vmax.xlane.f32.xlu0 %v1091_v59 }
 0x10d   :  { %1095 = vmax.xlane.f32.xlu1 %v1094_v62  ;;  %v3043_v63 = vpop.f32.mrb[24].mxu0  ;;  %v3047_v5 = vpop.f32.mrb[24].mxu1 }
 0x10e   :  { %v2449_v3 = vpop.f32.mrb[25].mxu0  ;;  %v1097_v4 = vsel %vm1024_vm2, %v3043_v63, -inf  ;;  %v2455_v8 = vpop.f32.mrb[25].mxu1  ;;  %v1103_v15 = vsel %vm1024_vm2, %v3047_v5, -inf }
 0x10f   :  { %1098 = vmax.xlane.f32.xlu0 %v1097_v4  ;;  %v3049_v7 = vpop.f32.mrb[26].mxu0  ;;  %v3053_v12 = vpop.f32.mrb[26].mxu1 }
 0x110   :  { %v2450_v9 = vpop.f32.mrb[27].mxu0  ;;  %v1100_v11 = vsel %vm1024_vm2, %v3049_v7, -inf  ;;  %v2456_v16 = vpop.f32.mrb[27].mxu1  ;;  %v1106_v17 = vsel %vm1024_vm2, %v3053_v12, -inf }
 0x111   :  { %1101 = vmax.xlane.f32.xlu1 %v1100_v11 }
 0x113   :  { %1104 = vmax.xlane.f32.xlu0 %v1103_v15 }
 0x115   :  { %1107 = vmax.xlane.f32.xlu1 %v1106_v17  ;;  %v3059_v19 = vpop.f32.mrb[28].mxu0  ;;  %v3063_v23 = vpop.f32.mrb[28].mxu1 }
 0x116   :  { %v2461_v20 = vpop.f32.mrb[29].mxu0  ;;  %v1109_v21 = vsel %vm1024_vm2, %v3059_v19, -inf  ;;  %v2467_v27 = vpop.f32.mrb[29].mxu1  ;;  %v1115_v32 = vsel %vm1024_vm2, %v3063_v23, -inf }
 0x117   :  { %1110 = vmax.xlane.f32.xlu0 %v1109_v21  ;;  %v3065_v24 = vpop.f32.mrb[30].mxu0  ;;  %v3069_v31 = vpop.f32.mrb[30].mxu1 }
 0x118   :  { %v2462_v28 = vpop.f32.mrb[31].mxu0  ;;  %v1112_v29 = vsel %vm1024_vm2, %v3065_v24, -inf  ;;  %v2468_v33 = vpop.f32.mrb[31].mxu1  ;;  %v1118_v35 = vsel %vm1024_vm2, %v3069_v31, -inf }
 0x119   :  { %1113 = vmax.xlane.f32.xlu1 %v1112_v29 }
 0x11b   :  { %1116 = vmax.xlane.f32.xlu0 %v1115_v32 }
 0x11d   :  { %1119 = vmax.xlane.f32.xlu1 %v1118_v35 }
 0x16c   :  { %v1027_v36 = vpop.xlane.xlu0 %1026  ;;  %v1033_v39 = vpop.xlane.xlu1 %1032 }
 0x16d   :  { %v1121_v40 = vsub.f32 %v2947_v49, %v1027_v36  ;;  %v1123_v41 = vsub.f32 %v2949_v50, %v1033_v39 }
 0x16f   :  { %v1153_v43 = vmul.f32 1.442695, %v1121_v40  ;;  %v1157_v44 = vmul.f32 1.442695, %v1123_v41 }
 0x170   :  { %v1030_v45 = vpop.xlane.xlu0 %1029  ;;  %v1036_v47 = vpop.xlane.xlu1 %1035 }
 0x171   :  { %2615 = vpow2.f32 %v1153_v43  ;;  %v1122_v48 = vsub.f32 %v2955_v55, %v1030_v45  ;;  %v1124_v53 = vsub.f32 %v2957_v57, %v1036_v47 }
 0x172   :  { %2617 = vpow2.f32 %v1157_v44 }
 0x173   :  { %v1155_v54 = vmul.f32 1.442695, %v1122_v48  ;;  %v1159_v56 = vmul.f32 1.442695, %v1124_v53 }
 0x174   :  { %v1039_v59 = vpop.xlane.xlu0 %1038 }
 0x175   :  { %2619 = vpow2.f32 %v1155_v54  ;;  %v1125_v60 = vsub.f32 %v2963_v61, %v1039_v59 }
 0x176   :  { %v1042_v62 = vpop.xlane.xlu1 %1041  ;;  %2621 = vpow2.f32 %v1159_v56 }
 0x177   :  { %v1161_v49 = vmul.f32 1.442695, %v1125_v60  ;;  %v1126_v50 = vsub.f32 %v2969_v2, %v1042_v62 }
 0x178   :  { %v1045_v3 = vpop.xlane.xlu0 %1044 }
 0x179   :  { %2623 = vpow2.f32 %v1161_v49  ;;  %v1163_v4 = vmul.f32 1.442695, %v1126_v50  ;;  %v1127_v8 = vsub.f32 %v2967_v1, %v1045_v3 }
 0x17a   :  { %v1048_v55 = vpop.xlane.xlu1 %1047 }
 0x17b   :  { %v3082_v9 = vpop.eup %2615  ;;  %2625 = vpow2.f32 %v1163_v4  ;;  %v1165_v57 = vmul.f32 1.442695, %v1127_v8  ;;  %v1128_v11 = vsub.f32 %v2973_v6, %v1048_v55 }
 0x17c   :  { %v1051_v15 = vpop.xlane.xlu0 %1050  ;;  %v1217_v61 = vsel %vm1024_vm2, %v3082_v9, 0.0  ;;  %v3087_v16 = vpop.eup %2617 }
 0x17d   :  { %2627 = vpow2.f32 %v1165_v57  ;;  %v1167_v2 = vmul.f32 1.442695, %v1128_v11  ;;  %v1129_v17 = vsub.f32 %v2979_v10, %v1051_v15  ;;  %1218 = vadd.xlane.f32.xlu0 %v1217_v61  ;;  %v1223_v6 = vsel %vm1024_vm2, %v3087_v16, 0.0 }
 0x17e   :  { %v1054_v20 = vpop.xlane.xlu1 %1053 }
 0x17f   :  { %v3090_v1 = vpop.eup %2619  ;;  %2629 = vpow2.f32 %v1167_v2  ;;  %v1169_v21 = vmul.f32 1.442695, %v1129_v17  ;;  %v1130_v27 = vsub.f32 %v2985_v14, %v1054_v20 }
 0x180   :  { %v1057_v28 = vpop.xlane.xlu0 %1056  ;;  %v1220_v29 = vsel %vm1024_vm2, %v3090_v1, 0.0  ;;  %v3097_v32 = vpop.eup %2621 }
 0x181   :  { %2631 = vpow2.f32 %v1169_v21  ;;  %v1171_v33 = vmul.f32 1.442695, %v1130_v27  ;;  %v1131_v10 = vsub.f32 %v2983_v13, %v1057_v28  ;;  %1224 = vadd.xlane.f32.xlu0 %v1223_v6  ;;  %1221 = vadd.xlane.f32.xlu1 %v1220_v29  ;;  %v1226_v43 = vsel %vm1024_vm2, %v3097_v32, 0.0 }
 0x182   :  { %v1060_v35 = vpop.xlane.xlu1 %1059 }
 0x183   :  { %v3100_v36 = vpop.eup %2623  ;;  %2633 = vpow2.f32 %v1171_v33  ;;  %v1173_v14 = vmul.f32 1.442695, %v1131_v10  ;;  %v1132_v39 = vsub.f32 %v2989_v18, %v1060_v35 }
 0x184   :  { %v1063_v40 = vpop.xlane.xlu0 %1062  ;;  %v1229_v41 = vsel %vm1024_vm2, %v3100_v36, 0.0 }
 0x185   :  { %v3107_v44 = vpop.eup %2625  ;;  %2635 = vpow2.f32 %v1173_v14  ;;  %v1175_v13 = vmul.f32 1.442695, %v1132_v39  ;;  %v1133_v45 = vsub.f32 %v2995_v22, %v1063_v40  ;;  %1230 = vadd.xlane.f32.xlu0 %v1229_v41  ;;  %1227 = vadd.xlane.f32.xlu1 %v1226_v43 }
 0x186   :  { %v1066_v47 = vpop.xlane.xlu1 %1065  ;;  %v1232_v59 = vsel %vm1024_vm2, %v3107_v44, 0.0 }
 0x187   :  { %v3110_v48 = vpop.eup %2627  ;;  %2637 = vpow2.f32 %v1175_v13  ;;  %v1177_v18 = vmul.f32 1.442695, %v1133_v45  ;;  %v1134_v53 = vsub.f32 %v3001_v26, %v1066_v47 }
 0x188   :  { %v1069_v54 = vpop.xlane.xlu0 %1068  ;;  %v1235_v56 = vsel %vm1024_vm2, %v3110_v48, 0.0 }
 0x189   :  { %v3117_v60 = vpop.eup %2629  ;;  %2639 = vpow2.f32 %v1177_v18  ;;  %v1179_v22 = vmul.f32 1.442695, %v1134_v53  ;;  %v1135_v62 = vsub.f32 %v2999_v25, %v1069_v54  ;;  %1236 = vadd.xlane.f32.xlu0 %v1235_v56  ;;  %1233 = vadd.xlane.f32.xlu1 %v1232_v59 }
 0x18a   :  { %v1072_v49 = vpop.xlane.xlu1 %1071  ;;  %v1238_v55 = vsel %vm1024_vm2, %v3117_v60, 0.0 }
 0x18b   :  { %v3120_v50 = vpop.eup %2631  ;;  %2641 = vpow2.f32 %v1179_v22  ;;  %v1181_v26 = vmul.f32 1.442695, %v1135_v62  ;;  %v1136_v3 = vsub.f32 %v3005_v30, %v1072_v49 }
 0x18c   :  { %v1075_v4 = vpop.xlane.xlu0 %1074  ;;  %v1241_v8 = vsel %vm1024_vm2, %v3120_v50, 0.0 }
 0x18d   :  { %v3127_v57 = vpop.eup %2633  ;;  %2643 = vpow2.f32 %v1181_v26  ;;  %v1183_v25 = vmul.f32 1.442695, %v1136_v3  ;;  %v1137_v11 = vsub.f32 %v3011_v34, %v1075_v4  ;;  %1242 = vadd.xlane.f32.xlu0 %v1241_v8  ;;  %1239 = vadd.xlane.f32.xlu1 %v1238_v55 }
 0x18e   :  { %v1078_v15 = vpop.xlane.xlu1 %1077  ;;  %v1244_v21 = vsel %vm1024_vm2, %v3127_v57, 0.0 }
 0x18f   :  { %v3130_v61 = vpop.eup %2635  ;;  %2645 = vpow2.f32 %v1183_v25  ;;  %v1185_v30 = vmul.f32 1.442695, %v1137_v11  ;;  %v1138_v2 = vsub.f32 %v3017_v38, %v1078_v15 }
 0x190   :  { %v1081_v17 = vpop.xlane.xlu0 %1080  ;;  %v1247_v20 = vsel %vm1024_vm2, %v3130_v61, 0.0 }
 0x191   :  { %v3137_v27 = vpop.eup %2637  ;;  %2647 = vpow2.f32 %v1185_v30  ;;  %v1187_v34 = vmul.f32 1.442695, %v1138_v2  ;;  %v1139_v28 = vsub.f32 %v3015_v37, %v1081_v17  ;;  %1248 = vadd.xlane.f32.xlu0 %v1247_v20  ;;  %1245 = vadd.xlane.f32.xlu1 %v1244_v21 }
 0x192   :  { %v1084_v6 = vpop.xlane.xlu1 %1083  ;;  %v1250_v14 = vsel %vm1024_vm2, %v3137_v27, 0.0 }
 0x193   :  { %v3140_v29 = vpop.eup %2639  ;;  %2649 = vpow2.f32 %v1187_v34  ;;  %v1189_v38 = vmul.f32 1.442695, %v1139_v28  ;;  %v1140_v33 = vsub.f32 %v3021_v42, %v1084_v6 }
 0x194   :  { %v1087_v10 = vpop.xlane.xlu0 %1086  ;;  %v1253_v35 = vsel %vm1024_vm2, %v3140_v29, 0.0 }
 0x195   :  { %v3147_v39 = vpop.eup %2641  ;;  %2651 = vpow2.f32 %v1189_v38  ;;  %v1191_v37 = vmul.f32 1.442695, %v1140_v33  ;;  %v1141_v40 = vsub.f32 %v3027_v46, %v1087_v10  ;;  %1254 = vadd.xlane.f32.xlu0 %v1253_v35  ;;  %1251 = vadd.xlane.f32.xlu1 %v1250_v14 }
 0x196   :  { %v1090_v41 = vpop.xlane.xlu1 %1089  ;;  %v1256_v18 = vsel %vm1024_vm2, %v3147_v39, 0.0 }
 0x197   :  { %v3150_v43 = vpop.eup %2643  ;;  %2653 = vpow2.f32 %v1191_v37  ;;  %v1193_v42 = vmul.f32 1.442695, %v1141_v40  ;;  %v1142_v13 = vsub.f32 %v3033_v52, %v1090_v41  ;;  %v2599_v52 = vld [vmem:[%s3503_s2] sm:$0xff]  }
 0x198   :  { %v1093_v45 = vpop.xlane.xlu0 %1092  ;;  %v1259_v47 = vsel %vm1024_vm2, %v3150_v43, 0.0  ;;  %2470 = vmatpush3.bf16.msra.mxu0 %v2599_v52 }
 0x199   :  { %v3157_v53 = vpop.eup %2645  ;;  %2655 = vpow2.f32 %v1193_v42  ;;  %v1195_v46 = vmul.f32 1.442695, %v1142_v13  ;;  %v1143_v54 = vsub.f32 %v3031_v51, %v1093_v45  ;;  %1260 = vadd.xlane.f32.xlu0 %v1259_v47  ;;  %1257 = vadd.xlane.f32.xlu1 %v1256_v18 }
 0x19a   :  { %v1096_v56 = vpop.xlane.xlu1 %1095  ;;  %v1262_v51 = vsel %vm1024_vm2, %v3157_v53, 0.0  ;;  %2481 = vmatprep.subr.bf16.mxu0 %v2743_v0 }
 0x19b   :  { %v3163_v59 = vpop.eup %2647  ;;  %2657 = vpow2.f32 %v1195_v46  ;;  %v1197_v22 = vmul.f32 1.442695, %v1143_v54  ;;  %v1144_v62 = vsub.f32 %v3037_v58, %v1096_v56  ;;  %v2600_v58 = vld [vmem:[%s3503_s2 + $0x8] sm:$0xff]  }
 0x19c   :  { %v1099_v49 = vpop.xlane.xlu0 %1098  ;;  %v1265_v26 = vsel %vm1024_vm2, %v3163_v59, 0.0  ;;  %2476 = vmatpush3.bf16.msra.mxu1 %v2600_v58 }
 0x19d   :  { %v3170_v3 = vpop.eup %2649  ;;  %2659 = vpow2.f32 %v1197_v22  ;;  %v1199_v4 = vmul.f32 1.442695, %v1144_v62  ;;  %v1145_v8 = vsub.f32 %v3043_v63, %v1099_v49  ;;  %1266 = vadd.xlane.f32.xlu0 %v1265_v26  ;;  %1263 = vadd.xlane.f32.xlu1 %v1262_v51 }
 0x19e   :  { %v1102_v55 = vpop.xlane.xlu1 %1101  ;;  %v1268_v63 = vsel %vm1024_vm2, %v3170_v3, 0.0  ;;  %2487 = vmatprep.subr.bf16.mxu1 %v2743_v0 }
 0x19f   :  { %v3177_v25 = vpop.eup %2651  ;;  %2661 = vpow2.f32 %v1199_v4  ;;  %v1201_v11 = vmul.f32 1.442695, %v1145_v8  ;;  %v1146_v15 = vsub.f32 %v3049_v7, %v1102_v55 }
 0x1a0   :  { %v1105_v30 = vpop.xlane.xlu0 %1104  ;;  %v1271_v2 = vsel %vm1024_vm2, %v3177_v25, 0.0 }
 0x1a1   :  { %v3184_v17 = vpop.eup %2653  ;;  %2663 = vpow2.f32 %v1201_v11  ;;  %v1203_v20 = vmul.f32 1.442695, %v1146_v15  ;;  %v1147_v21 = vsub.f32 %v3047_v5, %v1105_v30  ;;  %1272 = vadd.xlane.f32.xlu0 %v1271_v2  ;;  %1269 = vadd.xlane.f32.xlu1 %v1268_v63 }
 0x1a2   :  { %v1108_v34 = vpop.xlane.xlu1 %1107  ;;  %v1274_v10 = vsel %vm1024_vm2, %v3184_v17, 0.0 }
 0x1a3   :  { %v3188_v7 = vpop.eup %2655  ;;  %2665 = vpow2.f32 %v1203_v20  ;;  %v1205_v28 = vmul.f32 1.442695, %v1147_v21  ;;  %v1148_v6 = vsub.f32 %v3053_v12, %v1108_v34 }
 0x1a4   :  { %v1111_v38 = vpop.xlane.xlu0 %1110  ;;  %v1277_v33 = vsel %vm1024_vm2, %v3188_v7, 0.0 }
 0x1a5   :  { %v3195_v35 = vpop.eup %2657  ;;  %2667 = vpow2.f32 %v1205_v28  ;;  %v1207_v5 = vmul.f32 1.442695, %v1148_v6  ;;  %v1149_v14 = vsub.f32 %v3059_v19, %v1111_v38  ;;  %1278 = vadd.xlane.f32.xlu0 %v1277_v33  ;;  %1275 = vadd.xlane.f32.xlu1 %v1274_v10 }
 0x1a6   :  { %v1114_v37 = vpop.xlane.xlu1 %1113  ;;  %v1280_v45 = vsel %vm1024_vm2, %v3195_v35, 0.0 }
 0x1a7   :  { %v3198_v40 = vpop.eup %2659  ;;  %2669 = vpow2.f32 %v1207_v5  ;;  %v1209_v12 = vmul.f32 1.442695, %v1149_v14  ;;  %v1150_v41 = vsub.f32 %v3065_v24, %v1114_v37 }
 0x1a8   :  { %v1117_v42 = vpop.xlane.xlu0 %1116  ;;  %v1283_v13 = vsel %vm1024_vm2, %v3198_v40, 0.0 }
 0x1a9   :  { %v3205_v47 = vpop.eup %2661  ;;  %2671 = vpow2.f32 %v1209_v12  ;;  %v1211_v19 = vmul.f32 1.442695, %v1150_v41  ;;  %v1151_v18 = vsub.f32 %v3063_v23, %v1117_v42  ;;  %1284 = vadd.xlane.f32.xlu0 %v1283_v13  ;;  %1281 = vadd.xlane.f32.xlu1 %v1280_v45  ;;  %v2601_v13 = vld [vmem:[%s3503_s2 + $0x10] sm:$0xff]  }
 0x1aa   :  { %v1120_v46 = vpop.xlane.xlu1 %1119  ;;  %v1286_v22 = vsel %vm1024_vm2, %v3205_v47, 0.0 }
 0x1ab   :  { %v3208_v54 = vpop.eup %2663  ;;  %2673 = vpow2.f32 %v1211_v19  ;;  %v1213_v24 = vmul.f32 1.442695, %v1151_v18  ;;  %v1152_v56 = vsub.f32 %v3069_v31, %v1120_v46 }
 0x1ac   :  { %v1289_v52 = vsel %vm1024_vm2, %v3208_v54, 0.0 }
 0x1ad   :  { %v3215_v62 = vpop.eup %2665  ;;  %2675 = vpow2.f32 %v1213_v24  ;;  %v1215_v49 = vmul.f32 1.442695, %v1152_v56  ;;  %1290 = vadd.xlane.f32.xlu0 %v1289_v52  ;;  %1287 = vadd.xlane.f32.xlu1 %v1286_v22 }
 0x1ae   :  { %v1292_v31 = vsel %vm1024_vm2, %v3215_v62, 0.0 }
 0x1af   :  { %v3217_v23 = vpop.eup %2667  ;;  %2677 = vpow2.f32 %v1215_v49 }
 0x1b0   :  { %v1295_v26 = vsel %vm1024_vm2, %v3217_v23, 0.0 }
 0x1b1   :  { %v3223_v51 = vpop.eup %2669  ;;  %1296 = vadd.xlane.f32.xlu0 %v1295_v26  ;;  %1293 = vadd.xlane.f32.xlu1 %v1292_v31 }
 0x1b2   :  { %v1298_v55 = vsel %vm1024_vm2, %v3223_v51, 0.0 }
 0x1b3   :  { %v3225_v4 = vpop.eup %2671 }
 0x1b4   :  { %v1301_v8 = vsel %vm1024_vm2, %v3225_v4, 0.0 }
 0x1b5   :  { %v3231_v58 = vpop.eup %2673  ;;  %1302 = vadd.xlane.f32.xlu0 %v1301_v8  ;;  %1299 = vadd.xlane.f32.xlu1 %v1298_v55  ;;  %v2603_v8 = vld [vmem:[%s3503_s2 + $0x20] sm:$0xff]  }
 0x1b6   :  { %v1304_v30 = vsel %vm1024_vm2, %v3231_v58, 0.0 }
 0x1b7   :  { %v3233_v11 = vpop.eup %2675 }
 0x1b8   :  { %v1307_v15 = vsel %vm1024_vm2, %v3233_v11, 0.0 }
 0x1b9   :  { %v3239_v2 = vpop.eup %2677  ;;  %1308 = vadd.xlane.f32.xlu0 %v1307_v15  ;;  %1305 = vadd.xlane.f32.xlu1 %v1304_v30 }
 0x1ba   :  { %v1310_v63 = vsel %vm1024_vm2, %v3239_v2, 0.0 }
 0x1bd   :  { %1311 = vadd.xlane.f32.xlu1 %v1310_v63 }
 0x20a   :  { %v1219_v20 = vpop.xlane.xlu0 %1218 }
 0x20b   :  { %2679 = vrcp.f32 %v1219_v20 }
 0x20e   :  { %v1225_v21 = vpop.xlane.xlu0 %1224  ;;  %v1222_v34 = vpop.xlane.xlu1 %1221 }
 0x20f   :  { %2681 = vrcp.f32 %v1222_v34 }
 0x210   :  { %2683 = vrcp.f32 %v1225_v21  ;;  %v2604_v21 = vld [vmem:[%s3503_s2 + $0x28] sm:$0xff]  }
 0x212   :  { %v1231_v28 = vpop.xlane.xlu0 %1230  ;;  %v1228_v6 = vpop.xlane.xlu1 %1227 }
 0x213   :  { %2685 = vrcp.f32 %v1228_v6 }
 0x214   :  { %2687 = vrcp.f32 %v1231_v28 }
 0x215   :  { %v2680_v10 = vpop.eup %2679 }
 0x216   :  { %v1237_v38 = vpop.xlane.xlu0 %1236  ;;  %v1234_v33 = vpop.xlane.xlu1 %1233  ;;  %v1345_v12 = vmul.f32 %v2680_v10, %v3082_v9  ;;  %v2605_v10 = vld [vmem:[%s3503_s2 + $0x30] sm:$0xff]  }
 0x217   :  { %2689 = vrcp.f32 %v1234_v33 }
 0x218   :  { %2691 = vrcp.f32 %v1237_v38 }
 0x219   :  { %v2682_v5 = vpop.eup %2681 }
 0x21a   :  { %v1243_v14 = vpop.xlane.xlu0 %1242  ;;  %v1240_v37 = vpop.xlane.xlu1 %1239  ;;  %v1346_v41 = vmul.f32 %v2682_v5, %v3090_v1  ;;  %v2602_v1 = vld [vmem:[%s3503_s2 + $0x18] sm:$0xff]  }
 0x21b   :  { %v2684_v42 = vpop.eup %2683  ;;  %2693 = vrcp.f32 %v1240_v37 }
 0x21c   :  { %v1377_v45 = vpack.c.bf16 %v1346_v41, %v1345_v12  ;;  %2695 = vrcp.f32 %v1243_v14  ;;  %v1347_v24 = vmul.f32 %v2684_v42, %v3087_v16  ;;  %v2606_v42 = vld [vmem:[%s3503_s2 + $0x38] sm:$0xff]  }
 0x21d   :  { %v2686_v19 = vpop.eup %2685 }
 0x21e   :  { %v1249_v18 = vpop.xlane.xlu0 %1248  ;;  %v1246_v46 = vpop.xlane.xlu1 %1245  ;;  %v1348_v56 = vmul.f32 %v2686_v19, %v3097_v32  ;;  %2472 = vmatmul.mubr.msk.bf16.vlgmr.msra.gmra.mrb[32].mxu0 %vm1024_vm2, %v1377_v45 }
 0x21f   :  { %v2688_v9 = vpop.eup %2687  ;;  %2697 = vrcp.f32 %v1246_v46  ;;  %2482 = vmatpush3.bf16.msra.mxu0 %v2601_v13  ;;  %2483 = vmatprep.mubr.msk.bf16.mxu0 %vm2744_vm1, %v2743_v0 }
 0x220   :  { %v1378_v52 = vpack.c.bf16 %v1348_v56, %v1347_v24  ;;  %2493 = vmatprep.subr.bf16.mxu0 %v2743_v0  ;;  %2699 = vrcp.f32 %v1249_v18  ;;  %v1349_v32 = vmul.f32 %v2688_v9, %v3100_v36  ;;  %v2607_v24 = vld [vmem:[%s3503_s2 + $0x40] sm:$0xff]  }
 0x221   :  { %v2690_v22 = vpop.eup %2689 }
 0x222   :  { %v1255_v16 = vpop.xlane.xlu0 %1254  ;;  %v1252_v49 = vpop.xlane.xlu1 %1251  ;;  %v1350_v26 = vmul.f32 %v2690_v22, %v3107_v44  ;;  %2478 = vmatmul.mubr.msk.bf16.vlgmr.msra.gmra.mrb[32].mxu1 %vm1024_vm2, %v1378_v52 }
 0x223   :  { %v2692_v31 = vpop.eup %2691  ;;  %2488 = vmatpush3.bf16.msra.mxu1 %v2602_v1  ;;  %2701 = vrcp.f32 %v1252_v49  ;;  %2489 = vmatprep.mubr.msk.bf16.mxu1 %vm2744_vm1, %v2743_v0 }
 0x224   :  { %v1379_v55 = vpack.c.bf16 %v1350_v26, %v1349_v32  ;;  %2499 = vmatprep.subr.bf16.mxu1 %v2743_v0  ;;  %2703 = vrcp.f32 %v1255_v16  ;;  %v1351_v44 = vmul.f32 %v2692_v31, %v3110_v48  ;;  %v2608_v16 = vld [vmem:[%s3503_s2 + $0x48] sm:$0xff]  }
 0x225   :  { %v2694_v15 = vpop.eup %2693 }
 0x226   :  { %v1261_v36 = vpop.xlane.xlu0 %1260  ;;  %v1258_v30 = vpop.xlane.xlu1 %1257  ;;  %v1352_v63 = vmul.f32 %v2694_v15, %v3117_v60  ;;  %2484 = vmatmul.mubr.msk.bf16.vlgmr.msra.gmra.mrb[36].mxu0 %vm1024_vm2, %v1379_v55  ;;  %v2609_v55 = vld [vmem:[%s3503_s2 + $0x50] sm:$0xff]  }
 0x227   :  { %v2696_v20 = vpop.eup %2695  ;;  %2705 = vrcp.f32 %v1258_v30  ;;  %2494 = vmatpush3.bf16.msra.mxu0 %v2603_v8  ;;  %2495 = vmatprep.mubr.msk.bf16.mxu0 %vm2744_vm1, %v2743_v0 }
 0x228   :  { %v1380_v34 = vpack.c.bf16 %v1352_v63, %v1351_v44  ;;  %2505 = vmatprep.subr.bf16.mxu0 %v2743_v0  ;;  %2707 = vrcp.f32 %v1261_v36  ;;  %v1353_v60 = vmul.f32 %v2696_v20, %v3120_v50  ;;  %v2610_v20 = vld [vmem:[%s3503_s2 + $0x58] sm:$0xff]  }
 0x229   :  { %v2698_v28 = vpop.eup %2697 }
 0x22a   :  { %v1267_v48 = vpop.xlane.xlu0 %1266  ;;  %v1264_v6 = vpop.xlane.xlu1 %1263  ;;  %v1354_v38 = vmul.f32 %v2698_v28, %v3127_v57  ;;  %2490 = vmatmul.mubr.msk.bf16.vlgmr.msra.gmra.mrb[36].mxu1 %vm1024_vm2, %v1380_v34 }
 0x22b   :  { %v2700_v33 = vpop.eup %2699  ;;  %2500 = vmatpush3.bf16.msra.mxu1 %v2604_v21  ;;  %2709 = vrcp.f32 %v1264_v6  ;;  %2501 = vmatprep.mubr.msk.bf16.mxu1 %vm2744_vm1, %v2743_v0 }
 0x22c   :  { %v1381_v5 = vpack.c.bf16 %v1354_v38, %v1353_v60  ;;  %2511 = vmatprep.subr.bf16.mxu1 %v2743_v0  ;;  %2711 = vrcp.f32 %v1267_v48  ;;  %v1355_v57 = vmul.f32 %v2700_v33, %v3130_v61  ;;  %v2611_v60 = vld [vmem:[%s3503_s2 + $0x60] sm:$0xff]  }
 0x22d   :  { %v2702_v14 = vpop.eup %2701 }
 0x22e   :  { %v1273_v50 = vpop.xlane.xlu0 %1272  ;;  %v1270_v37 = vpop.xlane.xlu1 %1269  ;;  %v1356_v12 = vmul.f32 %v2702_v14, %v3137_v27  ;;  %2496 = vmatmul.mubr.msk.bf16.vlgmr.msra.gmra.mrb[40].mxu0 %vm1024_vm2, %v1381_v5 }
 0x22f   :  { %v2704_v41 = vpop.eup %2703  ;;  %2713 = vrcp.f32 %v1270_v37  ;;  %2506 = vmatpush3.bf16.msra.mxu0 %v2605_v10  ;;  %2507 = vmatprep.mubr.msk.bf16.mxu0 %vm2744_vm1, %v2743_v0 }
 0x230   :  { %v1382_v13 = vpack.c.bf16 %v1356_v12, %v1355_v57  ;;  %2517 = vmatprep.subr.bf16.mxu0 %v2743_v0  ;;  %2715 = vrcp.f32 %v1273_v50  ;;  %v1357_v27 = vmul.f32 %v2704_v41, %v3140_v29  ;;  %v2612_v50 = vld [vmem:[%s3503_s2 + $0x68] sm:$0xff]  }
 0x231   :  { %v2706_v45 = vpop.eup %2705 }
 0x232   :  { %v1279_v61 = vpop.xlane.xlu0 %1278  ;;  %v1276_v19 = vpop.xlane.xlu1 %1275  ;;  %v1358_v18 = vmul.f32 %v2706_v45, %v3147_v39  ;;  %2502 = vmatmul.mubr.msk.bf16.vlgmr.msra.gmra.mrb[40].mxu1 %vm1024_vm2, %v1382_v13 }
 0x233   :  { %v2708_v46 = vpop.eup %2707  ;;  %2512 = vmatpush3.bf16.msra.mxu1 %v2606_v42  ;;  %2717 = vrcp.f32 %v1276_v19  ;;  %2513 = vmatprep.mubr.msk.bf16.mxu1 %vm2744_vm1, %v2743_v0  ;;  %v2613_v42 = vld [vmem:[%s3503_s2 + $0x70] sm:$0xff]   ;;  %v2614_v19 = vld [vmem:[%s3503_s2 + $0x78] sm:$0xff]  }
 0x234   :  { %v1383_v56 = vpack.c.bf16 %v1358_v18, %v1357_v27  ;;  %2523 = vmatprep.subr.bf16.mxu1 %v2743_v0  ;;  %2719 = vrcp.f32 %v1279_v61  ;;  %v1359_v39 = vmul.f32 %v2708_v46, %v3150_v43 }
 0x235   :  { %v2710_v9 = vpop.eup %2709 }
 0x236   :  { %v1285_v29 = vpop.xlane.xlu0 %1284  ;;  %v1282_v1 = vpop.xlane.xlu1 %1281  ;;  %v1360_v52 = vmul.f32 %v2710_v9, %v3157_v53  ;;  %2508 = vmatmul.mubr.msk.bf16.vlgmr.msra.gmra.mrb[44].mxu0 %vm1024_vm2, %v1383_v56 }
 0x237   :  { %v2712_v22 = vpop.eup %2711  ;;  %2721 = vrcp.f32 %v1282_v1  ;;  %2518 = vmatpush3.bf16.msra.mxu0 %v2607_v24  ;;  %2519 = vmatprep.mubr.msk.bf16.mxu0 %vm2744_vm1, %v2743_v0 }
 0x238   :  { %v1384_v49 = vpack.c.bf16 %v1360_v52, %v1359_v39  ;;  %2529 = vmatprep.subr.bf16.mxu0 %v2743_v0  ;;  %2723 = vrcp.f32 %v1285_v29  ;;  %v1361_v53 = vmul.f32 %v2712_v22, %v3163_v59 }
 0x239   :  { %v2714_v32 = vpop.eup %2713 }
 0x23a   :  { %v1291_v43 = vpop.xlane.xlu0 %1290  ;;  %v1288_v26 = vpop.xlane.xlu1 %1287  ;;  %v1362_v31 = vmul.f32 %v2714_v32, %v3170_v3  ;;  %2514 = vmatmul.mubr.msk.bf16.vlgmr.msra.gmra.mrb[44].mxu1 %vm1024_vm2, %v1384_v49 }
 0x23b   :  { %v2716_v8 = vpop.eup %2715  ;;  %2524 = vmatpush3.bf16.msra.mxu1 %v2608_v16  ;;  %2725 = vrcp.f32 %v1288_v26  ;;  %2525 = vmatprep.mubr.msk.bf16.mxu1 %vm2744_vm1, %v2743_v0 }
 0x23c   :  { %v1385_v15 = vpack.c.bf16 %v1362_v31, %v1361_v53  ;;  %2535 = vmatprep.subr.bf16.mxu1 %v2743_v0  ;;  %2727 = vrcp.f32 %v1291_v43  ;;  %v1363_v3 = vmul.f32 %v2716_v8, %v3177_v25 }
 0x23d   :  { %v2718_v36 = vpop.eup %2717 }
 0x23e   :  { %v1297_v59 = vpop.xlane.xlu0 %1296  ;;  %v1294_v30 = vpop.xlane.xlu1 %1293  ;;  %v1364_v44 = vmul.f32 %v2718_v36, %v3184_v17  ;;  %2520 = vmatmul.mubr.msk.bf16.vlgmr.msra.gmra.mrb[48].mxu0 %vm1024_vm2, %v1385_v15 }
 0x23f   :  { %v2720_v63 = vpop.eup %2719  ;;  %2729 = vrcp.f32 %v1294_v30  ;;  %2530 = vmatpush3.bf16.msra.mxu0 %v2609_v55  ;;  %2531 = vmatprep.mubr.msk.bf16.mxu0 %vm2744_vm1, %v2743_v0 }
 0x240   :  { %v1386_v21 = vpack.c.bf16 %v1364_v44, %v1363_v3  ;;  %2541 = vmatprep.subr.bf16.mxu0 %v2743_v0  ;;  %2731 = vrcp.f32 %v1297_v59  ;;  %v1365_v17 = vmul.f32 %v2720_v63, %v3188_v7 }
 0x241   :  { %v2722_v34 = vpop.eup %2721 }
 0x242   :  { %v1303_v25 = vpop.xlane.xlu0 %1302  ;;  %v1300_v28 = vpop.xlane.xlu1 %1299  ;;  %v1366_v48 = vmul.f32 %v2722_v34, %v3195_v35  ;;  %2526 = vmatmul.mubr.msk.bf16.vlgmr.msra.gmra.mrb[48].mxu1 %vm1024_vm2, %v1386_v21 }
 0x243   :  { %v2724_v6 = vpop.eup %2723  ;;  %2536 = vmatpush3.bf16.msra.mxu1 %v2610_v20  ;;  %2733 = vrcp.f32 %v1300_v28  ;;  %2537 = vmatprep.mubr.msk.bf16.mxu1 %vm2744_vm1, %v2743_v0 }
 0x244   :  { %v1387_v38 = vpack.c.bf16 %v1366_v48, %v1365_v17  ;;  %2547 = vmatprep.subr.bf16.mxu1 %v2743_v0  ;;  %2735 = vrcp.f32 %v1303_v25  ;;  %v1367_v35 = vmul.f32 %v2724_v6, %v3198_v40 }
 0x245   :  { %v2726_v33 = vpop.eup %2725 }
 0x246   :  { %v1309_v7 = vpop.xlane.xlu0 %1308  ;;  %v1306_v10 = vpop.xlane.xlu1 %1305  ;;  %v1368_v5 = vmul.f32 %v2726_v33, %v3205_v47  ;;  %2532 = vmatmul.mubr.msk.bf16.vlgmr.msra.gmra.mrb[52].mxu0 %vm1024_vm2, %v1387_v38 }
 0x247   :  { %v2728_v14 = vpop.eup %2727  ;;  %2737 = vrcp.f32 %v1306_v10  ;;  %2542 = vmatpush3.bf16.msra.mxu0 %v2611_v60  ;;  %2543 = vmatprep.mubr.msk.bf16.mxu0 %vm2744_vm1, %v2743_v0 }
 0x248   :  { %2739 = vrcp.f32 %v1309_v7  ;;  %v1388_v37 = vpack.c.bf16 %v1368_v5, %v1367_v35  ;;  %2553 = vmatprep.subr.bf16.mxu0 %v2743_v0  ;;  %v1369_v47 = vmul.f32 %v2728_v14, %v3208_v54 }
 0x249   :  { %v2730_v57 = vpop.eup %2729 }
 0x24a   :  { %v1312_v40 = vpop.xlane.xlu1 %1311  ;;  %v1370_v12 = vmul.f32 %v2730_v57, %v3215_v62  ;;  %2538 = vmatmul.mubr.msk.bf16.vlgmr.msra.gmra.mrb[52].mxu1 %vm1024_vm2, %v1388_v37  ;;  %v2732_v41 = vpop.eup %2731 }
 0x24b   :  { %2741 = vrcp.f32 %v1312_v40  ;;  %2548 = vmatpush3.bf16.msra.mxu1 %v2612_v50  ;;  %2549 = vmatprep.mubr.msk.bf16.mxu1 %vm2744_vm1, %v2743_v0  ;;  %v1371_v54 = vmul.f32 %v2732_v41, %v3217_v23 }
 0x24c   :  { %v1389_v13 = vpack.c.bf16 %v1370_v12, %v1369_v47  ;;  %2559 = vmatprep.subr.bf16.mxu1 %v2743_v0 }
 0x24d   :  { %v2734_v45 = vpop.eup %2733 }
 0x24e   :  { %v1372_v62 = vmul.f32 %v2734_v45, %v3223_v51  ;;  %2544 = vmatmul.mubr.msk.bf16.vlgmr.msra.gmra.mrb[56].mxu0 %vm1024_vm2, %v1389_v13  ;;  %v2736_v61 = vpop.eup %2735 }
 0x24f   :  { %2554 = vmatpush3.bf16.msra.mxu0 %v2613_v42  ;;  %2555 = vmatprep.mubr.msk.bf16.mxu0 %vm2744_vm1, %v2743_v0  ;;  %v1373_v24 = vmul.f32 %v2736_v61, %v3225_v4 }
 0x250   :  { %v1390_v27 = vpack.c.bf16 %v1372_v62, %v1371_v54 }
 0x251   :  { %v2738_v18 = vpop.eup %2737 }
 0x252   :  { %v2740_v46 = vpop.eup %2739  ;;  %v1374_v23 = vmul.f32 %v2738_v18, %v3231_v58  ;;  %2550 = vmatmul.mubr.msk.bf16.vlgmr.msra.gmra.mrb[56].mxu1 %vm1024_vm2, %v1390_v27 }
 0x253   :  { %2560 = vmatpush3.bf16.msra.mxu1 %v2614_v19  ;;  %2561 = vmatprep.mubr.msk.bf16.mxu1 %vm2744_vm1, %v2743_v0  ;;  %v1375_v9 = vmul.f32 %v2740_v46, %v3233_v11 }
 0x254   :  { %v1391_v56 = vpack.c.bf16 %v1374_v23, %v1373_v24 }
 0x255   :  { %v2742_v51 = vpop.eup %2741 }
 0x256   :  { %v1376_v29 = vmul.f32 %v2742_v51, %v3239_v2  ;;  %2556 = vmatmul.mubr.msk.bf16.vlgmr.msra.gmra.mrb[60].mxu0 %vm1024_vm2, %v1391_v56 }
 0x258   :  { %v1392_v1 = vpack.c.bf16 %v1376_v29, %v1375_v9 }
 0x25a   :  { %2562 = vmatmul.mubr.msk.bf16.vlgmr.msra.gmra.mrb[60].mxu1 %vm1024_vm2, %v1392_v1 }
 0x2f1   :  { %v1436_v4 = vpop.f32.mrb[32].mxu0 }
 0x2f2   :  { %2193 = vst.msk [vmem:[%s3504_s3] sm:$0xff] %vm121_vm0, %v1436_v4  ;;  %v2473_v58 = vpop.f32.mrb[33].mxu0 }
 0x2f3   :  { %v1439_v39 = vpop.f32.mrb[34].mxu0 }
 0x2f4   :  { %2194 = vst.msk [vmem:[%s3504_s3 + $0x8] sm:$0xff] %vm121_vm0, %v1439_v39  ;;  %v2474_v0 = vpop.f32.mrb[35].mxu0 }
 0x2f5   :  { %v1486_v11 = vpop.f32.mrb[32].mxu1 }
 0x2f6   :  { %2195 = vst.msk [vmem:[%s3504_s3 + $0x10] sm:$0xff] %vm121_vm0, %v1486_v11  ;;  %v2479_v2 = vpop.f32.mrb[33].mxu1 }
 0x2f7   :  { %v1489_v52 = vpop.f32.mrb[34].mxu1 }
 0x2f8   :  { %2196 = vst.msk [vmem:[%s3504_s3 + $0x18] sm:$0xff] %vm121_vm0, %v1489_v52  ;;  %v2480_v22 = vpop.f32.mrb[35].mxu1 }
 0x2f9   :  { %v1536_v16 = vpop.f32.mrb[36].mxu0 }
 0x2fa   :  { %2197 = vst.msk [vmem:[%s3504_s3 + $0x20] sm:$0xff] %vm121_vm0, %v1536_v16  ;;  %v2485_v49 = vpop.f32.mrb[37].mxu0 }
 0x2fb   :  { %v1539_v32 = vpop.f32.mrb[38].mxu0 }
 0x2fc   :  { %2198 = vst.msk [vmem:[%s3504_s3 + $0x28] sm:$0xff] %vm121_vm0, %v1539_v32  ;;  %v2486_v43 = vpop.f32.mrb[39].mxu0 }
 0x2fd   :  { %v1586_v26 = vpop.f32.mrb[36].mxu1 }
 0x2fe   :  { %2199 = vst.msk [vmem:[%s3504_s3 + $0x30] sm:$0xff] %vm121_vm0, %v1586_v26  ;;  %v2491_v53 = vpop.f32.mrb[37].mxu1 }
 0x2ff   :  { %v1589_v31 = vpop.f32.mrb[38].mxu1 }
 0x300   :  { %2200 = vst.msk [vmem:[%s3504_s3 + $0x38] sm:$0xff] %vm121_vm0, %v1589_v31  ;;  %v2492_v8 = vpop.f32.mrb[39].mxu1 }
 0x301   :  { %v1636_v55 = vpop.f32.mrb[40].mxu0 }
 0x302   :  { %2201 = vst.msk [vmem:[%s3504_s3 + $0x40] sm:$0xff] %vm121_vm0, %v1636_v55  ;;  %v2497_v15 = vpop.f32.mrb[41].mxu0 }
 0x303   :  { %v1639_v36 = vpop.f32.mrb[42].mxu0 }
 0x304   :  { %2202 = vst.msk [vmem:[%s3504_s3 + $0x48] sm:$0xff] %vm121_vm0, %v1639_v36  ;;  %v2498_v59 = vpop.f32.mrb[43].mxu0 }
 0x305   :  { %v1686_v30 = vpop.f32.mrb[40].mxu1 }
 0x306   :  { %2203 = vst.msk [vmem:[%s3504_s3 + $0x50] sm:$0xff] %vm121_vm0, %v1686_v30  ;;  %v2503_v3 = vpop.f32.mrb[41].mxu1 }
 0x307   :  { %v1689_v44 = vpop.f32.mrb[42].mxu1 }
 0x308   :  { %2204 = vst.msk [vmem:[%s3504_s3 + $0x58] sm:$0xff] %vm121_vm0, %v1689_v44  ;;  %v2504_v63 = vpop.f32.mrb[43].mxu1 }
 0x309   :  { %v1736_v20 = vpop.f32.mrb[44].mxu0 }
 0x30a   :  { %2205 = vst.msk [vmem:[%s3504_s3 + $0x60] sm:$0xff] %vm121_vm0, %v1736_v20  ;;  %v2509_v21 = vpop.f32.mrb[45].mxu0 }
 0x30b   :  { %v1739_v34 = vpop.f32.mrb[46].mxu0 }
 0x30c   :  { %2206 = vst.msk [vmem:[%s3504_s3 + $0x68] sm:$0xff] %vm121_vm0, %v1739_v34  ;;  %v2510_v25 = vpop.f32.mrb[47].mxu0 }
 0x30d   :  { %v1786_v28 = vpop.f32.mrb[44].mxu1 }
 0x30e   :  { %2207 = vst.msk [vmem:[%s3504_s3 + $0x70] sm:$0xff] %vm121_vm0, %v1786_v28  ;;  %v2515_v17 = vpop.f32.mrb[45].mxu1 }
 0x30f   :  { %v1789_v48 = vpop.f32.mrb[46].mxu1 }
 0x310   :  { %2208 = vst.msk [vmem:[%s3504_s3 + $0x78] sm:$0xff] %vm121_vm0, %v1789_v48  ;;  %v2516_v6 = vpop.f32.mrb[47].mxu1 }
 0x311   :  { %v1836_v60 = vpop.f32.mrb[48].mxu0 }
 0x312   :  { %2209 = vst.msk [vmem:[%s3504_s3 + $0x80] sm:$0xff] %vm121_vm0, %v1836_v60  ;;  %v2521_v38 = vpop.f32.mrb[49].mxu0 }
 0x313   :  { %v1839_v33 = vpop.f32.mrb[50].mxu0 }
 0x314   :  { %2210 = vst.msk [vmem:[%s3504_s3 + $0x88] sm:$0xff] %vm121_vm0, %v1839_v33  ;;  %v2522_v7 = vpop.f32.mrb[51].mxu0 }
 0x315   :  { %v1886_v10 = vpop.f32.mrb[48].mxu1 }
 0x316   :  { %2211 = vst.msk [vmem:[%s3504_s3 + $0x90] sm:$0xff] %vm121_vm0, %v1886_v10  ;;  %v2527_v35 = vpop.f32.mrb[49].mxu1 }
 0x317   :  { %v1889_v5 = vpop.f32.mrb[50].mxu1 }
 0x318   :  { %2212 = vst.msk [vmem:[%s3504_s3 + $0x98] sm:$0xff] %vm121_vm0, %v1889_v5  ;;  %v2528_v14 = vpop.f32.mrb[51].mxu1 }
 0x319   :  { %v1936_v50 = vpop.f32.mrb[52].mxu0 }
 0x31a   :  { %2213 = vst.msk [vmem:[%s3504_s3 + $0xa0] sm:$0xff] %vm121_vm0, %v1936_v50  ;;  %v2533_v37 = vpop.f32.mrb[53].mxu0 }
 0x31b   :  { %v1939_v57 = vpop.f32.mrb[54].mxu0 }
 0x31c   :  { %2214 = vst.msk [vmem:[%s3504_s3 + $0xa8] sm:$0xff] %vm121_vm0, %v1939_v57  ;;  %v2534_v40 = vpop.f32.mrb[55].mxu0 }
 0x31d   :  { %v1986_v47 = vpop.f32.mrb[52].mxu1 }
 0x31e   :  { %2215 = vst.msk [vmem:[%s3504_s3 + $0xb0] sm:$0xff] %vm121_vm0, %v1986_v47  ;;  %v2539_v12 = vpop.f32.mrb[53].mxu1 }
 0x31f   :  { %v1989_v41 = vpop.f32.mrb[54].mxu1 }
 0x320   :  { %2216 = vst.msk [vmem:[%s3504_s3 + $0xb8] sm:$0xff] %vm121_vm0, %v1989_v41  ;;  %v2540_v42 = vpop.f32.mrb[55].mxu1 }
 0x321   :  { %v2036_v13 = vpop.f32.mrb[56].mxu0 }
 0x322   :  { %2217 = vst.msk [vmem:[%s3504_s3 + $0xc0] sm:$0xff] %vm121_vm0, %v2036_v13  ;;  %v2545_v45 = vpop.f32.mrb[57].mxu0 }
 0x323   :  { %v2039_v54 = vpop.f32.mrb[58].mxu0 }
 0x324   :  { %2218 = vst.msk [vmem:[%s3504_s3 + $0xc8] sm:$0xff] %vm121_vm0, %v2039_v54  ;;  %v2546_v62 = vpop.f32.mrb[59].mxu0 }
 0x325   :  { %v2086_v61 = vpop.f32.mrb[56].mxu1 }
 0x326   :  { %2219 = vst.msk [vmem:[%s3504_s3 + $0xd0] sm:$0xff] %vm121_vm0, %v2086_v61  ;;  %v2551_v19 = vpop.f32.mrb[57].mxu1 }
 0x327   :  { %v2089_v27 = vpop.f32.mrb[58].mxu1 }
 0x328   :  { %2220 = vst.msk [vmem:[%s3504_s3 + $0xd8] sm:$0xff] %vm121_vm0, %v2089_v27  ;;  %v2552_v18 = vpop.f32.mrb[59].mxu1 }
 0x329   :  { %v2136_v46 = vpop.f32.mrb[60].mxu0 }
 0x32a   :  { %2221 = vst.msk [vmem:[%s3504_s3 + $0xe0] sm:$0xff] %vm121_vm0, %v2136_v46  ;;  %v2557_v24 = vpop.f32.mrb[61].mxu0 }
 0x32b   :  { %v2139_v23 = vpop.f32.mrb[62].mxu0 }
 0x32c   :  { %2222 = vst.msk [vmem:[%s3504_s3 + $0xe8] sm:$0xff] %vm121_vm0, %v2139_v23  ;;  %v2558_v51 = vpop.f32.mrb[63].mxu0 }
 0x32d   :  { %v2186_v56 = vpop.f32.mrb[60].mxu1 }
 0x32e   :  { %2223 = vst.msk [vmem:[%s3504_s3 + $0xf0] sm:$0xff] %vm121_vm0, %v2186_v56  ;;  %v2563_v9 = vpop.f32.mrb[61].mxu1 }
 0x32f   :  { %v2189_v29 = vpop.f32.mrb[62].mxu1 }
 0x330   :  { %2224 = vst.msk [vmem:[%s3504_s3 + $0xf8] sm:$0xff] %vm121_vm0, %v2189_v29  ;;  %v2564_v1 = vpop.f32.mrb[63].mxu1 }

// kernel: vq_vae_forward.27
= control target key start
LH: loop header
LB: loop body
LE: loop exit
PB: predicated region body
PF: predicated region fallthrough
CT: control target
= control target key end

     0   :  { %vm60_vm0 = vcmask 523264   ;;  %vm116_vm1 = vcmask 261120   ;;  %s213_s1 = inlined_call_operand.vmem [shape: bf16[64,32], index: 1, kind: input, shape index: {}]   ;;  %s214_s0 = inlined_call_operand.vmem [shape: f32[32,64], index: 0, kind: input, shape index: {}]   ;;  %s215_s2 = inlined_call_operand.vmem [shape: f32[1,32], index: 2, kind: input, shape index: {}]   ;;  %s216_s3 = inlined_call_operand.vmem [shape: f32[32,32], index: 3, kind: output, shape index: {}]  }
   0x1   :  { %v150_v0 = vld [vmem:[%s213_s1] sm:$0xff]   ;;  %v151_v1 = vld [vmem:[%s213_s1 + $0x8] sm:$0xff]   ;;  %v152_v2 = vld [vmem:[%s213_s1 + $0x10] sm:$0xff]  }
   0x2   :  { %138 = vmatprep.subr.bf16.mxu0 %v150_v0  ;;  %v15_v3 = vld [vmem:[%s214_s0] sm:$0xff]  ;;  %v16_v4 = vld [vmem:[%s214_s0 + $0x8] sm:$0xff]  ;;  %v153_v6 = vld [vmem:[%s213_s1 + $0x18] sm:$0xff]  }
   0x3   :  { %139 = vmatpush3.bf16.msra.mxu0 %v150_v0  ;;  %v19_v5 = vpack.c.bf16 %v16_v4, %v15_v3  ;;  %v17_v7 = vld [vmem:[%s214_s0 + $0x10] sm:$0xff]  ;;  %v18_v8 = vld [vmem:[%s214_s0 + $0x18] sm:$0xff]  ;;  %v125_v10 = vld [vmem:[%s215_s2] ss:$0 sm:$0xff] }
   0x4   :  { %140 = vmatprep.subr.bf16.mxu0 %v151_v1  ;;  %v20_v9 = vpack.c.bf16 %v18_v8, %v17_v7 }
   0x5   :  { %146 = vmatprep.mubr.msk.bf16.mxu0 %vm60_vm0, %v19_v5 }
   0x7   :  { %141 = vmatpush3.bf16.msra.mxu0 %v151_v1 }
   0x8   :  { %142 = vmatprep.subr.bf16.mxu0 %v152_v2 }
   0xb   :  { %143 = vmatpush3.bf16.msra.mxu0 %v152_v2 }
   0xc   :  { %144 = vmatprep.subr.bf16.mxu0 %v153_v6 }
   0xf   :  { %145 = vmatpush3.bf16.msra.mxu0 %v153_v6 }
  0x12   :  { %147 = vmatmul.mubr.msk.bf16.vlgmr.msra.gmra.mrb[0].mxu0 %vm60_vm0, %v20_v9 }
  0xe5   :  { %v148_v11 = vpop.f32.mrb[0].mxu0 }
  0xe6   :  { %v110_v12 = vadd.f32 %v148_v11, %v125_v10  ;;  %v101_v13 = vpop.f32.mrb[1].mxu0 }
  0xe7   :  { %v102_v14 = vadd.f32 %v125_v10, %v101_v13  ;;  %v149_v15 = vpop.f32.mrb[2].mxu0 }
  0xe8   :  { %119 = vst.msk [vmem:[%s216_s3 + $0x10] sm:$0xff] %vm116_vm1, %v110_v12  ;;  %v113_v16 = vadd.f32 %v149_v15, %v125_v10  ;;  %v104_v17 = vpop.f32.mrb[3].mxu0 }
  0xe9   :  { %117 = vst.msk [vmem:[%s216_s3] sm:$0xff] %vm116_vm1, %v102_v14  ;;  %v105_v18 = vadd.f32 %v125_v10, %v104_v17 }
  0xea   :  { %120 = vst.msk [vmem:[%s216_s3 + $0x18] sm:$0xff] %vm116_vm1, %v113_v16 }
  0xeb   :  { %118 = vst.msk [vmem:[%s216_s3 + $0x8] sm:$0xff] %vm116_vm1, %v105_v18 }

// kernel: vq_vae_forward.30
= control target key start
LH: loop header
LB: loop body
LE: loop exit
PB: predicated region body
PF: predicated region fallthrough
CT: control target
= control target key end

     0   :  { %vm204_vm0 = vcmask 261120   ;;  %vm329_vm1 = vcmask 257024   ;;  %s550_s1 = inlined_call_operand.vmem [shape: bf16[288,32], index: 1, kind: input, shape index: {}]   ;;  %s551_s0 = inlined_call_operand.vmem [shape: bf16[32,288], index: 0, kind: input, shape index: {}]   ;;  %s552_s2 = inlined_call_operand.vmem [shape: f32[1,32], index: 2, kind: input, shape index: {}]   ;;  %s553_s3 = inlined_call_operand.vmem [shape: bf16[32,32], index: 3, kind: output, shape index: {}]  }
   0x1   :  { %v413_v0 = vld [vmem:[%s550_s1 + $0x40] sm:$0xff]   ;;  %v415_v2 = vld [vmem:[%s550_s1 + $0x48] sm:$0xff]   ;;  %v417_v4 = vld [vmem:[%s550_s1 + $0x50] sm:$0xff]  }
   0x2   :  { %v414_v1 = vld [vmem:[%s550_s1] sm:$0xff]   ;;  %373 = vmatprep.subr.bf16.mxu0 %v413_v0  ;;  %v416_v3 = vld [vmem:[%s550_s1 + $0x8] sm:$0xff]   ;;  %v418_v5 = vld [vmem:[%s550_s1 + $0x10] sm:$0xff]  }
   0x3   :  { %374 = vmatpush3.bf16.msra.mxu0 %v414_v1  ;;  %v419_v6 = vld [vmem:[%s550_s1 + $0x58] sm:$0xff]   ;;  %v421_v8 = vld [vmem:[%s550_s1 + $0x60] sm:$0xff]   ;;  %v423_v11 = vld [vmem:[%s550_s1 + $0x68] sm:$0xff]  }
   0x4   :  { %375 = vmatprep.subr.bf16.mxu0 %v415_v2  ;;  %v420_v7 = vld [vmem:[%s550_s1 + $0x18] sm:$0xff]   ;;  %v422_v9 = vld [vmem:[%s550_s1 + $0x20] sm:$0xff]   ;;  %v424_v12 = vld [vmem:[%s550_s1 + $0x28] sm:$0xff]  }
   0x5   :  { %v428_v10 = vld [vmem:[%s550_s1 + $0x80] sm:$0xff]   ;;  %v425_v13 = vld [vmem:[%s550_s1 + $0x70] sm:$0xff]   ;;  %v433_v15 = vld [vmem:[%s550_s1 + $0x88] sm:$0xff]  }
   0x6   :  { %405 = vmatprep.subr.bf16.mxu1 %v428_v10  ;;  %v432_v14 = vld [vmem:[%s551_s0 + $0x4] ss:$12 sps:$4 sm:$0xff]   ;;  %v434_v16 = vld [vmem:[%s551_s0 + $0x8] ss:$12 sps:$4 sm:$0xff]   ;;  %v435_v17 = vld [vmem:[%s551_s0 + $0x20] ss:$12 sps:$4 sm:$0xff]  }
   0x7   :  { %376 = vmatpush3.bf16.msra.mxu0 %v416_v3  ;;  %406 = vmatpush3.bf16.msra.mxu1 %v428_v10  ;;  %v426_v18 = vld [vmem:[%s550_s1 + $0x30] sm:$0xff]   ;;  %v427_v19 = vld [vmem:[%s550_s1 + $0x78] sm:$0xff]   ;;  %v430_v21 = vld [vmem:[%s551_s0] ss:$12 sps:$4 sm:$0xff]  }
   0x8   :  { %377 = vmatprep.subr.bf16.mxu0 %v417_v4  ;;  %243 = vmatprep.mubr.bf16.mxu0 %v432_v14  ;;  %v429_v20 = vld [vmem:[%s550_s1 + $0x38] sm:$0xff]   ;;  %v338_v30 = vld [vmem:[%s552_s2] ss:$0 sm:$0xff] }
   0x9   :  { %407 = vmatprep.subr.bf16.mxu1 %v433_v15  ;;  %409 = vmatprep.mubr.msk.bf16.mxu1 %vm204_vm0, %v434_v16  ;;  %v436_v22 = vld [vmem:[%s551_s0 + $0x1c] ss:$12 sps:$4 sm:$0xff]   ;;  %v438_v23 = vld [vmem:[%s551_s0 + $0x18] ss:$12 sps:$4 sm:$0xff]  }
   0xb   :  { %378 = vmatpush3.bf16.msra.mxu0 %v418_v5  ;;  %408 = vmatpush3.bf16.msra.mxu1 %v433_v15 }
   0xc   :  { %379 = vmatprep.subr.bf16.mxu0 %v419_v6 }
   0xe   :  { %410 = vmatmul.mubr.msk.bf16.vlgmr.msra.gmra.mrb[0].mxu1 %vm204_vm0, %v435_v17 }
   0xf   :  { %380 = vmatpush3.bf16.msra.mxu0 %v420_v7 }
  0x10   :  { %381 = vmatprep.subr.bf16.mxu0 %v421_v8 }
  0x13   :  { %382 = vmatpush3.bf16.msra.mxu0 %v422_v9 }
  0x14   :  { %383 = vmatprep.subr.bf16.mxu0 %v423_v11 }
  0x17   :  { %384 = vmatpush3.bf16.msra.mxu0 %v424_v12 }
  0x18   :  { %385 = vmatprep.subr.bf16.mxu0 %v425_v13 }
  0x1b   :  { %386 = vmatpush3.bf16.msra.mxu0 %v426_v18 }
  0x1c   :  { %387 = vmatprep.subr.bf16.mxu0 %v427_v19 }
  0x1f   :  { %388 = vmatpush3.bf16.msra.mxu0 %v429_v20 }
  0x22   :  { %244 = vmatmul.mubr.bf16.vlgmr.msra.gmra.mrb[0].mxu0 %v430_v21 }
  0x23   :  { %251 = vmatprep.mubr.bf16.mxu0 %v436_v22 }
  0x2a   :  { %252 = vmatmul.mubr.bf16.gmra.mrb[4].mxu0 %v438_v23 }
  0xe1   :  { %v411_v24 = vpop.f32.mrb[0].mxu1 }
  0xe2   :  { %v294_v25 = vpop.f32.mrb[1].mxu1 }
  0xe3   :  { %v412_v26 = vpop.f32.mrb[2].mxu1 }
  0xe4   :  { %v297_v27 = vpop.f32.mrb[3].mxu1 }
  0xf5   :  { %v389_v28 = vpop.f32.mrb[0].mxu0 }
  0xf6   :  { %v390_v29 = vpop.f32.mrb[1].mxu0 }
  0xf7   :  { %v391_v31 = vadd.f32 %v390_v29, %v389_v28  ;;  %v392_v32 = vpop.f32.mrb[2].mxu0 }
  0xf8   :  { %v393_v33 = vpop.f32.mrb[3].mxu0 }
  0xf9   :  { %v394_v34 = vadd.f32 %v393_v33, %v392_v32  ;;  %v246_v35 = vadd.f32 %v391_v31, %v338_v30 }
  0xfb   :  { %v295_v36 = vadd.f32 %v294_v25, %v246_v35  ;;  %v249_v37 = vadd.f32 %v394_v34, %v338_v30 }
  0xfd   :  { %v309_v38 = vmax.f32 %v295_v36, 0.0  ;;  %v298_v39 = vadd.f32 %v297_v27, %v249_v37  ;;  %v395_v40 = vpop.f32.mrb[4].mxu0 }
  0xfe   :  { %v396_v41 = vpop.f32.mrb[5].mxu0 }
  0xff   :  { %v369_v42 = vpack.c.bf16 %v309_v38, %v309_v38  ;;  %v310_v43 = vmax.f32 %v298_v39, 0.0  ;;  %v397_v44 = vadd.f32 %v396_v41, %v395_v40  ;;  %v398_v45 = vpop.f32.mrb[6].mxu0 }
 0x100   :  { %v399_v46 = vpop.f32.mrb[7].mxu0 }
 0x101   :  { %330 = vst.msk [vmem:[%s553_s3] sm:$0xf] %vm329_vm1, %v369_v42  ;;  %v370_v47 = vpack.c.bf16 %v310_v43, %v310_v43  ;;  %v254_v48 = vadd.f32 %v397_v44, %v338_v30  ;;  %v400_v49 = vadd.f32 %v399_v46, %v398_v45 }
 0x103   :  { %331 = vst.msk [vmem:[%s553_s3 + $0x4] sm:$0xf] %vm329_vm1, %v370_v47  ;;  %v303_v50 = vadd.f32 %v411_v24, %v254_v48  ;;  %v257_v51 = vadd.f32 %v400_v49, %v338_v30 }
 0x105   :  { %v311_v52 = vmax.f32 %v303_v50, 0.0  ;;  %v306_v53 = vadd.f32 %v412_v26, %v257_v51 }
 0x107   :  { %v371_v54 = vpack.c.bf16 %v311_v52, %v311_v52  ;;  %v312_v55 = vmax.f32 %v306_v53, 0.0 }
 0x109   :  { %332 = vst.msk [vmem:[%s553_s3 + $0x8] sm:$0xf] %vm329_vm1, %v371_v54  ;;  %v372_v56 = vpack.c.bf16 %v312_v55, %v312_v55 }
 0x10b   :  { %333 = vst.msk [vmem:[%s553_s3 + $0xc] sm:$0xf] %vm329_vm1, %v372_v56 }

// kernel: vq_vae_forward.33
= control target key start
LH: loop header
LB: loop body
LE: loop exit
PB: predicated region body
PF: predicated region fallthrough
CT: control target
= control target key end

     0   :  { %vm55_vm0 = vcmask 261120   ;;  %vm135_vm1 = vcmask 257024   ;;  %s239_s1 = inlined_call_operand.vmem [shape: bf16[32,32], index: 1, kind: input, shape index: {}]   ;;  %s240_s0 = inlined_call_operand.vmem [shape: bf16[32,32], index: 0, kind: input, shape index: {}]   ;;  %s241_s2 = inlined_call_operand.vmem [shape: f32[1,32], index: 2, kind: input, shape index: {}]   ;;  %s242_s3 = inlined_call_operand.vmem [shape: f32[32,32], index: 3, kind: input, shape index: {}]   ;;  %s243_s4 = inlined_call_operand.vmem [shape: bf16[32,32], index: 4, kind: output, shape index: {}]  }
   0x1   :  { %v171_v0 = vld [vmem:[%s239_s1] sm:$0xff]   ;;  %v172_v1 = vld [vmem:[%s239_s1 + $0x8] sm:$0xff]   ;;  %v113_v6 = vld [vmem:[%s242_s3 + $0x10] sm:$0xff] }
   0x2   :  { %163 = vmatprep.subr.bf16.mxu0 %v171_v0  ;;  %v173_v2 = vld [vmem:[%s240_s0] sm:$0xff]   ;;  %v174_v3 = vld [vmem:[%s240_s0 + $0x8] sm:$0xff]   ;;  %v114_v12 = vld [vmem:[%s242_s3 + $0x18] sm:$0xff] }
   0x3   :  { %164 = vmatpush3.bf16.msra.mxu0 %v171_v0  ;;  %167 = vmatprep.mubr.msk.bf16.mxu0 %vm55_vm0, %v173_v2  ;;  %v144_v4 = vld [vmem:[%s241_s2] ss:$0 sm:$0xff]  ;;  %v112_v16 = vld [vmem:[%s242_s3 + $0x8] sm:$0xff] }
   0x4   :  { %165 = vmatprep.subr.bf16.mxu0 %v172_v1  ;;  %v111_v9 = vld [vmem:[%s242_s3] sm:$0xff] }
   0x7   :  { %166 = vmatpush3.bf16.msra.mxu0 %v172_v1 }
   0xa   :  { %168 = vmatmul.mubr.msk.bf16.vlgmr.msra.gmra.mrb[0].mxu0 %vm55_vm0, %v174_v3 }
  0xdd   :  { %v169_v5 = vpop.f32.mrb[0].mxu0 }
  0xde   :  { %v105_v7 = vadd.f32 %v169_v5, %v144_v4  ;;  %v96_v8 = vpop.f32.mrb[1].mxu0 }
  0xdf   :  { %v97_v10 = vadd.f32 %v144_v4, %v96_v8  ;;  %v170_v11 = vpop.f32.mrb[2].mxu0 }
  0xe0   :  { %v117_v13 = vadd.f32 %v113_v6, %v105_v7  ;;  %v108_v14 = vadd.f32 %v170_v11, %v144_v4  ;;  %v99_v15 = vpop.f32.mrb[3].mxu0 }
  0xe1   :  { %v115_v17 = vadd.f32 %v111_v9, %v97_v10  ;;  %v100_v18 = vadd.f32 %v144_v4, %v99_v15 }
  0xe2   :  { %v157_v19 = vpack.c.bf16 %v117_v13, %v117_v13  ;;  %v118_v20 = vadd.f32 %v114_v12, %v108_v14 }
  0xe3   :  { %v155_v21 = vpack.c.bf16 %v115_v17, %v115_v17  ;;  %v116_v22 = vadd.f32 %v112_v16, %v100_v18 }
  0xe4   :  { %138 = vst.msk [vmem:[%s243_s4 + $0x8] sm:$0xf] %vm135_vm1, %v157_v19  ;;  %v158_v23 = vpack.c.bf16 %v118_v20, %v118_v20 }
  0xe5   :  { %136 = vst.msk [vmem:[%s243_s4] sm:$0xf] %vm135_vm1, %v155_v21  ;;  %v156_v24 = vpack.c.bf16 %v116_v22, %v116_v22 }
  0xe6   :  { %139 = vst.msk [vmem:[%s243_s4 + $0xc] sm:$0xf] %vm135_vm1, %v158_v23 }
  0xe7   :  { %137 = vst.msk [vmem:[%s243_s4 + $0x4] sm:$0xf] %vm135_vm1, %v156_v24 }

// kernel: vq_vae_forward.31
= control target key start
LH: loop header
LB: loop body
LE: loop exit
PB: predicated region body
PF: predicated region fallthrough
CT: control target
= control target key end

     0   :  { %vm55_vm0 = vcmask 261120   ;;  %s220_s1 = inlined_call_operand.vmem [shape: bf16[32,32], index: 1, kind: input, shape index: {}]   ;;  %s221_s0 = inlined_call_operand.vmem [shape: bf16[32,32], index: 0, kind: input, shape index: {}]   ;;  %s222_s2 = inlined_call_operand.vmem [shape: f32[1,32], index: 2, kind: input, shape index: {}]   ;;  %s223_s3 = inlined_call_operand.vmem [shape: f32[32,32], index: 3, kind: input, shape index: {}]   ;;  %s224_s4 = inlined_call_operand.vmem [shape: f32[32,32], index: 4, kind: output, shape index: {}]  }
   0x1   :  { %v146_v0 = vld [vmem:[%s220_s1] sm:$0xff]   ;;  %v147_v1 = vld [vmem:[%s220_s1 + $0x8] sm:$0xff]   ;;  %v113_v6 = vld [vmem:[%s223_s3 + $0x10] sm:$0xff] }
   0x2   :  { %138 = vmatprep.subr.bf16.mxu0 %v146_v0  ;;  %v148_v2 = vld [vmem:[%s221_s0] sm:$0xff]   ;;  %v149_v3 = vld [vmem:[%s221_s0 + $0x8] sm:$0xff]   ;;  %v114_v12 = vld [vmem:[%s223_s3 + $0x18] sm:$0xff] }
   0x3   :  { %139 = vmatpush3.bf16.msra.mxu0 %v146_v0  ;;  %142 = vmatprep.mubr.msk.bf16.mxu0 %vm55_vm0, %v148_v2  ;;  %v127_v4 = vld [vmem:[%s222_s2] ss:$0 sm:$0xff]  ;;  %v112_v16 = vld [vmem:[%s223_s3 + $0x8] sm:$0xff] }
   0x4   :  { %140 = vmatprep.subr.bf16.mxu0 %v147_v1  ;;  %v111_v9 = vld [vmem:[%s223_s3] sm:$0xff] }
   0x7   :  { %141 = vmatpush3.bf16.msra.mxu0 %v147_v1 }
   0xa   :  { %143 = vmatmul.mubr.msk.bf16.vlgmr.msra.gmra.mrb[0].mxu0 %vm55_vm0, %v149_v3 }
  0xdd   :  { %v144_v5 = vpop.f32.mrb[0].mxu0 }
  0xde   :  { %v105_v7 = vadd.f32 %v144_v5, %v127_v4  ;;  %v96_v8 = vpop.f32.mrb[1].mxu0 }
  0xdf   :  { %v97_v10 = vadd.f32 %v127_v4, %v96_v8  ;;  %v145_v11 = vpop.f32.mrb[2].mxu0 }
  0xe0   :  { %v117_v13 = vadd.f32 %v113_v6, %v105_v7  ;;  %v108_v14 = vadd.f32 %v145_v11, %v127_v4  ;;  %v99_v15 = vpop.f32.mrb[3].mxu0 }
  0xe1   :  { %v115_v17 = vadd.f32 %v111_v9, %v97_v10  ;;  %v100_v18 = vadd.f32 %v127_v4, %v99_v15 }
  0xe2   :  { %121 = vst.msk [vmem:[%s224_s4 + $0x10] sm:$0xff] %vm55_vm0, %v117_v13  ;;  %v118_v19 = vadd.f32 %v114_v12, %v108_v14 }
  0xe3   :  { %119 = vst.msk [vmem:[%s224_s4] sm:$0xff] %vm55_vm0, %v115_v17  ;;  %v116_v20 = vadd.f32 %v112_v16, %v100_v18 }
  0xe4   :  { %122 = vst.msk [vmem:[%s224_s4 + $0x18] sm:$0xff] %vm55_vm0, %v118_v19 }
  0xe5   :  { %120 = vst.msk [vmem:[%s224_s4 + $0x8] sm:$0xff] %vm55_vm0, %v116_v20 }

// kernel: vq_vae_forward.34
= control target key start
LH: loop header
LB: loop body
LE: loop exit
PB: predicated region body
PF: predicated region fallthrough
CT: control target
= control target key end

     0   :  { %vm204_vm0 = vcmask 261120   ;;  %s517_s1 = inlined_call_operand.vmem [shape: bf16[288,128], index: 1, kind: input, shape index: {}]   ;;  %s518_s0 = inlined_call_operand.vmem [shape: bf16[32,288], index: 0, kind: input, shape index: {}]   ;;  %s519_s2 = inlined_call_operand.vmem [shape: f32[1,128], index: 2, kind: input, shape index: {}]   ;;  %s520_s3 = inlined_call_operand.vmem [shape: f32[32,128], index: 3, kind: output, shape index: {}]  }
   0x1   :  { %v384_v0 = vld [vmem:[%s517_s1 + $0x40] sm:$0xff]   ;;  %v386_v2 = vld [vmem:[%s517_s1 + $0x48] sm:$0xff]   ;;  %v388_v4 = vld [vmem:[%s517_s1 + $0x50] sm:$0xff]  }
   0x2   :  { %v385_v1 = vld [vmem:[%s517_s1] sm:$0xff]   ;;  %344 = vmatprep.subr.bf16.mxu0 %v384_v0  ;;  %v387_v3 = vld [vmem:[%s517_s1 + $0x8] sm:$0xff]   ;;  %v389_v5 = vld [vmem:[%s517_s1 + $0x10] sm:$0xff]  }
   0x3   :  { %345 = vmatpush3.bf16.msra.mxu0 %v385_v1  ;;  %v390_v6 = vld [vmem:[%s517_s1 + $0x58] sm:$0xff]   ;;  %v392_v8 = vld [vmem:[%s517_s1 + $0x60] sm:$0xff]   ;;  %v394_v11 = vld [vmem:[%s517_s1 + $0x68] sm:$0xff]  }
   0x4   :  { %346 = vmatprep.subr.bf16.mxu0 %v386_v2  ;;  %v391_v7 = vld [vmem:[%s517_s1 + $0x18] sm:$0xff]   ;;  %v393_v9 = vld [vmem:[%s517_s1 + $0x20] sm:$0xff]   ;;  %v395_v12 = vld [vmem:[%s517_s1 + $0x28] sm:$0xff]  }
   0x5   :  { %v399_v10 = vld [vmem:[%s517_s1 + $0x80] sm:$0xff]   ;;  %v396_v13 = vld [vmem:[%s517_s1 + $0x70] sm:$0xff]   ;;  %v404_v15 = vld [vmem:[%s517_s1 + $0x88] sm:$0xff]  }
   0x6   :  { %376 = vmatprep.subr.bf16.mxu1 %v399_v10  ;;  %v403_v14 = vld [vmem:[%s518_s0 + $0x4] ss:$12 sps:$4 sm:$0xff]   ;;  %v405_v16 = vld [vmem:[%s518_s0 + $0x8] ss:$12 sps:$4 sm:$0xff]   ;;  %v406_v17 = vld [vmem:[%s518_s0 + $0x20] ss:$12 sps:$4 sm:$0xff]  }
   0x7   :  { %347 = vmatpush3.bf16.msra.mxu0 %v387_v3  ;;  %377 = vmatpush3.bf16.msra.mxu1 %v399_v10  ;;  %v397_v18 = vld [vmem:[%s517_s1 + $0x30] sm:$0xff]   ;;  %v398_v19 = vld [vmem:[%s517_s1 + $0x78] sm:$0xff]   ;;  %v401_v21 = vld [vmem:[%s518_s0] ss:$12 sps:$4 sm:$0xff]  }
   0x8   :  { %348 = vmatprep.subr.bf16.mxu0 %v388_v4  ;;  %243 = vmatprep.mubr.bf16.mxu0 %v403_v14  ;;  %v400_v20 = vld [vmem:[%s517_s1 + $0x38] sm:$0xff]   ;;  %v317_v30 = vld [vmem:[%s519_s2] ss:$0 sm:$0xff] }
   0x9   :  { %378 = vmatprep.subr.bf16.mxu1 %v404_v15  ;;  %380 = vmatprep.mubr.msk.bf16.mxu1 %vm204_vm0, %v405_v16  ;;  %v407_v22 = vld [vmem:[%s518_s0 + $0x1c] ss:$12 sps:$4 sm:$0xff]   ;;  %v409_v23 = vld [vmem:[%s518_s0 + $0x18] ss:$12 sps:$4 sm:$0xff]  }
   0xb   :  { %349 = vmatpush3.bf16.msra.mxu0 %v389_v5  ;;  %379 = vmatpush3.bf16.msra.mxu1 %v404_v15 }
   0xc   :  { %350 = vmatprep.subr.bf16.mxu0 %v390_v6 }
   0xe   :  { %381 = vmatmul.mubr.msk.bf16.vlgmr.msra.gmra.mrb[0].mxu1 %vm204_vm0, %v406_v17 }
   0xf   :  { %351 = vmatpush3.bf16.msra.mxu0 %v391_v7 }
  0x10   :  { %352 = vmatprep.subr.bf16.mxu0 %v392_v8 }
  0x13   :  { %353 = vmatpush3.bf16.msra.mxu0 %v393_v9 }
  0x14   :  { %354 = vmatprep.subr.bf16.mxu0 %v394_v11 }
  0x17   :  { %355 = vmatpush3.bf16.msra.mxu0 %v395_v12 }
  0x18   :  { %356 = vmatprep.subr.bf16.mxu0 %v396_v13 }
  0x1b   :  { %357 = vmatpush3.bf16.msra.mxu0 %v397_v18 }
  0x1c   :  { %358 = vmatprep.subr.bf16.mxu0 %v398_v19 }
  0x1f   :  { %359 = vmatpush3.bf16.msra.mxu0 %v400_v20 }
  0x22   :  { %244 = vmatmul.mubr.bf16.vlgmr.msra.gmra.mrb[0].mxu0 %v401_v21 }
  0x23   :  { %251 = vmatprep.mubr.bf16.mxu0 %v407_v22 }
  0x2a   :  { %252 = vmatmul.mubr.bf16.gmra.mrb[4].mxu0 %v409_v23 }
  0xe1   :  { %v382_v24 = vpop.f32.mrb[0].mxu1 }
  0xe2   :  { %v294_v25 = vpop.f32.mrb[1].mxu1 }
  0xe3   :  { %v383_v26 = vpop.f32.mrb[2].mxu1 }
  0xe4   :  { %v297_v27 = vpop.f32.mrb[3].mxu1 }
  0xf5   :  { %v360_v28 = vpop.f32.mrb[0].mxu0 }
  0xf6   :  { %v361_v29 = vpop.f32.mrb[1].mxu0 }
  0xf7   :  { %v362_v31 = vadd.f32 %v361_v29, %v360_v28  ;;  %v363_v32 = vpop.f32.mrb[2].mxu0 }
  0xf8   :  { %v364_v33 = vpop.f32.mrb[3].mxu0 }
  0xf9   :  { %v365_v34 = vadd.f32 %v364_v33, %v363_v32  ;;  %v246_v35 = vadd.f32 %v362_v31, %v317_v30 }
  0xfb   :  { %v295_v36 = vadd.f32 %v294_v25, %v246_v35  ;;  %v249_v37 = vadd.f32 %v365_v34, %v317_v30 }
  0xfd   :  { %309 = vst [vmem:[%s520_s3] sm:$0xff] %v295_v36  ;;  %v298_v38 = vadd.f32 %v297_v27, %v249_v37  ;;  %v366_v39 = vpop.f32.mrb[4].mxu0 }
  0xfe   :  { %v367_v40 = vpop.f32.mrb[5].mxu0 }
  0xff   :  { %310 = vst [vmem:[%s520_s3 + $0x8] sm:$0xff] %v298_v38  ;;  %v368_v41 = vadd.f32 %v367_v40, %v366_v39  ;;  %v369_v42 = vpop.f32.mrb[6].mxu0 }
 0x100   :  { %v370_v43 = vpop.f32.mrb[7].mxu0 }
 0x101   :  { %v254_v44 = vadd.f32 %v368_v41, %v317_v30  ;;  %v371_v45 = vadd.f32 %v370_v43, %v369_v42 }
 0x103   :  { %v303_v46 = vadd.f32 %v382_v24, %v254_v44  ;;  %v257_v47 = vadd.f32 %v371_v45, %v317_v30 }
 0x105   :  { %311 = vst [vmem:[%s520_s3 + $0x10] sm:$0xff] %v303_v46  ;;  %v306_v48 = vadd.f32 %v383_v26, %v257_v47 }
 0x107   :  { %312 = vst [vmem:[%s520_s3 + $0x18] sm:$0xff] %v306_v48 }

// kernel: vq_vae_forward.35
= control target key start
LH: loop header
LB: loop body
LE: loop exit
PB: predicated region body
PF: predicated region fallthrough
CT: control target
= control target key end

     0   :  { %vm318_vm0 = vcmask 261120   ;;  %vm537_vm1 = vcmask 97280   ;;  %s1020_s1 = inlined_call_operand.vmem [shape: bf16[288,12], index: 1, kind: input, shape index: {}]   ;;  %s1021_s0 = inlined_call_operand.vmem [shape: bf16[128,288], index: 0, kind: input, shape index: {}]   ;;  %s1022_s2 = inlined_call_operand.vmem [shape: f32[1,12], index: 2, kind: input, shape index: {}]   ;;  %s1023_s3 = inlined_call_operand.vmem [shape: f32[128,12], index: 3, kind: output, shape index: {}]  }
   0x1   :  { %v719_v0 = vld [vmem:[%s1020_s1 + $0x40] sm:$0xff]   ;;  %v721_v2 = vld [vmem:[%s1020_s1 + $0x48] sm:$0xff]   ;;  %v723_v4 = vld [vmem:[%s1020_s1 + $0x50] sm:$0xff]  }
   0x2   :  { %v720_v1 = vld [vmem:[%s1020_s1] sm:$0xff]   ;;  %609 = vmatprep.subr.bf16.mxu0 %v719_v0  ;;  %703 = vmatprep.subr.bf16.mxu1 %v719_v0  ;;  %v722_v3 = vld [vmem:[%s1020_s1 + $0x8] sm:$0xff]   ;;  %v724_v5 = vld [vmem:[%s1020_s1 + $0x10] sm:$0xff]  }
   0x3   :  { %610 = vmatpush3.bf16.msra.mxu0 %v720_v1  ;;  %711 = vmatpush3.bf16.msra.mxu1 %v720_v1  ;;  %v725_v6 = vld [vmem:[%s1020_s1 + $0x58] sm:$0xff]   ;;  %v727_v8 = vld [vmem:[%s1020_s1 + $0x60] sm:$0xff]   ;;  %v729_v10 = vld [vmem:[%s1020_s1 + $0x68] sm:$0xff]  }
   0x4   :  { %611 = vmatprep.subr.bf16.mxu0 %v721_v2  ;;  %704 = vmatprep.subr.bf16.mxu1 %v721_v2  ;;  %v726_v7 = vld [vmem:[%s1020_s1 + $0x18] sm:$0xff]   ;;  %v728_v9 = vld [vmem:[%s1020_s1 + $0x20] sm:$0xff]   ;;  %v730_v13 = vld [vmem:[%s1020_s1 + $0x28] sm:$0xff]  }
   0x5   :  { %v737_v11 = vld [vmem:[%s1021_s0 + $0x4] ss:$12 sps:$4 sm:$0xff]   ;;  %v740_v12 = vld [vmem:[%s1021_s0 + $0x94] ss:$12 sps:$4 sm:$0xff]   ;;  %v733_v16 = vld [vmem:[%s1020_s1 + $0x78] sm:$0xff]  }
   0x6   :  { %v731_v14 = vld [vmem:[%s1020_s1 + $0x70] sm:$0xff]   ;;  %375 = vmatprep.mubr.bf16.mxu0 %v737_v11  ;;  %423 = vmatprep.mubr.bf16.mxu1 %v740_v12  ;;  %v734_v17 = vld [vmem:[%s1020_s1 + $0x38] sm:$0xff]   ;;  %v735_v18 = vld [vmem:[%s1021_s0] ss:$12 sps:$4 sm:$0xff]  }
   0x7   :  { %612 = vmatpush3.bf16.msra.mxu0 %v722_v3  ;;  %712 = vmatpush3.bf16.msra.mxu1 %v722_v3  ;;  %v732_v15 = vld [vmem:[%s1020_s1 + $0x30] sm:$0xff]   ;;  %v741_v19 = vld [vmem:[%s1020_s1 + $0x80] sm:$0xff]   ;;  %v742_v21 = vld [vmem:[%s1021_s0 + $0x1c] ss:$12 sps:$4 sm:$0xff]  }
   0x8   :  { %613 = vmatprep.subr.bf16.mxu0 %v723_v4  ;;  %705 = vmatprep.subr.bf16.mxu1 %v723_v4  ;;  %v738_v20 = vld [vmem:[%s1021_s0 + $0x90] ss:$12 sps:$4 sm:$0xff]   ;;  %v744_v22 = vld [vmem:[%s1021_s0 + $0xac] ss:$12 sps:$4 sm:$0xff]   ;;  %v747_v25 = vld [vmem:[%s1021_s0 + $0xa8] ss:$12 sps:$4 sm:$0xff]  }
   0x9   :  { %v748_v23 = vld [vmem:[%s1020_s1 + $0x88] sm:$0xff]   ;;  %v746_v24 = vld [vmem:[%s1021_s0 + $0x18] ss:$12 sps:$4 sm:$0xff]   ;;  %v749_v26 = vld [vmem:[%s1021_s0 + $0x34] ss:$12 sps:$4 sm:$0xff]  }
   0xa   :  { %v751_v27 = vld [vmem:[%s1021_s0 + $0x8] ss:$12 sps:$4 sm:$0xff]   ;;  %v752_v28 = vld [vmem:[%s1021_s0 + $0x30] ss:$12 sps:$4 sm:$0xff]   ;;  %v753_v29 = vld [vmem:[%s1021_s0 + $0x20] ss:$12 sps:$4 sm:$0xff]  }
   0xb   :  { %614 = vmatpush3.bf16.msra.mxu0 %v724_v5  ;;  %713 = vmatpush3.bf16.msra.mxu1 %v724_v5  ;;  %v754_v30 = vld [vmem:[%s1021_s0 + $0x4c] ss:$12 sps:$4 sm:$0xff]   ;;  %v757_v32 = vld [vmem:[%s1021_s0 + $0x48] ss:$12 sps:$4 sm:$0xff]   ;;  %v758_v33 = vld [vmem:[%s1021_s0 + $0x50] ss:$12 sps:$4 sm:$0xff]  }
   0xc   :  { %615 = vmatprep.subr.bf16.mxu0 %v725_v6  ;;  %706 = vmatprep.subr.bf16.mxu1 %v725_v6  ;;  %v756_v31 = vld [vmem:[%s1021_s0 + $0x38] ss:$12 sps:$4 sm:$0xff]   ;;  %v761_v35 = vld [vmem:[%s1021_s0 + $0x68] ss:$12 sps:$4 sm:$0xff]   ;;  %v762_v36 = vld [vmem:[%s1021_s0 + $0x60] ss:$12 sps:$4 sm:$0xff]  }
   0xd   :  { %v759_v34 = vld [vmem:[%s1021_s0 + $0x64] ss:$12 sps:$4 sm:$0xff]   ;;  %v763_v37 = vld [vmem:[%s1021_s0 + $0x80] ss:$12 sps:$4 sm:$0xff]   ;;  %v764_v38 = vld [vmem:[%s1021_s0 + $0x7c] ss:$12 sps:$4 sm:$0xff]  }
   0xe   :  { %v766_v39 = vld [vmem:[%s1021_s0 + $0x98] ss:$12 sps:$4 sm:$0xff]   ;;  %v768_v41 = vld [vmem:[%s1021_s0 + $0xb0] ss:$12 sps:$4 sm:$0xff]   ;;  %v934_v2 = vld [vmem:[%s1022_s2] ss:$0 sm:$0xff] }
   0xf   :  { %616 = vmatpush3.bf16.msra.mxu0 %v726_v7  ;;  %714 = vmatpush3.bf16.msra.mxu1 %v726_v7  ;;  %v767_v40 = vld [vmem:[%s1021_s0 + $0x78] ss:$12 sps:$4 sm:$0xff]  }
  0x10   :  { %617 = vmatprep.subr.bf16.mxu0 %v727_v8  ;;  %707 = vmatprep.subr.bf16.mxu1 %v727_v8 }
  0x13   :  { %618 = vmatpush3.bf16.msra.mxu0 %v728_v9  ;;  %715 = vmatpush3.bf16.msra.mxu1 %v728_v9 }
  0x14   :  { %619 = vmatprep.subr.bf16.mxu0 %v729_v10  ;;  %708 = vmatprep.subr.bf16.mxu1 %v729_v10 }
  0x17   :  { %620 = vmatpush3.bf16.msra.mxu0 %v730_v13  ;;  %716 = vmatpush3.bf16.msra.mxu1 %v730_v13 }
  0x18   :  { %621 = vmatprep.subr.bf16.mxu0 %v731_v14  ;;  %709 = vmatprep.subr.bf16.mxu1 %v731_v14 }
  0x1b   :  { %622 = vmatpush3.bf16.msra.mxu0 %v732_v15  ;;  %717 = vmatpush3.bf16.msra.mxu1 %v732_v15 }
  0x1c   :  { %623 = vmatprep.subr.bf16.mxu0 %v733_v16  ;;  %710 = vmatprep.subr.bf16.mxu1 %v733_v16 }
  0x1f   :  { %624 = vmatpush3.bf16.msra.mxu0 %v734_v17  ;;  %718 = vmatpush3.bf16.msra.mxu1 %v734_v17 }
  0x20   :  { %683 = vmatprep.subr.bf16.mxu1 %v741_v19 }
  0x22   :  { %376 = vmatmul.mubr.bf16.vlgmr.msra.gmra.mrb[0].mxu0 %v735_v18  ;;  %424 = vmatmul.mubr.bf16.vlgmr.msra.gmra.mrb[0].mxu1 %v738_v20 }
  0x23   :  { %684 = vmatpush3.bf16.msra.mxu1 %v741_v19  ;;  %383 = vmatprep.mubr.bf16.mxu0 %v742_v21 }
  0x24   :  { %431 = vmatprep.mubr.bf16.mxu1 %v744_v22  ;;  %685 = vmatprep.subr.bf16.mxu1 %v748_v23 }
  0x27   :  { %686 = vmatpush3.bf16.msra.mxu1 %v748_v23 }
  0x2a   :  { %384 = vmatmul.mubr.bf16.gmra.mrb[4].mxu0 %v746_v24  ;;  %432 = vmatmul.mubr.bf16.gmra.mrb[4].mxu1 %v747_v25 }
  0x2b   :  { %391 = vmatprep.mubr.bf16.mxu0 %v749_v26  ;;  %687 = vmatprep.mubr.msk.bf16.mxu1 %vm318_vm0, %v751_v27 }
  0x32   :  { %392 = vmatmul.mubr.bf16.gmra.mrb[8].mxu0 %v752_v28  ;;  %688 = vmatmul.mubr.msk.bf16.vlgmr.msra.gmra.mrb[8].mxu1 %vm318_vm0, %v753_v29 }
  0x33   :  { %399 = vmatprep.mubr.bf16.mxu0 %v754_v30  ;;  %691 = vmatprep.mubr.msk.bf16.mxu1 %vm318_vm0, %v756_v31 }
  0x3a   :  { %400 = vmatmul.mubr.bf16.gmra.mrb[12].mxu0 %v757_v32  ;;  %692 = vmatmul.mubr.msk.bf16.gmra.mrb[12].mxu1 %vm318_vm0, %v758_v33 }
  0x3b   :  { %407 = vmatprep.mubr.bf16.mxu0 %v759_v34  ;;  %695 = vmatprep.mubr.msk.bf16.mxu1 %vm318_vm0, %v761_v35 }
  0x42   :  { %408 = vmatmul.mubr.bf16.gmra.mrb[16].mxu0 %v762_v36  ;;  %696 = vmatmul.mubr.msk.bf16.gmra.mrb[16].mxu1 %vm318_vm0, %v763_v37 }
  0x43   :  { %415 = vmatprep.mubr.bf16.mxu0 %v764_v38  ;;  %699 = vmatprep.mubr.msk.bf16.mxu1 %vm318_vm0, %v766_v39 }
  0x4a   :  { %416 = vmatmul.mubr.bf16.gmra.mrb[20].mxu0 %v767_v40  ;;  %700 = vmatmul.mubr.msk.bf16.gmra.mrb[20].mxu1 %vm318_vm0, %v768_v41 }
  0xf5   :  { %v625_v42 = vpop.f32.mrb[0].mxu0  ;;  %v661_v43 = vpop.f32.mrb[0].mxu1 }
  0xf6   :  { %v626_v44 = vpop.f32.mrb[1].mxu0  ;;  %v662_v45 = vpop.f32.mrb[1].mxu1 }
  0xf7   :  { %v627_v46 = vadd.f32 %v626_v44, %v625_v42  ;;  %v628_v47 = vpop.f32.mrb[2].mxu0  ;;  %v923_v48 = vadd.f32 %v662_v45, %v661_v43  ;;  %v664_v49 = vpop.f32.mrb[2].mxu1 }
  0xf8   :  { %v629_v50 = vpop.f32.mrb[3].mxu0  ;;  %v665_v51 = vpop.f32.mrb[3].mxu1 }
  0xf9   :  { %v630_v52 = vadd.f32 %v629_v50, %v628_v47  ;;  %v925_v53 = vadd.f32 %v665_v51, %v664_v49  ;;  %v378_v6 = vadd.f32 %v627_v46, %v934_v2 }
  0xfb   :  { %v381_v15 = vadd.f32 %v630_v52, %v934_v2 }
  0xfd   :  { %v631_v54 = vpop.f32.mrb[4].mxu0  ;;  %v667_v55 = vpop.f32.mrb[4].mxu1 }
  0xfe   :  { %v632_v56 = vpop.f32.mrb[5].mxu0  ;;  %v668_v57 = vpop.f32.mrb[5].mxu1 }
  0xff   :  { %v633_v58 = vadd.f32 %v632_v56, %v631_v54  ;;  %v634_v59 = vpop.f32.mrb[6].mxu0  ;;  %v927_v60 = vadd.f32 %v668_v57, %v667_v55  ;;  %v670_v61 = vpop.f32.mrb[6].mxu1 }
 0x100   :  { %v635_v62 = vpop.f32.mrb[7].mxu0  ;;  %v671_v63 = vpop.f32.mrb[7].mxu1 }
 0x101   :  { %v636_v0 = vadd.f32 %v635_v62, %v634_v59  ;;  %v929_v1 = vadd.f32 %v671_v63, %v670_v61  ;;  %v386_v3 = vadd.f32 %v633_v58, %v934_v2  ;;  %v434_v54 = vadd.f32 %v927_v60, %v934_v2 }
 0x102   :  { %v426_v58 = vadd.f32 %v923_v48, %v934_v2 }
 0x103   :  { %v389_v10 = vadd.f32 %v636_v0, %v934_v2  ;;  %v437_v63 = vadd.f32 %v929_v1, %v934_v2 }
 0x105   :  { %v637_v4 = vpop.f32.mrb[8].mxu0  ;;  %v689_v5 = vpop.f32.mrb[8].mxu1 }
 0x106   :  { %v483_v7 = vadd.f32 %v689_v5, %v386_v3  ;;  %v638_v8 = vpop.f32.mrb[9].mxu0  ;;  %v474_v9 = vpop.f32.mrb[9].mxu1  ;;  %v429_v5 = vadd.f32 %v925_v53, %v934_v2 }
 0x107   :  { %v639_v11 = vadd.f32 %v638_v8, %v637_v4  ;;  %v475_v12 = vadd.f32 %v474_v9, %v378_v6  ;;  %v640_v13 = vpop.f32.mrb[10].mxu0  ;;  %v690_v14 = vpop.f32.mrb[10].mxu1 }
 0x108   :  { %540 = vst.msk [vmem:[%s1023_s3 + $0x10] sm:$0xff] %vm537_vm1, %v483_v7  ;;  %v486_v16 = vadd.f32 %v690_v14, %v389_v10  ;;  %v641_v17 = vpop.f32.mrb[11].mxu0  ;;  %v477_v18 = vpop.f32.mrb[11].mxu1 }
 0x109   :  { %538 = vst.msk [vmem:[%s1023_s3] sm:$0xff] %vm537_vm1, %v475_v12  ;;  %v642_v19 = vadd.f32 %v641_v17, %v640_v13  ;;  %v478_v20 = vadd.f32 %v477_v18, %v381_v15  ;;  %v394_v23 = vadd.f32 %v639_v11, %v934_v2 }
 0x10a   :  { %541 = vst.msk [vmem:[%s1023_s3 + $0x18] sm:$0xff] %vm537_vm1, %v486_v16 }
 0x10b   :  { %539 = vst.msk [vmem:[%s1023_s3 + $0x8] sm:$0xff] %vm537_vm1, %v478_v20  ;;  %v397_v30 = vadd.f32 %v642_v19, %v934_v2 }
 0x10d   :  { %v643_v21 = vpop.f32.mrb[12].mxu0  ;;  %v693_v22 = vpop.f32.mrb[12].mxu1 }
 0x10e   :  { %v644_v24 = vpop.f32.mrb[13].mxu0  ;;  %v490_v25 = vpop.f32.mrb[13].mxu1 }
 0x10f   :  { %v645_v26 = vadd.f32 %v644_v24, %v643_v21  ;;  %v491_v27 = vadd.f32 %v490_v25, %v394_v23  ;;  %v646_v28 = vpop.f32.mrb[14].mxu0  ;;  %v694_v29 = vpop.f32.mrb[14].mxu1 }
 0x110   :  { %v647_v31 = vpop.f32.mrb[15].mxu0  ;;  %v493_v32 = vpop.f32.mrb[15].mxu1 }
 0x111   :  { %v402_v33 = vadd.f32 %v645_v26, %v934_v2  ;;  %542 = vst.msk [vmem:[%s1023_s3 + $0x20] sm:$0xff] %vm537_vm1, %v491_v27  ;;  %v648_v34 = vadd.f32 %v647_v31, %v646_v28  ;;  %v494_v35 = vadd.f32 %v493_v32, %v397_v30 }
 0x113   :  { %v499_v36 = vadd.f32 %v693_v22, %v402_v33  ;;  %v405_v37 = vadd.f32 %v648_v34, %v934_v2  ;;  %543 = vst.msk [vmem:[%s1023_s3 + $0x28] sm:$0xff] %vm537_vm1, %v494_v35 }
 0x115   :  { %544 = vst.msk [vmem:[%s1023_s3 + $0x30] sm:$0xff] %vm537_vm1, %v499_v36  ;;  %v502_v38 = vadd.f32 %v694_v29, %v405_v37  ;;  %v649_v39 = vpop.f32.mrb[16].mxu0  ;;  %v697_v40 = vpop.f32.mrb[16].mxu1 }
 0x116   :  { %v650_v41 = vpop.f32.mrb[17].mxu0  ;;  %v506_v42 = vpop.f32.mrb[17].mxu1 }
 0x117   :  { %545 = vst.msk [vmem:[%s1023_s3 + $0x38] sm:$0xff] %vm537_vm1, %v502_v38  ;;  %v651_v43 = vadd.f32 %v650_v41, %v649_v39  ;;  %v652_v44 = vpop.f32.mrb[18].mxu0  ;;  %v698_v45 = vpop.f32.mrb[18].mxu1 }
 0x118   :  { %v653_v46 = vpop.f32.mrb[19].mxu0  ;;  %v509_v47 = vpop.f32.mrb[19].mxu1 }
 0x119   :  { %v410_v49 = vadd.f32 %v651_v43, %v934_v2  ;;  %v654_v50 = vadd.f32 %v653_v46, %v652_v44 }
 0x11b   :  { %v507_v51 = vadd.f32 %v506_v42, %v410_v49  ;;  %v413_v52 = vadd.f32 %v654_v50, %v934_v2 }
 0x11d   :  { %546 = vst.msk [vmem:[%s1023_s3 + $0x40] sm:$0xff] %vm537_vm1, %v507_v51  ;;  %v510_v55 = vadd.f32 %v509_v47, %v413_v52  ;;  %v655_v56 = vpop.f32.mrb[20].mxu0  ;;  %v701_v57 = vpop.f32.mrb[20].mxu1 }
 0x11e   :  { %v531_v59 = vadd.f32 %v701_v57, %v434_v54  ;;  %v656_v61 = vpop.f32.mrb[21].mxu0  ;;  %v522_v62 = vpop.f32.mrb[21].mxu1 }
 0x11f   :  { %547 = vst.msk [vmem:[%s1023_s3 + $0x48] sm:$0xff] %vm537_vm1, %v510_v55  ;;  %v657_v60 = vadd.f32 %v656_v61, %v655_v56  ;;  %v523_v0 = vadd.f32 %v522_v62, %v426_v58  ;;  %v658_v3 = vpop.f32.mrb[22].mxu0  ;;  %v702_v4 = vpop.f32.mrb[22].mxu1 }
 0x120   :  { %552 = vst.msk [vmem:[%s1023_s3 + $0x70] sm:$0xff] %vm537_vm1, %v531_v59  ;;  %v534_v48 = vadd.f32 %v702_v4, %v437_v63  ;;  %v659_v6 = vpop.f32.mrb[23].mxu0  ;;  %v525_v1 = vpop.f32.mrb[23].mxu1 }
 0x121   :  { %v418_v7 = vadd.f32 %v657_v60, %v934_v2  ;;  %550 = vst.msk [vmem:[%s1023_s3 + $0x60] sm:$0xff] %vm537_vm1, %v523_v0  ;;  %v660_v8 = vadd.f32 %v659_v6, %v658_v3  ;;  %v526_v9 = vadd.f32 %v525_v1, %v429_v5 }
 0x122   :  { %553 = vst.msk [vmem:[%s1023_s3 + $0x78] sm:$0xff] %vm537_vm1, %v534_v48 }
 0x123   :  { %v515_v53 = vadd.f32 %v697_v40, %v418_v7  ;;  %v421_v10 = vadd.f32 %v660_v8, %v934_v2  ;;  %551 = vst.msk [vmem:[%s1023_s3 + $0x68] sm:$0xff] %vm537_vm1, %v526_v9 }
 0x125   :  { %548 = vst.msk [vmem:[%s1023_s3 + $0x50] sm:$0xff] %vm537_vm1, %v515_v53  ;;  %v518_v11 = vadd.f32 %v698_v45, %v421_v10 }
 0x127   :  { %549 = vst.msk [vmem:[%s1023_s3 + $0x58] sm:$0xff] %vm537_vm1, %v518_v11 }

</bundles_post_ra>
